<compile_context>
chip_gen: v6e
topology: v6e:2x2x1
jax: 0.10.0
libtpu: 0.0.40
codegen_flags: <defaults>
</compile_context>

<pallas_src>
import jax
import jax.numpy as jnp
from jax.experimental import pallas as pl
from jax.experimental.pallas import tpu as pltpu


# ----------------------------- Pallas kernel --------------------------------


def _make_lstm_kernel(n_layers, L, Bp, H, O):
    """Fused stacked-LSTM recurrence + FC/sigmoid/softmax(dim=0) kernel."""

    def kernel(*refs):
        # ---- parse refs: inputs, output, scratch ---------------------------
        it = iter(refs)
        x_ref = next(it)            # (L*Bp, E)  time-major embeddings, f32
        lens_ref = next(it)         # (Bp, 1)    int32 lengths (0 = padded row)
        layer_refs = []
        for _ in range(n_layers):   # per layer: W_ih^T(bf16), W_hh^T(f32), b
            layer_refs.append((next(it), next(it), next(it)))
        fc_w_ref = next(it)         # (H, O)   f32
        fc_b_ref = next(it)         # (1, O)   f32
        out_ref = next(it)          # (Bp, O)  f32
        seq_ref = next(it)          # (L*Bp, H)  scratch: this layer's outputs
        xg_ref = next(it)           # (L*Bp, 4H) scratch: bulk x-projections
        h_ref = next(it)            # (Bp, H)    scratch
        c_ref = next(it)            # (Bp, H)    scratch

        # Hoisted once (JAX does not CSE broadcast_in_dim inside loops).
        lens_b = jnp.broadcast_to(lens_ref[...], (Bp, H))       # (Bp,H) int32

        # ---- stacked LSTM (layers + timesteps unrolled at trace time) ------
        for layer, (wih_ref, whh_ref, b_ref) in enumerate(layer_refs):
            inp = x_ref[...] if layer == 0 else seq_ref[...]
            # Bulk input projection for ALL timesteps at once (no recurrence
            # dependency): one (L*Bp, in) x (in, 4H) bf16 MXU matmul, f32 acc.
            xg_ref[...] = jnp.dot(
                inp.astype(jnp.bfloat16), wih_ref[...],
                preferred_element_type=jnp.float32) + b_ref[...]

            h_ref[...] = jnp.zeros_like(h_ref)
            c_ref[...] = jnp.zeros_like(c_ref)

            # TODO(synk): for long L switch to lax.fori_loop(..., unroll=2..4)
            # to bound vreg live ranges; at L=8 a static unroll is fine.
            for t in range(L):
                r0 = t * Bp            # static multiple of 8 -> aligned slab
                # Recurrent projection kept in f32 (tiny MXU op; no per-step
                # cast on the serial dependency chain).
                g = xg_ref[r0:r0 + Bp, :] + jnp.dot(
                    h_ref[...], whh_ref[...],
                    preferred_element_type=jnp.float32)         # (Bp, 4H) f32
                # One full-width sigmoid over the 128-lane gate vector, slice
                # afterwards; tanh only on the g-gate. PyTorch order i,f,g,o.
                s = 1.0 / (1.0 + jnp.exp(-g))
                i_g = s[:, 0:H]
                f_g = s[:, H:2 * H]
                o_g = s[:, 3 * H:4 * H]
                g_g = jnp.tanh(g[:, 2 * H:3 * H])
                c_new = f_g * c_ref[...] + i_g * g_g
                h_new = o_g * jnp.tanh(c_new)
                # pack_padded_sequence: freeze (h, c) once t >= len[b]; the
                # final h then equals out[b][len[b]-1], also for stacked layers.
                m = lens_b > t                                   # (Bp,H) bool
                h_ref[...] = jnp.where(m, h_new, h_ref[...])
                c_ref[...] = jnp.where(m, c_new, c_ref[...])
                seq_ref[r0:r0 + Bp, :] = h_ref[...]
            # TODO(synk): nn.LSTM inter-layer dropout is train-mode only;
            # eval/inference (identity) semantics are implemented here.

        # ---- FC + sigmoid + softmax over dim=0 (batch), exact math ---------
        # h_ref now holds out[b][len[b]-1] of the top layer for every row b.
        y = jnp.dot(h_ref[...], fc_w_ref[...],
                    preferred_element_type=jnp.float32) + fc_b_ref[...]
        y = 1.0 / (1.0 + jnp.exp(-y))                            # sigmoid
        # Padded batch rows must not enter the softmax over dim=0.
        valid = jnp.broadcast_to(lens_ref[...], (Bp, O)) > 0     # (Bp, O) bool
        y_m = jnp.where(valid, y, jnp.full_like(y, -jnp.inf))
        mx = jnp.max(y_m, axis=0, keepdims=True)                 # over batch
        e = jnp.where(valid, jnp.exp(y - mx), jnp.zeros_like(y))
        out_ref[...] = e / jnp.sum(e, axis=0, keepdims=True)

    return kernel


# ------------------------------ model wrapper --------------------------------


class LSTMPallas:
    """Deterministic-parameter JAX/Pallas port of the PyTorch LSTM module."""

    def __init__(self, name, vocab_size, output_size, embedding_dim,
                 hidden_dim, n_layers, bidirectional, dropout_prob, key):
        # TODO(synk): bidirectional=True (reverse-direction recurrence) is not
        # implemented; unidirectional path only.
        assert not bidirectional, "bidirectional LSTM path not implemented"
        self.name = name
        self.output_size = output_size
        self.embedding_dim = embedding_dim
        self.hidden_dim = hidden_dim
        self.n_layers = n_layers
        self.dropout_prob = dropout_prob   # identity at inference

        keys = jax.random.split(key, 1 + 4 * n_layers + 2)
        ki = iter(keys)

        # nn.Embedding(vocab_size, embedding_dim, padding_idx=0)
        emb = jax.random.normal(next(ki), (vocab_size, embedding_dim),
                                jnp.float32) * 0.1
        self.embedding = emb.at[0].set(0.0)            # padding row is zero

        # nn.LSTM weights, PyTorch gate order (i, f, g, o); stored transposed.
        # W_ih^T in bf16 (bulk, off-critical-path matmul); W_hh^T in f32
        # (recurrent critical path stays full precision).
        self.layers = []
        for layer in range(n_layers):
            in_dim = embedding_dim if layer == 0 else hidden_dim
            w_ih = jax.random.normal(next(ki), (4 * hidden_dim, in_dim),
                                     jnp.float32) * 0.1
            w_hh = jax.random.normal(next(ki), (4 * hidden_dim, hidden_dim),
                                     jnp.float32) * 0.1
            b_ih = jax.random.normal(next(ki), (4 * hidden_dim,),
                                     jnp.float32) * 0.1
            b_hh = jax.random.normal(next(ki), (4 * hidden_dim,),
                                     jnp.float32) * 0.1
            self.layers.append((
                w_ih.T.astype(jnp.bfloat16),                   # (in_dim, 4H)
                w_hh.T.astype(jnp.float32),                    # (H, 4H) f32
                (b_ih + b_hh).reshape(1, 4 * hidden_dim),      # (1, 4H) f32
            ))

        # nn.Linear(hidden_dim, output_size) — tiny one-shot op, keep f32.
        fc_w = jax.random.normal(next(ki), (output_size, hidden_dim),
                                 jnp.float32) * 0.1
        fc_b = jax.random.normal(next(ki), (output_size,), jnp.float32) * 0.1
        self.fc_w = fc_w.T.astype(jnp.float32)         # (H, O)
        self.fc_b = fc_b.reshape(1, output_size)       # (1, O)

    def __call__(self, seqs, lens):
        B, L = seqs.shape
        E, H, O = self.embedding_dim, self.hidden_dim, self.output_size
        Bp = ((B + 7) // 8) * 8          # pad batch to the f32 sublane tile

        # Embedding lookup (plain-JAX gather glue); padding row 0 is zero.
        # TODO(synk): at real vocab sizes, gather rows in-kernel via
        # scalar-prefetched ids + DMA instead of materializing embeds in HBM.
        embeds = self.embedding[seqs]                            # (B, L, E)
        embeds = jnp.zeros((Bp, L, E), jnp.float32).at[:B].set(embeds)
        # Time-major flat layout: each timestep is an aligned 8-row slab.
        x2d = jnp.transpose(embeds, (1, 0, 2)).reshape(L * Bp, E)
        # Lengths column replaces the old (L*B, H) mask; padded rows get 0 so
        # they stay frozen at the zero initial state and drop out of softmax.
        lens_col = jnp.zeros((Bp, 1), jnp.int32).at[:B, 0].set(
            lens.astype(jnp.int32))

        args = [x2d, lens_col]
        for wih, whh, b in self.layers:
            args.extend((wih, whh, b))
        args.extend((self.fc_w, self.fc_b))

        kernel = _make_lstm_kernel(self.n_layers, L, Bp, H, O)
        out = pl.pallas_call(
            kernel,
            out_shape=jax.ShapeDtypeStruct((Bp, O), jnp.float32),
            in_specs=[pl.BlockSpec(memory_space=pltpu.MemorySpace.VMEM)]
            * len(args),
            out_specs=pl.BlockSpec(memory_space=pltpu.MemorySpace.VMEM),
            scratch_shapes=[
                pltpu.VMEM((L * Bp, H), jnp.float32),        # layer outputs
                pltpu.VMEM((L * Bp, 4 * H), jnp.float32),    # bulk x-proj
                pltpu.VMEM((Bp, H), jnp.float32),            # h state
                pltpu.VMEM((Bp, H), jnp.float32),            # c state
            ],
            # TODO(synk): when scaling L*B, chunk the time axis of xg/seq to
            # stay within v7x's 64 MiB VMEM (vmem_limit_bytes) and add a
            # "parallel" batch-tile grid axis to use both v7x TensorCores.
        )(*args)
        return out[:B]


# ---------------------------------- main --------------------------------------

if __name__ == "__main__":
    key = jax.random.PRNGKey(0)
    k_model, k_seq = jax.random.split(key)

    vocab_size = 50
    output_size = 4
    embedding_dim = 16
    hidden_dim = 32            # 4*H = 128 -> lane-dense gate matmuls
    n_layers = 2
    bidirectional = False
    dropout_prob = 0.5
    batch = 2
    seq_len = 8

    model = LSTMPallas("lstm", vocab_size, output_size, embedding_dim,
                       hidden_dim, n_layers, bidirectional, dropout_prob,
                       k_model)

    seqs = jax.random.randint(k_seq, (batch, seq_len), 1, vocab_size,
                              dtype=jnp.int32)
    # explicit padding tokens (index 0) at the tail of row 1; lens descending
    # as pack_padded_sequence(enforce_sorted=True) requires.
    seqs = seqs.at[1, -2:].set(0)
    lens = jnp.array([seq_len, seq_len - 2], dtype=jnp.int32)

    out = model(seqs, lens)
    out = jax.block_until_ready(out)
    assert out.shape == (batch, output_size)
    print("KERNEL_OK")
</pallas_src>

<mosaic_0001>
module attributes {stable_mosaic.version = 11 : i64} {
  func.func @kernel(%arg0: memref<64x16xf32, #tpu.memory_space<vmem>>, %arg1: memref<8x1xi32, #tpu.memory_space<vmem>>, %arg2: memref<16x128xbf16, #tpu.memory_space<vmem>>, %arg3: memref<32x128xf32, #tpu.memory_space<vmem>>, %arg4: memref<1x128xf32, #tpu.memory_space<vmem>>, %arg5: memref<32x128xbf16, #tpu.memory_space<vmem>>, %arg6: memref<32x128xf32, #tpu.memory_space<vmem>>, %arg7: memref<1x128xf32, #tpu.memory_space<vmem>>, %arg8: memref<32x4xf32, #tpu.memory_space<vmem>>, %arg9: memref<1x4xf32, #tpu.memory_space<vmem>>, %arg10: memref<8x4xf32, #tpu.memory_space<vmem>>, %arg11: memref<64x32xf32, #tpu.memory_space<vmem>>, %arg12: memref<64x128xf32, #tpu.memory_space<vmem>>, %arg13: memref<8x32xf32, #tpu.memory_space<vmem>>, %arg14: memref<8x32xf32, #tpu.memory_space<vmem>>) attributes {dimension_semantics = [], scalar_prefetch = 0 : i64, scratch_operands = 4 : i64, tpu.core_type = #tpu.core_type<tc>} {
    %c0 = arith.constant 0 : index
    %c0_0 = arith.constant 0 : index
    %0 = vector.load %arg1[%c0, %c0_0] : memref<8x1xi32, #tpu.memory_space<vmem>>, vector<8x1xi32>
    %1 = vector.shape_cast %0 : vector<8x1xi32> to vector<8x1xi32>
    %2 = vector.broadcast %1 : vector<8x1xi32> to vector<8x32xi32>
    %c0_1 = arith.constant 0 : index
    %c0_2 = arith.constant 0 : index
    %3 = vector.load %arg0[%c0_1, %c0_2] : memref<64x16xf32, #tpu.memory_space<vmem>>, vector<64x16xf32>
    %4 = arith.truncf %3 : vector<64x16xf32> to vector<64x16xbf16>
    %c0_3 = arith.constant 0 : index
    %c0_4 = arith.constant 0 : index
    %5 = vector.load %arg2[%c0_3, %c0_4] : memref<16x128xbf16, #tpu.memory_space<vmem>>, vector<16x128xbf16>
    %cst = arith.constant dense<0.000000e+00> : vector<64x128xf32>
    %6 = tpu.matmul %4, %5, %cst {dimension_numbers = #tpu.dot_dimension_numbers<[1], [0], [0], [1], [0, 0, 1, 1], [], []>} : vector<64x16xbf16>, vector<16x128xbf16>, vector<64x128xf32> -> vector<64x128xf32>
    %c0_5 = arith.constant 0 : index
    %c0_6 = arith.constant 0 : index
    %7 = vector.load %arg4[%c0_5, %c0_6] : memref<1x128xf32, #tpu.memory_space<vmem>>, vector<1x128xf32>
    %8 = vector.broadcast %7 : vector<1x128xf32> to vector<64x128xf32>
    %9 = arith.addf %6, %8 : vector<64x128xf32>
    %c0_7 = arith.constant 0 : index
    %c0_8 = arith.constant 0 : index
    %10 = vector.load %arg12[%c0_7, %c0_8] : memref<64x128xf32, #tpu.memory_space<vmem>>, vector<64x128xf32>
    tpu.vector_store %arg12[%c0_7, %c0_8], %9 {strides = array<i32>} : memref<64x128xf32, #tpu.memory_space<vmem>>, vector<64x128xf32>,
    %cst_9 = arith.constant 0.000000e+00 : f32
    %11 = vector.broadcast %cst_9 : f32 to vector<8x32xf32>
    %c0_10 = arith.constant 0 : index
    %c0_11 = arith.constant 0 : index
    %12 = vector.load %arg13[%c0_10, %c0_11] : memref<8x32xf32, #tpu.memory_space<vmem>>, vector<8x32xf32>
    tpu.vector_store %arg13[%c0_10, %c0_11], %11 {strides = array<i32>} : memref<8x32xf32, #tpu.memory_space<vmem>>, vector<8x32xf32>,
    %cst_12 = arith.constant 0.000000e+00 : f32
    %13 = vector.broadcast %cst_12 : f32 to vector<8x32xf32>
    %c0_13 = arith.constant 0 : index
    %c0_14 = arith.constant 0 : index
    %14 = vector.load %arg14[%c0_13, %c0_14] : memref<8x32xf32, #tpu.memory_space<vmem>>, vector<8x32xf32>
    tpu.vector_store %arg14[%c0_13, %c0_14], %13 {strides = array<i32>} : memref<8x32xf32, #tpu.memory_space<vmem>>, vector<8x32xf32>,
    %c0_15 = arith.constant 0 : index
    %c0_16 = arith.constant 0 : index
    %15 = vector.load %arg12[%c0_15, %c0_16] : memref<64x128xf32, #tpu.memory_space<vmem>>, vector<8x128xf32>
    %c0_17 = arith.constant 0 : index
    %c0_18 = arith.constant 0 : index
    %16 = vector.load %arg13[%c0_17, %c0_18] : memref<8x32xf32, #tpu.memory_space<vmem>>, vector<8x32xf32>
    %c0_19 = arith.constant 0 : index
    %c0_20 = arith.constant 0 : index
    %17 = vector.load %arg3[%c0_19, %c0_20] : memref<32x128xf32, #tpu.memory_space<vmem>>, vector<32x128xf32>
    %cst_21 = arith.constant dense<0.000000e+00> : vector<8x128xf32>
    %18 = tpu.matmul %16, %17, %cst_21 {dimension_numbers = #tpu.dot_dimension_numbers<[1], [0], [0], [1], [0, 0, 1, 1], [], []>} : vector<8x32xf32>, vector<32x128xf32>, vector<8x128xf32> -> vector<8x128xf32>
    %19 = arith.addf %15, %18 : vector<8x128xf32>
    %cst_22 = arith.constant 0.000000e+00 : f32
    %20 = vector.broadcast %cst_22 : f32 to vector<8x128xf32>
    %21 = arith.subf %20, %19 : vector<8x128xf32>
    %22 = math.exp %21 : vector<8x128xf32>
    %cst_23 = arith.constant 1.000000e+00 : f32
    %23 = vector.broadcast %cst_23 : f32 to vector<8x128xf32>
    %24 = arith.addf %23, %22 : vector<8x128xf32>
    %cst_24 = arith.constant 1.000000e+00 : f32
    %25 = vector.broadcast %cst_24 : f32 to vector<8x128xf32>
    %26 = arith.divf %25, %24 : vector<8x128xf32>
    %27 = vector.extract_strided_slice %26 {offsets = [0, 0], sizes = [8, 32], strides = [1, 1]} : vector<8x128xf32> to vector<8x32xf32>
    %28 = vector.extract_strided_slice %26 {offsets = [0, 32], sizes = [8, 32], strides = [1, 1]} : vector<8x128xf32> to vector<8x32xf32>
    %29 = vector.extract_strided_slice %26 {offsets = [0, 96], sizes = [8, 32], strides = [1, 1]} : vector<8x128xf32> to vector<8x32xf32>
    %30 = vector.extract_strided_slice %19 {offsets = [0, 64], sizes = [8, 32], strides = [1, 1]} : vector<8x128xf32> to vector<8x32xf32>
    %31 = math.tanh %30 : vector<8x32xf32>
    %c0_25 = arith.constant 0 : index
    %c0_26 = arith.constant 0 : index
    %32 = vector.load %arg14[%c0_25, %c0_26] : memref<8x32xf32, #tpu.memory_space<vmem>>, vector<8x32xf32>
    %33 = arith.mulf %28, %32 : vector<8x32xf32>
    %34 = arith.mulf %27, %31 : vector<8x32xf32>
    %35 = arith.addf %33, %34 : vector<8x32xf32>
    %36 = math.tanh %35 : vector<8x32xf32>
    %37 = arith.mulf %29, %36 : vector<8x32xf32>
    %c0_i32 = arith.constant 0 : i32
    %38 = vector.broadcast %c0_i32 : i32 to vector<8x32xi32>
    %39 = arith.cmpi sgt, %2, %38 : vector<8x32xi32>
    %c0_27 = arith.constant 0 : index
    %c0_28 = arith.constant 0 : index
    %40 = vector.load %arg13[%c0_27, %c0_28] : memref<8x32xf32, #tpu.memory_space<vmem>>, vector<8x32xf32>
    %41 = arith.select %39, %37, %40 : vector<8x32xi1>, vector<8x32xf32>
    %c0_29 = arith.constant 0 : index
    %c0_30 = arith.constant 0 : index
    %42 = vector.load %arg13[%c0_29, %c0_30] : memref<8x32xf32, #tpu.memory_space<vmem>>, vector<8x32xf32>
    tpu.vector_store %arg13[%c0_29, %c0_30], %41 {strides = array<i32>} : memref<8x32xf32, #tpu.memory_space<vmem>>, vector<8x32xf32>,
    %c0_31 = arith.constant 0 : index
    %c0_32 = arith.constant 0 : index
    %43 = vector.load %arg14[%c0_31, %c0_32] : memref<8x32xf32, #tpu.memory_space<vmem>>, vector<8x32xf32>
    %44 = arith.select %39, %35, %43 : vector<8x32xi1>, vector<8x32xf32>
    %c0_33 = arith.constant 0 : index
    %c0_34 = arith.constant 0 : index
    %45 = vector.load %arg14[%c0_33, %c0_34] : memref<8x32xf32, #tpu.memory_space<vmem>>, vector<8x32xf32>
    tpu.vector_store %arg14[%c0_33, %c0_34], %44 {strides = array<i32>} : memref<8x32xf32, #tpu.memory_space<vmem>>, vector<8x32xf32>,
    %c0_35 = arith.constant 0 : index
    %c0_36 = arith.constant 0 : index
    %46 = vector.load %arg13[%c0_35, %c0_36] : memref<8x32xf32, #tpu.memory_space<vmem>>, vector<8x32xf32>
    %c0_37 = arith.constant 0 : index
    %c0_38 = arith.constant 0 : index
    %47 = vector.load %arg11[%c0_37, %c0_38] : memref<64x32xf32, #tpu.memory_space<vmem>>, vector<8x32xf32>
    tpu.vector_store %arg11[%c0_37, %c0_38], %46 {strides = array<i32>} : memref<64x32xf32, #tpu.memory_space<vmem>>, vector<8x32xf32>,
    %c8 = arith.constant 8 : index
    %c0_39 = arith.constant 0 : index
    %48 = vector.load %arg12[%c8, %c0_39] : memref<64x128xf32, #tpu.memory_space<vmem>>, vector<8x128xf32>
    %c0_40 = arith.constant 0 : index
    %c0_41 = arith.constant 0 : index
    %49 = vector.load %arg13[%c0_40, %c0_41] : memref<8x32xf32, #tpu.memory_space<vmem>>, vector<8x32xf32>
    %c0_42 = arith.constant 0 : index
    %c0_43 = arith.constant 0 : index
    %50 = vector.load %arg3[%c0_42, %c0_43] : memref<32x128xf32, #tpu.memory_space<vmem>>, vector<32x128xf32>
    %cst_44 = arith.constant dense<0.000000e+00> : vector<8x128xf32>
    %51 = tpu.matmul %49, %50, %cst_44 {dimension_numbers = #tpu.dot_dimension_numbers<[1], [0], [0], [1], [0, 0, 1, 1], [], []>} : vector<8x32xf32>, vector<32x128xf32>, vector<8x128xf32> -> vector<8x128xf32>
    %52 = arith.addf %48, %51 : vector<8x128xf32>
    %cst_45 = arith.constant 0.000000e+00 : f32
    %53 = vector.broadcast %cst_45 : f32 to vector<8x128xf32>
    %54 = arith.subf %53, %52 : vector<8x128xf32>
    %55 = math.exp %54 : vector<8x128xf32>
    %cst_46 = arith.constant 1.000000e+00 : f32
    %56 = vector.broadcast %cst_46 : f32 to vector<8x128xf32>
    %57 = arith.addf %56, %55 : vector<8x128xf32>
    %cst_47 = arith.constant 1.000000e+00 : f32
    %58 = vector.broadcast %cst_47 : f32 to vector<8x128xf32>
    %59 = arith.divf %58, %57 : vector<8x128xf32>
    %60 = vector.extract_strided_slice %59 {offsets = [0, 0], sizes = [8, 32], strides = [1, 1]} : vector<8x128xf32> to vector<8x32xf32>
    %61 = vector.extract_strided_slice %59 {offsets = [0, 32], sizes = [8, 32], strides = [1, 1]} : vector<8x128xf32> to vector<8x32xf32>
    %62 = vector.extract_strided_slice %59 {offsets = [0, 96], sizes = [8, 32], strides = [1, 1]} : vector<8x128xf32> to vector<8x32xf32>
    %63 = vector.extract_strided_slice %52 {offsets = [0, 64], sizes = [8, 32], strides = [1, 1]} : vector<8x128xf32> to vector<8x32xf32>
    %64 = math.tanh %63 : vector<8x32xf32>
    %c0_48 = arith.constant 0 : index
    %c0_49 = arith.constant 0 : index
    %65 = vector.load %arg14[%c0_48, %c0_49] : memref<8x32xf32, #tpu.memory_space<vmem>>, vector<8x32xf32>
    %66 = arith.mulf %61, %65 : vector<8x32xf32>
    %67 = arith.mulf %60, %64 : vector<8x32xf32>
    %68 = arith.addf %66, %67 : vector<8x32xf32>
    %69 = math.tanh %68 : vector<8x32xf32>
    %70 = arith.mulf %62, %69 : vector<8x32xf32>
    %c1_i32 = arith.constant 1 : i32
    %71 = vector.broadcast %c1_i32 : i32 to vector<8x32xi32>
    %72 = arith.cmpi sgt, %2, %71 : vector<8x32xi32>
    %c0_50 = arith.constant 0 : index
    %c0_51 = arith.constant 0 : index
    %73 = vector.load %arg13[%c0_50, %c0_51] : memref<8x32xf32, #tpu.memory_space<vmem>>, vector<8x32xf32>
    %74 = arith.select %72, %70, %73 : vector<8x32xi1>, vector<8x32xf32>
    %c0_52 = arith.constant 0 : index
    %c0_53 = arith.constant 0 : index
    %75 = vector.load %arg13[%c0_52, %c0_53] : memref<8x32xf32, #tpu.memory_space<vmem>>, vector<8x32xf32>
    tpu.vector_store %arg13[%c0_52, %c0_53], %74 {strides = array<i32>} : memref<8x32xf32, #tpu.memory_space<vmem>>, vector<8x32xf32>,
    %c0_54 = arith.constant 0 : index
    %c0_55 = arith.constant 0 : index
    %76 = vector.load %arg14[%c0_54, %c0_55] : memref<8x32xf32, #tpu.memory_space<vmem>>, vector<8x32xf32>
    %77 = arith.select %72, %68, %76 : vector<8x32xi1>, vector<8x32xf32>
    %c0_56 = arith.constant 0 : index
    %c0_57 = arith.constant 0 : index
    %78 = vector.load %arg14[%c0_56, %c0_57] : memref<8x32xf32, #tpu.memory_space<vmem>>, vector<8x32xf32>
    tpu.vector_store %arg14[%c0_56, %c0_57], %77 {strides = array<i32>} : memref<8x32xf32, #tpu.memory_space<vmem>>, vector<8x32xf32>,
    %c0_58 = arith.constant 0 : index
    %c0_59 = arith.constant 0 : index
    %79 = vector.load %arg13[%c0_58, %c0_59] : memref<8x32xf32, #tpu.memory_space<vmem>>, vector<8x32xf32>
    %c8_60 = arith.constant 8 : index
    %c0_61 = arith.constant 0 : index
    %80 = vector.load %arg11[%c8_60, %c0_61] : memref<64x32xf32, #tpu.memory_space<vmem>>, vector<8x32xf32>
    tpu.vector_store %arg11[%c8_60, %c0_61], %79 {strides = array<i32>} : memref<64x32xf32, #tpu.memory_space<vmem>>, vector<8x32xf32>,
    %c16 = arith.constant 16 : index
    %c0_62 = arith.constant 0 : index
    %81 = vector.load %arg12[%c16, %c0_62] : memref<64x128xf32, #tpu.memory_space<vmem>>, vector<8x128xf32>
    %c0_63 = arith.constant 0 : index
    %c0_64 = arith.constant 0 : index
    %82 = vector.load %arg13[%c0_63, %c0_64] : memref<8x32xf32, #tpu.memory_space<vmem>>, vector<8x32xf32>
    %c0_65 = arith.constant 0 : index
    %c0_66 = arith.constant 0 : index
    %83 = vector.load %arg3[%c0_65, %c0_66] : memref<32x128xf32, #tpu.memory_space<vmem>>, vector<32x128xf32>
    %cst_67 = arith.constant dense<0.000000e+00> : vector<8x128xf32>
    %84 = tpu.matmul %82, %83, %cst_67 {dimension_numbers = #tpu.dot_dimension_numbers<[1], [0], [0], [1], [0, 0, 1, 1], [], []>} : vector<8x32xf32>, vector<32x128xf32>, vector<8x128xf32> -> vector<8x128xf32>
    %85 = arith.addf %81, %84 : vector<8x128xf32>
    %cst_68 = arith.constant 0.000000e+00 : f32
    %86 = vector.broadcast %cst_68 : f32 to vector<8x128xf32>
    %87 = arith.subf %86, %85 : vector<8x128xf32>
    %88 = math.exp %87 : vector<8x128xf32>
    %cst_69 = arith.constant 1.000000e+00 : f32
    %89 = vector.broadcast %cst_69 : f32 to vector<8x128xf32>
    %90 = arith.addf %89, %88 : vector<8x128xf32>
    %cst_70 = arith.constant 1.000000e+00 : f32
    %91 = vector.broadcast %cst_70 : f32 to vector<8x128xf32>
    %92 = arith.divf %91, %90 : vector<8x128xf32>
    %93 = vector.extract_strided_slice %92 {offsets = [0, 0], sizes = [8, 32], strides = [1, 1]} : vector<8x128xf32> to vector<8x32xf32>
    %94 = vector.extract_strided_slice %92 {offsets = [0, 32], sizes = [8, 32], strides = [1, 1]} : vector<8x128xf32> to vector<8x32xf32>
    %95 = vector.extract_strided_slice %92 {offsets = [0, 96], sizes = [8, 32], strides = [1, 1]} : vector<8x128xf32> to vector<8x32xf32>
    %96 = vector.extract_strided_slice %85 {offsets = [0, 64], sizes = [8, 32], strides = [1, 1]} : vector<8x128xf32> to vector<8x32xf32>
    %97 = math.tanh %96 : vector<8x32xf32>
    %c0_71 = arith.constant 0 : index
    %c0_72 = arith.constant 0 : index
    %98 = vector.load %arg14[%c0_71, %c0_72] : memref<8x32xf32, #tpu.memory_space<vmem>>, vector<8x32xf32>
    %99 = arith.mulf %94, %98 : vector<8x32xf32>
    %100 = arith.mulf %93, %97 : vector<8x32xf32>
    %101 = arith.addf %99, %100 : vector<8x32xf32>
    %102 = math.tanh %101 : vector<8x32xf32>
    %103 = arith.mulf %95, %102 : vector<8x32xf32>
    %c2_i32 = arith.constant 2 : i32
    %104 = vector.broadcast %c2_i32 : i32 to vector<8x32xi32>
    %105 = arith.cmpi sgt, %2, %104 : vector<8x32xi32>
    %c0_73 = arith.constant 0 : index
    %c0_74 = arith.constant 0 : index
    %106 = vector.load %arg13[%c0_73, %c0_74] : memref<8x32xf32, #tpu.memory_space<vmem>>, vector<8x32xf32>
    %107 = arith.select %105, %103, %106 : vector<8x32xi1>, vector<8x32xf32>
    %c0_75 = arith.constant 0 : index
    %c0_76 = arith.constant 0 : index
    %108 = vector.load %arg13[%c0_75, %c0_76] : memref<8x32xf32, #tpu.memory_space<vmem>>, vector<8x32xf32>
    tpu.vector_store %arg13[%c0_75, %c0_76], %107 {strides = array<i32>} : memref<8x32xf32, #tpu.memory_space<vmem>>, vector<8x32xf32>,
    %c0_77 = arith.constant 0 : index
    %c0_78 = arith.constant 0 : index
    %109 = vector.load %arg14[%c0_77, %c0_78] : memref<8x32xf32, #tpu.memory_space<vmem>>, vector<8x32xf32>
    %110 = arith.select %105, %101, %109 : vector<8x32xi1>, vector<8x32xf32>
    %c0_79 = arith.constant 0 : index
    %c0_80 = arith.constant 0 : index
    %111 = vector.load %arg14[%c0_79, %c0_80] : memref<8x32xf32, #tpu.memory_space<vmem>>, vector<8x32xf32>
    tpu.vector_store %arg14[%c0_79, %c0_80], %110 {strides = array<i32>} : memref<8x32xf32, #tpu.memory_space<vmem>>, vector<8x32xf32>,
    %c0_81 = arith.constant 0 : index
    %c0_82 = arith.constant 0 : index
    %112 = vector.load %arg13[%c0_81, %c0_82] : memref<8x32xf32, #tpu.memory_space<vmem>>, vector<8x32xf32>
    %c16_83 = arith.constant 16 : index
    %c0_84 = arith.constant 0 : index
    %113 = vector.load %arg11[%c16_83, %c0_84] : memref<64x32xf32, #tpu.memory_space<vmem>>, vector<8x32xf32>
    tpu.vector_store %arg11[%c16_83, %c0_84], %112 {strides = array<i32>} : memref<64x32xf32, #tpu.memory_space<vmem>>, vector<8x32xf32>,
    %c24 = arith.constant 24 : index
    %c0_85 = arith.constant 0 : index
    %114 = vector.load %arg12[%c24, %c0_85] : memref<64x128xf32, #tpu.memory_space<vmem>>, vector<8x128xf32>
    %c0_86 = arith.constant 0 : index
    %c0_87 = arith.constant 0 : index
    %115 = vector.load %arg13[%c0_86, %c0_87] : memref<8x32xf32, #tpu.memory_space<vmem>>, vector<8x32xf32>
    %c0_88 = arith.constant 0 : index
    %c0_89 = arith.constant 0 : index
    %116 = vector.load %arg3[%c0_88, %c0_89] : memref<32x128xf32, #tpu.memory_space<vmem>>, vector<32x128xf32>
    %cst_90 = arith.constant dense<0.000000e+00> : vector<8x128xf32>
    %117 = tpu.matmul %115, %116, %cst_90 {dimension_numbers = #tpu.dot_dimension_numbers<[1], [0], [0], [1], [0, 0, 1, 1], [], []>} : vector<8x32xf32>, vector<32x128xf32>, vector<8x128xf32> -> vector<8x128xf32>
    %118 = arith.addf %114, %117 : vector<8x128xf32>
    %cst_91 = arith.constant 0.000000e+00 : f32
    %119 = vector.broadcast %cst_91 : f32 to vector<8x128xf32>
    %120 = arith.subf %119, %118 : vector<8x128xf32>
    %121 = math.exp %120 : vector<8x128xf32>
    %cst_92 = arith.constant 1.000000e+00 : f32
    %122 = vector.broadcast %cst_92 : f32 to vector<8x128xf32>
    %123 = arith.addf %122, %121 : vector<8x128xf32>
    %cst_93 = arith.constant 1.000000e+00 : f32
    %124 = vector.broadcast %cst_93 : f32 to vector<8x128xf32>
    %125 = arith.divf %124, %123 : vector<8x128xf32>
    %126 = vector.extract_strided_slice %125 {offsets = [0, 0], sizes = [8, 32], strides = [1, 1]} : vector<8x128xf32> to vector<8x32xf32>
    %127 = vector.extract_strided_slice %125 {offsets = [0, 32], sizes = [8, 32], strides = [1, 1]} : vector<8x128xf32> to vector<8x32xf32>
    %128 = vector.extract_strided_slice %125 {offsets = [0, 96], sizes = [8, 32], strides = [1, 1]} : vector<8x128xf32> to vector<8x32xf32>
    %129 = vector.extract_strided_slice %118 {offsets = [0, 64], sizes = [8, 32], strides = [1, 1]} : vector<8x128xf32> to vector<8x32xf32>
    %130 = math.tanh %129 : vector<8x32xf32>
    %c0_94 = arith.constant 0 : index
    %c0_95 = arith.constant 0 : index
    %131 = vector.load %arg14[%c0_94, %c0_95] : memref<8x32xf32, #tpu.memory_space<vmem>>, vector<8x32xf32>
    %132 = arith.mulf %127, %131 : vector<8x32xf32>
    %133 = arith.mulf %126, %130 : vector<8x32xf32>
    %134 = arith.addf %132, %133 : vector<8x32xf32>
    %135 = math.tanh %134 : vector<8x32xf32>
    %136 = arith.mulf %128, %135 : vector<8x32xf32>
    %c3_i32 = arith.constant 3 : i32
    %137 = vector.broadcast %c3_i32 : i32 to vector<8x32xi32>
    %138 = arith.cmpi sgt, %2, %137 : vector<8x32xi32>
    %c0_96 = arith.constant 0 : index
    %c0_97 = arith.constant 0 : index
    %139 = vector.load %arg13[%c0_96, %c0_97] : memref<8x32xf32, #tpu.memory_space<vmem>>, vector<8x32xf32>
    %140 = arith.select %138, %136, %139 : vector<8x32xi1>, vector<8x32xf32>
    %c0_98 = arith.constant 0 : index
    %c0_99 = arith.constant 0 : index
    %141 = vector.load %arg13[%c0_98, %c0_99] : memref<8x32xf32, #tpu.memory_space<vmem>>, vector<8x32xf32>
    tpu.vector_store %arg13[%c0_98, %c0_99], %140 {strides = array<i32>} : memref<8x32xf32, #tpu.memory_space<vmem>>, vector<8x32xf32>,
    %c0_100 = arith.constant 0 : index
    %c0_101 = arith.constant 0 : index
    %142 = vector.load %arg14[%c0_100, %c0_101] : memref<8x32xf32, #tpu.memory_space<vmem>>, vector<8x32xf32>
    %143 = arith.select %138, %134, %142 : vector<8x32xi1>, vector<8x32xf32>
    %c0_102 = arith.constant 0 : index
    %c0_103 = arith.constant 0 : index
    %144 = vector.load %arg14[%c0_102, %c0_103] : memref<8x32xf32, #tpu.memory_space<vmem>>, vector<8x32xf32>
    tpu.vector_store %arg14[%c0_102, %c0_103], %143 {strides = array<i32>} : memref<8x32xf32, #tpu.memory_space<vmem>>, vector<8x32xf32>,
    %c0_104 = arith.constant 0 : index
    %c0_105 = arith.constant 0 : index
    %145 = vector.load %arg13[%c0_104, %c0_105] : memref<8x32xf32, #tpu.memory_space<vmem>>, vector<8x32xf32>
    %c24_106 = arith.constant 24 : index
    %c0_107 = arith.constant 0 : index
    %146 = vector.load %arg11[%c24_106, %c0_107] : memref<64x32xf32, #tpu.memory_space<vmem>>, vector<8x32xf32>
    tpu.vector_store %arg11[%c24_106, %c0_107], %145 {strides = array<i32>} : memref<64x32xf32, #tpu.memory_space<vmem>>, vector<8x32xf32>,
    %c32 = arith.constant 32 : index
    %c0_108 = arith.constant 0 : index
    %147 = vector.load %arg12[%c32, %c0_108] : memref<64x128xf32, #tpu.memory_space<vmem>>, vector<8x128xf32>
    %c0_109 = arith.constant 0 : index
    %c0_110 = arith.constant 0 : index
    %148 = vector.load %arg13[%c0_109, %c0_110] : memref<8x32xf32, #tpu.memory_space<vmem>>, vector<8x32xf32>
    %c0_111 = arith.constant 0 : index
    %c0_112 = arith.constant 0 : index
    %149 = vector.load %arg3[%c0_111, %c0_112] : memref<32x128xf32, #tpu.memory_space<vmem>>, vector<32x128xf32>
    %cst_113 = arith.constant dense<0.000000e+00> : vector<8x128xf32>
    %150 = tpu.matmul %148, %149, %cst_113 {dimension_numbers = #tpu.dot_dimension_numbers<[1], [0], [0], [1], [0, 0, 1, 1], [], []>} : vector<8x32xf32>, vector<32x128xf32>, vector<8x128xf32> -> vector<8x128xf32>
    %151 = arith.addf %147, %150 : vector<8x128xf32>
    %cst_114 = arith.constant 0.000000e+00 : f32
    %152 = vector.broadcast %cst_114 : f32 to vector<8x128xf32>
    %153 = arith.subf %152, %151 : vector<8x128xf32>
    %154 = math.exp %153 : vector<8x128xf32>
    %cst_115 = arith.constant 1.000000e+00 : f32
    %155 = vector.broadcast %cst_115 : f32 to vector<8x128xf32>
    %156 = arith.addf %155, %154 : vector<8x128xf32>
    %cst_116 = arith.constant 1.000000e+00 : f32
    %157 = vector.broadcast %cst_116 : f32 to vector<8x128xf32>
    %158 = arith.divf %157, %156 : vector<8x128xf32>
    %159 = vector.extract_strided_slice %158 {offsets = [0, 0], sizes = [8, 32], strides = [1, 1]} : vector<8x128xf32> to vector<8x32xf32>
    %160 = vector.extract_strided_slice %158 {offsets = [0, 32], sizes = [8, 32], strides = [1, 1]} : vector<8x128xf32> to vector<8x32xf32>
    %161 = vector.extract_strided_slice %158 {offsets = [0, 96], sizes = [8, 32], strides = [1, 1]} : vector<8x128xf32> to vector<8x32xf32>
    %162 = vector.extract_strided_slice %151 {offsets = [0, 64], sizes = [8, 32], strides = [1, 1]} : vector<8x128xf32> to vector<8x32xf32>
    %163 = math.tanh %162 : vector<8x32xf32>
    %c0_117 = arith.constant 0 : index
    %c0_118 = arith.constant 0 : index
    %164 = vector.load %arg14[%c0_117, %c0_118] : memref<8x32xf32, #tpu.memory_space<vmem>>, vector<8x32xf32>
    %165 = arith.mulf %160, %164 : vector<8x32xf32>
    %166 = arith.mulf %159, %163 : vector<8x32xf32>
    %167 = arith.addf %165, %166 : vector<8x32xf32>
    %168 = math.tanh %167 : vector<8x32xf32>
    %169 = arith.mulf %161, %168 : vector<8x32xf32>
    %c4_i32 = arith.constant 4 : i32
    %170 = vector.broadcast %c4_i32 : i32 to vector<8x32xi32>
    %171 = arith.cmpi sgt, %2, %170 : vector<8x32xi32>
    %c0_119 = arith.constant 0 : index
    %c0_120 = arith.constant 0 : index
    %172 = vector.load %arg13[%c0_119, %c0_120] : memref<8x32xf32, #tpu.memory_space<vmem>>, vector<8x32xf32>
    %173 = arith.select %171, %169, %172 : vector<8x32xi1>, vector<8x32xf32>
    %c0_121 = arith.constant 0 : index
    %c0_122 = arith.constant 0 : index
    %174 = vector.load %arg13[%c0_121, %c0_122] : memref<8x32xf32, #tpu.memory_space<vmem>>, vector<8x32xf32>
    tpu.vector_store %arg13[%c0_121, %c0_122], %173 {strides = array<i32>} : memref<8x32xf32, #tpu.memory_space<vmem>>, vector<8x32xf32>,
    %c0_123 = arith.constant 0 : index
    %c0_124 = arith.constant 0 : index
    %175 = vector.load %arg14[%c0_123, %c0_124] : memref<8x32xf32, #tpu.memory_space<vmem>>, vector<8x32xf32>
    %176 = arith.select %171, %167, %175 : vector<8x32xi1>, vector<8x32xf32>
    %c0_125 = arith.constant 0 : index
    %c0_126 = arith.constant 0 : index
    %177 = vector.load %arg14[%c0_125, %c0_126] : memref<8x32xf32, #tpu.memory_space<vmem>>, vector<8x32xf32>
    tpu.vector_store %arg14[%c0_125, %c0_126], %176 {strides = array<i32>} : memref<8x32xf32, #tpu.memory_space<vmem>>, vector<8x32xf32>,
    %c0_127 = arith.constant 0 : index
    %c0_128 = arith.constant 0 : index
    %178 = vector.load %arg13[%c0_127, %c0_128] : memref<8x32xf32, #tpu.memory_space<vmem>>, vector<8x32xf32>
    %c32_129 = arith.constant 32 : index
    %c0_130 = arith.constant 0 : index
    %179 = vector.load %arg11[%c32_129, %c0_130] : memref<64x32xf32, #tpu.memory_space<vmem>>, vector<8x32xf32>
    tpu.vector_store %arg11[%c32_129, %c0_130], %178 {strides = array<i32>} : memref<64x32xf32, #tpu.memory_space<vmem>>, vector<8x32xf32>,
    %c40 = arith.constant 40 : index
    %c0_131 = arith.constant 0 : index
    %180 = vector.load %arg12[%c40, %c0_131] : memref<64x128xf32, #tpu.memory_space<vmem>>, vector<8x128xf32>
    %c0_132 = arith.constant 0 : index
    %c0_133 = arith.constant 0 : index
    %181 = vector.load %arg13[%c0_132, %c0_133] : memref<8x32xf32, #tpu.memory_space<vmem>>, vector<8x32xf32>
    %c0_134 = arith.constant 0 : index
    %c0_135 = arith.constant 0 : index
    %182 = vector.load %arg3[%c0_134, %c0_135] : memref<32x128xf32, #tpu.memory_space<vmem>>, vector<32x128xf32>
    %cst_136 = arith.constant dense<0.000000e+00> : vector<8x128xf32>
    %183 = tpu.matmul %181, %182, %cst_136 {dimension_numbers = #tpu.dot_dimension_numbers<[1], [0], [0], [1], [0, 0, 1, 1], [], []>} : vector<8x32xf32>, vector<32x128xf32>, vector<8x128xf32> -> vector<8x128xf32>
    %184 = arith.addf %180, %183 : vector<8x128xf32>
    %cst_137 = arith.constant 0.000000e+00 : f32
    %185 = vector.broadcast %cst_137 : f32 to vector<8x128xf32>
    %186 = arith.subf %185, %184 : vector<8x128xf32>
    %187 = math.exp %186 : vector<8x128xf32>
    %cst_138 = arith.constant 1.000000e+00 : f32
    %188 = vector.broadcast %cst_138 : f32 to vector<8x128xf32>
    %189 = arith.addf %188, %187 : vector<8x128xf32>
    %cst_139 = arith.constant 1.000000e+00 : f32
    %190 = vector.broadcast %cst_139 : f32 to vector<8x128xf32>
    %191 = arith.divf %190, %189 : vector<8x128xf32>
    %192 = vector.extract_strided_slice %191 {offsets = [0, 0], sizes = [8, 32], strides = [1, 1]} : vector<8x128xf32> to vector<8x32xf32>
    %193 = vector.extract_strided_slice %191 {offsets = [0, 32], sizes = [8, 32], strides = [1, 1]} : vector<8x128xf32> to vector<8x32xf32>
    %194 = vector.extract_strided_slice %191 {offsets = [0, 96], sizes = [8, 32], strides = [1, 1]} : vector<8x128xf32> to vector<8x32xf32>
    %195 = vector.extract_strided_slice %184 {offsets = [0, 64], sizes = [8, 32], strides = [1, 1]} : vector<8x128xf32> to vector<8x32xf32>
    %196 = math.tanh %195 : vector<8x32xf32>
    %c0_140 = arith.constant 0 : index
    %c0_141 = arith.constant 0 : index
    %197 = vector.load %arg14[%c0_140, %c0_141] : memref<8x32xf32, #tpu.memory_space<vmem>>, vector<8x32xf32>
    %198 = arith.mulf %193, %197 : vector<8x32xf32>
    %199 = arith.mulf %192, %196 : vector<8x32xf32>
    %200 = arith.addf %198, %199 : vector<8x32xf32>
    %201 = math.tanh %200 : vector<8x32xf32>
    %202 = arith.mulf %194, %201 : vector<8x32xf32>
    %c5_i32 = arith.constant 5 : i32
    %203 = vector.broadcast %c5_i32 : i32 to vector<8x32xi32>
    %204 = arith.cmpi sgt, %2, %203 : vector<8x32xi32>
    %c0_142 = arith.constant 0 : index
    %c0_143 = arith.constant 0 : index
    %205 = vector.load %arg13[%c0_142, %c0_143] : memref<8x32xf32, #tpu.memory_space<vmem>>, vector<8x32xf32>
    %206 = arith.select %204, %202, %205 : vector<8x32xi1>, vector<8x32xf32>
    %c0_144 = arith.constant 0 : index
    %c0_145 = arith.constant 0 : index
    %207 = vector.load %arg13[%c0_144, %c0_145] : memref<8x32xf32, #tpu.memory_space<vmem>>, vector<8x32xf32>
    tpu.vector_store %arg13[%c0_144, %c0_145], %206 {strides = array<i32>} : memref<8x32xf32, #tpu.memory_space<vmem>>, vector<8x32xf32>,
    %c0_146 = arith.constant 0 : index
    %c0_147 = arith.constant 0 : index
    %208 = vector.load %arg14[%c0_146, %c0_147] : memref<8x32xf32, #tpu.memory_space<vmem>>, vector<8x32xf32>
    %209 = arith.select %204, %200, %208 : vector<8x32xi1>, vector<8x32xf32>
    %c0_148 = arith.constant 0 : index
    %c0_149 = arith.constant 0 : index
    %210 = vector.load %arg14[%c0_148, %c0_149] : memref<8x32xf32, #tpu.memory_space<vmem>>, vector<8x32xf32>
    tpu.vector_store %arg14[%c0_148, %c0_149], %209 {strides = array<i32>} : memref<8x32xf32, #tpu.memory_space<vmem>>, vector<8x32xf32>,
    %c0_150 = arith.constant 0 : index
    %c0_151 = arith.constant 0 : index
    %211 = vector.load %arg13[%c0_150, %c0_151] : memref<8x32xf32, #tpu.memory_space<vmem>>, vector<8x32xf32>
    %c40_152 = arith.constant 40 : index
    %c0_153 = arith.constant 0 : index
    %212 = vector.load %arg11[%c40_152, %c0_153] : memref<64x32xf32, #tpu.memory_space<vmem>>, vector<8x32xf32>
    tpu.vector_store %arg11[%c40_152, %c0_153], %211 {strides = array<i32>} : memref<64x32xf32, #tpu.memory_space<vmem>>, vector<8x32xf32>,
    %c48 = arith.constant 48 : index
    %c0_154 = arith.constant 0 : index
    %213 = vector.load %arg12[%c48, %c0_154] : memref<64x128xf32, #tpu.memory_space<vmem>>, vector<8x128xf32>
    %c0_155 = arith.constant 0 : index
    %c0_156 = arith.constant 0 : index
    %214 = vector.load %arg13[%c0_155, %c0_156] : memref<8x32xf32, #tpu.memory_space<vmem>>, vector<8x32xf32>
    %c0_157 = arith.constant 0 : index
    %c0_158 = arith.constant 0 : index
    %215 = vector.load %arg3[%c0_157, %c0_158] : memref<32x128xf32, #tpu.memory_space<vmem>>, vector<32x128xf32>
    %cst_159 = arith.constant dense<0.000000e+00> : vector<8x128xf32>
    %216 = tpu.matmul %214, %215, %cst_159 {dimension_numbers = #tpu.dot_dimension_numbers<[1], [0], [0], [1], [0, 0, 1, 1], [], []>} : vector<8x32xf32>, vector<32x128xf32>, vector<8x128xf32> -> vector<8x128xf32>
    %217 = arith.addf %213, %216 : vector<8x128xf32>
    %cst_160 = arith.constant 0.000000e+00 : f32
    %218 = vector.broadcast %cst_160 : f32 to vector<8x128xf32>
    %219 = arith.subf %218, %217 : vector<8x128xf32>
    %220 = math.exp %219 : vector<8x128xf32>
    %cst_161 = arith.constant 1.000000e+00 : f32
    %221 = vector.broadcast %cst_161 : f32 to vector<8x128xf32>
    %222 = arith.addf %221, %220 : vector<8x128xf32>
    %cst_162 = arith.constant 1.000000e+00 : f32
    %223 = vector.broadcast %cst_162 : f32 to vector<8x128xf32>
    %224 = arith.divf %223, %222 : vector<8x128xf32>
    %225 = vector.extract_strided_slice %224 {offsets = [0, 0], sizes = [8, 32], strides = [1, 1]} : vector<8x128xf32> to vector<8x32xf32>
    %226 = vector.extract_strided_slice %224 {offsets = [0, 32], sizes = [8, 32], strides = [1, 1]} : vector<8x128xf32> to vector<8x32xf32>
    %227 = vector.extract_strided_slice %224 {offsets = [0, 96], sizes = [8, 32], strides = [1, 1]} : vector<8x128xf32> to vector<8x32xf32>
    %228 = vector.extract_strided_slice %217 {offsets = [0, 64], sizes = [8, 32], strides = [1, 1]} : vector<8x128xf32> to vector<8x32xf32>
    %229 = math.tanh %228 : vector<8x32xf32>
    %c0_163 = arith.constant 0 : index
    %c0_164 = arith.constant 0 : index
    %230 = vector.load %arg14[%c0_163, %c0_164] : memref<8x32xf32, #tpu.memory_space<vmem>>, vector<8x32xf32>
    %231 = arith.mulf %226, %230 : vector<8x32xf32>
    %232 = arith.mulf %225, %229 : vector<8x32xf32>
    %233 = arith.addf %231, %232 : vector<8x32xf32>
    %234 = math.tanh %233 : vector<8x32xf32>
    %235 = arith.mulf %227, %234 : vector<8x32xf32>
    %c6_i32 = arith.constant 6 : i32
    %236 = vector.broadcast %c6_i32 : i32 to vector<8x32xi32>
    %237 = arith.cmpi sgt, %2, %236 : vector<8x32xi32>
    %c0_165 = arith.constant 0 : index
    %c0_166 = arith.constant 0 : index
    %238 = vector.load %arg13[%c0_165, %c0_166] : memref<8x32xf32, #tpu.memory_space<vmem>>, vector<8x32xf32>
    %239 = arith.select %237, %235, %238 : vector<8x32xi1>, vector<8x32xf32>
    %c0_167 = arith.constant 0 : index
    %c0_168 = arith.constant 0 : index
    %240 = vector.load %arg13[%c0_167, %c0_168] : memref<8x32xf32, #tpu.memory_space<vmem>>, vector<8x32xf32>
    tpu.vector_store %arg13[%c0_167, %c0_168], %239 {strides = array<i32>} : memref<8x32xf32, #tpu.memory_space<vmem>>, vector<8x32xf32>,
    %c0_169 = arith.constant 0 : index
    %c0_170 = arith.constant 0 : index
    %241 = vector.load %arg14[%c0_169, %c0_170] : memref<8x32xf32, #tpu.memory_space<vmem>>, vector<8x32xf32>
    %242 = arith.select %237, %233, %241 : vector<8x32xi1>, vector<8x32xf32>
    %c0_171 = arith.constant 0 : index
    %c0_172 = arith.constant 0 : index
    %243 = vector.load %arg14[%c0_171, %c0_172] : memref<8x32xf32, #tpu.memory_space<vmem>>, vector<8x32xf32>
    tpu.vector_store %arg14[%c0_171, %c0_172], %242 {strides = array<i32>} : memref<8x32xf32, #tpu.memory_space<vmem>>, vector<8x32xf32>,
    %c0_173 = arith.constant 0 : index
    %c0_174 = arith.constant 0 : index
    %244 = vector.load %arg13[%c0_173, %c0_174] : memref<8x32xf32, #tpu.memory_space<vmem>>, vector<8x32xf32>
    %c48_175 = arith.constant 48 : index
    %c0_176 = arith.constant 0 : index
    %245 = vector.load %arg11[%c48_175, %c0_176] : memref<64x32xf32, #tpu.memory_space<vmem>>, vector<8x32xf32>
    tpu.vector_store %arg11[%c48_175, %c0_176], %244 {strides = array<i32>} : memref<64x32xf32, #tpu.memory_space<vmem>>, vector<8x32xf32>,
    %c56 = arith.constant 56 : index
    %c0_177 = arith.constant 0 : index
    %246 = vector.load %arg12[%c56, %c0_177] : memref<64x128xf32, #tpu.memory_space<vmem>>, vector<8x128xf32>
    %c0_178 = arith.constant 0 : index
    %c0_179 = arith.constant 0 : index
    %247 = vector.load %arg13[%c0_178, %c0_179] : memref<8x32xf32, #tpu.memory_space<vmem>>, vector<8x32xf32>
    %c0_180 = arith.constant 0 : index
    %c0_181 = arith.constant 0 : index
    %248 = vector.load %arg3[%c0_180, %c0_181] : memref<32x128xf32, #tpu.memory_space<vmem>>, vector<32x128xf32>
    %cst_182 = arith.constant dense<0.000000e+00> : vector<8x128xf32>
    %249 = tpu.matmul %247, %248, %cst_182 {dimension_numbers = #tpu.dot_dimension_numbers<[1], [0], [0], [1], [0, 0, 1, 1], [], []>} : vector<8x32xf32>, vector<32x128xf32>, vector<8x128xf32> -> vector<8x128xf32>
    %250 = arith.addf %246, %249 : vector<8x128xf32>
    %cst_183 = arith.constant 0.000000e+00 : f32
    %251 = vector.broadcast %cst_183 : f32 to vector<8x128xf32>
    %252 = arith.subf %251, %250 : vector<8x128xf32>
    %253 = math.exp %252 : vector<8x128xf32>
    %cst_184 = arith.constant 1.000000e+00 : f32
    %254 = vector.broadcast %cst_184 : f32 to vector<8x128xf32>
    %255 = arith.addf %254, %253 : vector<8x128xf32>
    %cst_185 = arith.constant 1.000000e+00 : f32
    %256 = vector.broadcast %cst_185 : f32 to vector<8x128xf32>
    %257 = arith.divf %256, %255 : vector<8x128xf32>
    %258 = vector.extract_strided_slice %257 {offsets = [0, 0], sizes = [8, 32], strides = [1, 1]} : vector<8x128xf32> to vector<8x32xf32>
    %259 = vector.extract_strided_slice %257 {offsets = [0, 32], sizes = [8, 32], strides = [1, 1]} : vector<8x128xf32> to vector<8x32xf32>
    %260 = vector.extract_strided_slice %257 {offsets = [0, 96], sizes = [8, 32], strides = [1, 1]} : vector<8x128xf32> to vector<8x32xf32>
    %261 = vector.extract_strided_slice %250 {offsets = [0, 64], sizes = [8, 32], strides = [1, 1]} : vector<8x128xf32> to vector<8x32xf32>
    %262 = math.tanh %261 : vector<8x32xf32>
    %c0_186 = arith.constant 0 : index
    %c0_187 = arith.constant 0 : index
    %263 = vector.load %arg14[%c0_186, %c0_187] : memref<8x32xf32, #tpu.memory_space<vmem>>, vector<8x32xf32>
    %264 = arith.mulf %259, %263 : vector<8x32xf32>
    %265 = arith.mulf %258, %262 : vector<8x32xf32>
    %266 = arith.addf %264, %265 : vector<8x32xf32>
    %267 = math.tanh %266 : vector<8x32xf32>
    %268 = arith.mulf %260, %267 : vector<8x32xf32>
    %c7_i32 = arith.constant 7 : i32
    %269 = vector.broadcast %c7_i32 : i32 to vector<8x32xi32>
    %270 = arith.cmpi sgt, %2, %269 : vector<8x32xi32>
    %c0_188 = arith.constant 0 : index
    %c0_189 = arith.constant 0 : index
    %271 = vector.load %arg13[%c0_188, %c0_189] : memref<8x32xf32, #tpu.memory_space<vmem>>, vector<8x32xf32>
    %272 = arith.select %270, %268, %271 : vector<8x32xi1>, vector<8x32xf32>
    %c0_190 = arith.constant 0 : index
    %c0_191 = arith.constant 0 : index
    %273 = vector.load %arg13[%c0_190, %c0_191] : memref<8x32xf32, #tpu.memory_space<vmem>>, vector<8x32xf32>
    tpu.vector_store %arg13[%c0_190, %c0_191], %272 {strides = array<i32>} : memref<8x32xf32, #tpu.memory_space<vmem>>, vector<8x32xf32>,
    %c0_192 = arith.constant 0 : index
    %c0_193 = arith.constant 0 : index
    %274 = vector.load %arg14[%c0_192, %c0_193] : memref<8x32xf32, #tpu.memory_space<vmem>>, vector<8x32xf32>
    %275 = arith.select %270, %266, %274 : vector<8x32xi1>, vector<8x32xf32>
    %c0_194 = arith.constant 0 : index
    %c0_195 = arith.constant 0 : index
    %276 = vector.load %arg14[%c0_194, %c0_195] : memref<8x32xf32, #tpu.memory_space<vmem>>, vector<8x32xf32>
    tpu.vector_store %arg14[%c0_194, %c0_195], %275 {strides = array<i32>} : memref<8x32xf32, #tpu.memory_space<vmem>>, vector<8x32xf32>,
    %c0_196 = arith.constant 0 : index
    %c0_197 = arith.constant 0 : index
    %277 = vector.load %arg13[%c0_196, %c0_197] : memref<8x32xf32, #tpu.memory_space<vmem>>, vector<8x32xf32>
    %c56_198 = arith.constant 56 : index
    %c0_199 = arith.constant 0 : index
    %278 = vector.load %arg11[%c56_198, %c0_199] : memref<64x32xf32, #tpu.memory_space<vmem>>, vector<8x32xf32>
    tpu.vector_store %arg11[%c56_198, %c0_199], %277 {strides = array<i32>} : memref<64x32xf32, #tpu.memory_space<vmem>>, vector<8x32xf32>,
    %c0_200 = arith.constant 0 : index
    %c0_201 = arith.constant 0 : index
    %279 = vector.load %arg11[%c0_200, %c0_201] : memref<64x32xf32, #tpu.memory_space<vmem>>, vector<64x32xf32>
    %280 = arith.truncf %279 : vector<64x32xf32> to vector<64x32xbf16>
    %c0_202 = arith.constant 0 : index
    %c0_203 = arith.constant 0 : index
    %281 = vector.load %arg5[%c0_202, %c0_203] : memref<32x128xbf16, #tpu.memory_space<vmem>>, vector<32x128xbf16>
    %cst_204 = arith.constant dense<0.000000e+00> : vector<64x128xf32>
    %282 = tpu.matmul %280, %281, %cst_204 {dimension_numbers = #tpu.dot_dimension_numbers<[1], [0], [0], [1], [0, 0, 1, 1], [], []>} : vector<64x32xbf16>, vector<32x128xbf16>, vector<64x128xf32> -> vector<64x128xf32>
    %c0_205 = arith.constant 0 : index
    %c0_206 = arith.constant 0 : index
    %283 = vector.load %arg7[%c0_205, %c0_206] : memref<1x128xf32, #tpu.memory_space<vmem>>, vector<1x128xf32>
    %284 = vector.broadcast %283 : vector<1x128xf32> to vector<64x128xf32>
    %285 = arith.addf %282, %284 : vector<64x128xf32>
    %c0_207 = arith.constant 0 : index
    %c0_208 = arith.constant 0 : index
    %286 = vector.load %arg12[%c0_207, %c0_208] : memref<64x128xf32, #tpu.memory_space<vmem>>, vector<64x128xf32>
    tpu.vector_store %arg12[%c0_207, %c0_208], %285 {strides = array<i32>} : memref<64x128xf32, #tpu.memory_space<vmem>>, vector<64x128xf32>,
    %cst_209 = arith.constant 0.000000e+00 : f32
    %287 = vector.broadcast %cst_209 : f32 to vector<8x32xf32>
    %c0_210 = arith.constant 0 : index
    %c0_211 = arith.constant 0 : index
    %288 = vector.load %arg13[%c0_210, %c0_211] : memref<8x32xf32, #tpu.memory_space<vmem>>, vector<8x32xf32>
    tpu.vector_store %arg13[%c0_210, %c0_211], %287 {strides = array<i32>} : memref<8x32xf32, #tpu.memory_space<vmem>>, vector<8x32xf32>,
    %cst_212 = arith.constant 0.000000e+00 : f32
    %289 = vector.broadcast %cst_212 : f32 to vector<8x32xf32>
    %c0_213 = arith.constant 0 : index
    %c0_214 = arith.constant 0 : index
    %290 = vector.load %arg14[%c0_213, %c0_214] : memref<8x32xf32, #tpu.memory_space<vmem>>, vector<8x32xf32>
    tpu.vector_store %arg14[%c0_213, %c0_214], %289 {strides = array<i32>} : memref<8x32xf32, #tpu.memory_space<vmem>>, vector<8x32xf32>,
    %c0_215 = arith.constant 0 : index
    %c0_216 = arith.constant 0 : index
    %291 = vector.load %arg12[%c0_215, %c0_216] : memref<64x128xf32, #tpu.memory_space<vmem>>, vector<8x128xf32>
    %c0_217 = arith.constant 0 : index
    %c0_218 = arith.constant 0 : index
    %292 = vector.load %arg13[%c0_217, %c0_218] : memref<8x32xf32, #tpu.memory_space<vmem>>, vector<8x32xf32>
    %c0_219 = arith.constant 0 : index
    %c0_220 = arith.constant 0 : index
    %293 = vector.load %arg6[%c0_219, %c0_220] : memref<32x128xf32, #tpu.memory_space<vmem>>, vector<32x128xf32>
    %cst_221 = arith.constant dense<0.000000e+00> : vector<8x128xf32>
    %294 = tpu.matmul %292, %293, %cst_221 {dimension_numbers = #tpu.dot_dimension_numbers<[1], [0], [0], [1], [0, 0, 1, 1], [], []>} : vector<8x32xf32>, vector<32x128xf32>, vector<8x128xf32> -> vector<8x128xf32>
    %295 = arith.addf %291, %294 : vector<8x128xf32>
    %cst_222 = arith.constant 0.000000e+00 : f32
    %296 = vector.broadcast %cst_222 : f32 to vector<8x128xf32>
    %297 = arith.subf %296, %295 : vector<8x128xf32>
    %298 = math.exp %297 : vector<8x128xf32>
    %cst_223 = arith.constant 1.000000e+00 : f32
    %299 = vector.broadcast %cst_223 : f32 to vector<8x128xf32>
    %300 = arith.addf %299, %298 : vector<8x128xf32>
    %cst_224 = arith.constant 1.000000e+00 : f32
    %301 = vector.broadcast %cst_224 : f32 to vector<8x128xf32>
    %302 = arith.divf %301, %300 : vector<8x128xf32>
    %303 = vector.extract_strided_slice %302 {offsets = [0, 0], sizes = [8, 32], strides = [1, 1]} : vector<8x128xf32> to vector<8x32xf32>
    %304 = vector.extract_strided_slice %302 {offsets = [0, 32], sizes = [8, 32], strides = [1, 1]} : vector<8x128xf32> to vector<8x32xf32>
    %305 = vector.extract_strided_slice %302 {offsets = [0, 96], sizes = [8, 32], strides = [1, 1]} : vector<8x128xf32> to vector<8x32xf32>
    %306 = vector.extract_strided_slice %295 {offsets = [0, 64], sizes = [8, 32], strides = [1, 1]} : vector<8x128xf32> to vector<8x32xf32>
    %307 = math.tanh %306 : vector<8x32xf32>
    %c0_225 = arith.constant 0 : index
    %c0_226 = arith.constant 0 : index
    %308 = vector.load %arg14[%c0_225, %c0_226] : memref<8x32xf32, #tpu.memory_space<vmem>>, vector<8x32xf32>
    %309 = arith.mulf %304, %308 : vector<8x32xf32>
    %310 = arith.mulf %303, %307 : vector<8x32xf32>
    %311 = arith.addf %309, %310 : vector<8x32xf32>
    %312 = math.tanh %311 : vector<8x32xf32>
    %313 = arith.mulf %305, %312 : vector<8x32xf32>
    %c0_i32_227 = arith.constant 0 : i32
    %314 = vector.broadcast %c0_i32_227 : i32 to vector<8x32xi32>
    %315 = arith.cmpi sgt, %2, %314 : vector<8x32xi32>
    %c0_228 = arith.constant 0 : index
    %c0_229 = arith.constant 0 : index
    %316 = vector.load %arg13[%c0_228, %c0_229] : memref<8x32xf32, #tpu.memory_space<vmem>>, vector<8x32xf32>
    %317 = arith.select %315, %313, %316 : vector<8x32xi1>, vector<8x32xf32>
    %c0_230 = arith.constant 0 : index
    %c0_231 = arith.constant 0 : index
    %318 = vector.load %arg13[%c0_230, %c0_231] : memref<8x32xf32, #tpu.memory_space<vmem>>, vector<8x32xf32>
    tpu.vector_store %arg13[%c0_230, %c0_231], %317 {strides = array<i32>} : memref<8x32xf32, #tpu.memory_space<vmem>>, vector<8x32xf32>,
    %c0_232 = arith.constant 0 : index
    %c0_233 = arith.constant 0 : index
    %319 = vector.load %arg14[%c0_232, %c0_233] : memref<8x32xf32, #tpu.memory_space<vmem>>, vector<8x32xf32>
    %320 = arith.select %315, %311, %319 : vector<8x32xi1>, vector<8x32xf32>
    %c0_234 = arith.constant 0 : index
    %c0_235 = arith.constant 0 : index
    %321 = vector.load %arg14[%c0_234, %c0_235] : memref<8x32xf32, #tpu.memory_space<vmem>>, vector<8x32xf32>
    tpu.vector_store %arg14[%c0_234, %c0_235], %320 {strides = array<i32>} : memref<8x32xf32, #tpu.memory_space<vmem>>, vector<8x32xf32>,
    %c0_236 = arith.constant 0 : index
    %c0_237 = arith.constant 0 : index
    %322 = vector.load %arg13[%c0_236, %c0_237] : memref<8x32xf32, #tpu.memory_space<vmem>>, vector<8x32xf32>
    %c0_238 = arith.constant 0 : index
    %c0_239 = arith.constant 0 : index
    %323 = vector.load %arg11[%c0_238, %c0_239] : memref<64x32xf32, #tpu.memory_space<vmem>>, vector<8x32xf32>
    tpu.vector_store %arg11[%c0_238, %c0_239], %322 {strides = array<i32>} : memref<64x32xf32, #tpu.memory_space<vmem>>, vector<8x32xf32>,
    %c8_240 = arith.constant 8 : index
    %c0_241 = arith.constant 0 : index
    %324 = vector.load %arg12[%c8_240, %c0_241] : memref<64x128xf32, #tpu.memory_space<vmem>>, vector<8x128xf32>
    %c0_242 = arith.constant 0 : index
    %c0_243 = arith.constant 0 : index
    %325 = vector.load %arg13[%c0_242, %c0_243] : memref<8x32xf32, #tpu.memory_space<vmem>>, vector<8x32xf32>
    %c0_244 = arith.constant 0 : index
    %c0_245 = arith.constant 0 : index
    %326 = vector.load %arg6[%c0_244, %c0_245] : memref<32x128xf32, #tpu.memory_space<vmem>>, vector<32x128xf32>
    %cst_246 = arith.constant dense<0.000000e+00> : vector<8x128xf32>
    %327 = tpu.matmul %325, %326, %cst_246 {dimension_numbers = #tpu.dot_dimension_numbers<[1], [0], [0], [1], [0, 0, 1, 1], [], []>} : vector<8x32xf32>, vector<32x128xf32>, vector<8x128xf32> -> vector<8x128xf32>
    %328 = arith.addf %324, %327 : vector<8x128xf32>
    %cst_247 = arith.constant 0.000000e+00 : f32
    %329 = vector.broadcast %cst_247 : f32 to vector<8x128xf32>
    %330 = arith.subf %329, %328 : vector<8x128xf32>
    %331 = math.exp %330 : vector<8x128xf32>
    %cst_248 = arith.constant 1.000000e+00 : f32
    %332 = vector.broadcast %cst_248 : f32 to vector<8x128xf32>
    %333 = arith.addf %332, %331 : vector<8x128xf32>
    %cst_249 = arith.constant 1.000000e+00 : f32
    %334 = vector.broadcast %cst_249 : f32 to vector<8x128xf32>
    %335 = arith.divf %334, %333 : vector<8x128xf32>
    %336 = vector.extract_strided_slice %335 {offsets = [0, 0], sizes = [8, 32], strides = [1, 1]} : vector<8x128xf32> to vector<8x32xf32>
    %337 = vector.extract_strided_slice %335 {offsets = [0, 32], sizes = [8, 32], strides = [1, 1]} : vector<8x128xf32> to vector<8x32xf32>
    %338 = vector.extract_strided_slice %335 {offsets = [0, 96], sizes = [8, 32], strides = [1, 1]} : vector<8x128xf32> to vector<8x32xf32>
    %339 = vector.extract_strided_slice %328 {offsets = [0, 64], sizes = [8, 32], strides = [1, 1]} : vector<8x128xf32> to vector<8x32xf32>
    %340 = math.tanh %339 : vector<8x32xf32>
    %c0_250 = arith.constant 0 : index
    %c0_251 = arith.constant 0 : index
    %341 = vector.load %arg14[%c0_250, %c0_251] : memref<8x32xf32, #tpu.memory_space<vmem>>, vector<8x32xf32>
    %342 = arith.mulf %337, %341 : vector<8x32xf32>
    %343 = arith.mulf %336, %340 : vector<8x32xf32>
    %344 = arith.addf %342, %343 : vector<8x32xf32>
    %345 = math.tanh %344 : vector<8x32xf32>
    %346 = arith.mulf %338, %345 : vector<8x32xf32>
    %c1_i32_252 = arith.constant 1 : i32
    %347 = vector.broadcast %c1_i32_252 : i32 to vector<8x32xi32>
    %348 = arith.cmpi sgt, %2, %347 : vector<8x32xi32>
    %c0_253 = arith.constant 0 : index
    %c0_254 = arith.constant 0 : index
    %349 = vector.load %arg13[%c0_253, %c0_254] : memref<8x32xf32, #tpu.memory_space<vmem>>, vector<8x32xf32>
    %350 = arith.select %348, %346, %349 : vector<8x32xi1>, vector<8x32xf32>
    %c0_255 = arith.constant 0 : index
    %c0_256 = arith.constant 0 : index
    %351 = vector.load %arg13[%c0_255, %c0_256] : memref<8x32xf32, #tpu.memory_space<vmem>>, vector<8x32xf32>
    tpu.vector_store %arg13[%c0_255, %c0_256], %350 {strides = array<i32>} : memref<8x32xf32, #tpu.memory_space<vmem>>, vector<8x32xf32>,
    %c0_257 = arith.constant 0 : index
    %c0_258 = arith.constant 0 : index
    %352 = vector.load %arg14[%c0_257, %c0_258] : memref<8x32xf32, #tpu.memory_space<vmem>>, vector<8x32xf32>
    %353 = arith.select %348, %344, %352 : vector<8x32xi1>, vector<8x32xf32>
    %c0_259 = arith.constant 0 : index
    %c0_260 = arith.constant 0 : index
    %354 = vector.load %arg14[%c0_259, %c0_260] : memref<8x32xf32, #tpu.memory_space<vmem>>, vector<8x32xf32>
    tpu.vector_store %arg14[%c0_259, %c0_260], %353 {strides = array<i32>} : memref<8x32xf32, #tpu.memory_space<vmem>>, vector<8x32xf32>,
    %c0_261 = arith.constant 0 : index
    %c0_262 = arith.constant 0 : index
    %355 = vector.load %arg13[%c0_261, %c0_262] : memref<8x32xf32, #tpu.memory_space<vmem>>, vector<8x32xf32>
    %c8_263 = arith.constant 8 : index
    %c0_264 = arith.constant 0 : index
    %356 = vector.load %arg11[%c8_263, %c0_264] : memref<64x32xf32, #tpu.memory_space<vmem>>, vector<8x32xf32>
    tpu.vector_store %arg11[%c8_263, %c0_264], %355 {strides = array<i32>} : memref<64x32xf32, #tpu.memory_space<vmem>>, vector<8x32xf32>,
    %c16_265 = arith.constant 16 : index
    %c0_266 = arith.constant 0 : index
    %357 = vector.load %arg12[%c16_265, %c0_266] : memref<64x128xf32, #tpu.memory_space<vmem>>, vector<8x128xf32>
    %c0_267 = arith.constant 0 : index
    %c0_268 = arith.constant 0 : index
    %358 = vector.load %arg13[%c0_267, %c0_268] : memref<8x32xf32, #tpu.memory_space<vmem>>, vector<8x32xf32>
    %c0_269 = arith.constant 0 : index
    %c0_270 = arith.constant 0 : index
    %359 = vector.load %arg6[%c0_269, %c0_270] : memref<32x128xf32, #tpu.memory_space<vmem>>, vector<32x128xf32>
    %cst_271 = arith.constant dense<0.000000e+00> : vector<8x128xf32>
    %360 = tpu.matmul %358, %359, %cst_271 {dimension_numbers = #tpu.dot_dimension_numbers<[1], [0], [0], [1], [0, 0, 1, 1], [], []>} : vector<8x32xf32>, vector<32x128xf32>, vector<8x128xf32> -> vector<8x128xf32>
    %361 = arith.addf %357, %360 : vector<8x128xf32>
    %cst_272 = arith.constant 0.000000e+00 : f32
    %362 = vector.broadcast %cst_272 : f32 to vector<8x128xf32>
    %363 = arith.subf %362, %361 : vector<8x128xf32>
    %364 = math.exp %363 : vector<8x128xf32>
    %cst_273 = arith.constant 1.000000e+00 : f32
    %365 = vector.broadcast %cst_273 : f32 to vector<8x128xf32>
    %366 = arith.addf %365, %364 : vector<8x128xf32>
    %cst_274 = arith.constant 1.000000e+00 : f32
    %367 = vector.broadcast %cst_274 : f32 to vector<8x128xf32>
    %368 = arith.divf %367, %366 : vector<8x128xf32>
    %369 = vector.extract_strided_slice %368 {offsets = [0, 0], sizes = [8, 32], strides = [1, 1]} : vector<8x128xf32> to vector<8x32xf32>
    %370 = vector.extract_strided_slice %368 {offsets = [0, 32], sizes = [8, 32], strides = [1, 1]} : vector<8x128xf32> to vector<8x32xf32>
    %371 = vector.extract_strided_slice %368 {offsets = [0, 96], sizes = [8, 32], strides = [1, 1]} : vector<8x128xf32> to vector<8x32xf32>
    %372 = vector.extract_strided_slice %361 {offsets = [0, 64], sizes = [8, 32], strides = [1, 1]} : vector<8x128xf32> to vector<8x32xf32>
    %373 = math.tanh %372 : vector<8x32xf32>
    %c0_275 = arith.constant 0 : index
    %c0_276 = arith.constant 0 : index
    %374 = vector.load %arg14[%c0_275, %c0_276] : memref<8x32xf32, #tpu.memory_space<vmem>>, vector<8x32xf32>
    %375 = arith.mulf %370, %374 : vector<8x32xf32>
    %376 = arith.mulf %369, %373 : vector<8x32xf32>
    %377 = arith.addf %375, %376 : vector<8x32xf32>
    %378 = math.tanh %377 : vector<8x32xf32>
    %379 = arith.mulf %371, %378 : vector<8x32xf32>
    %c2_i32_277 = arith.constant 2 : i32
    %380 = vector.broadcast %c2_i32_277 : i32 to vector<8x32xi32>
    %381 = arith.cmpi sgt, %2, %380 : vector<8x32xi32>
    %c0_278 = arith.constant 0 : index
    %c0_279 = arith.constant 0 : index
    %382 = vector.load %arg13[%c0_278, %c0_279] : memref<8x32xf32, #tpu.memory_space<vmem>>, vector<8x32xf32>
    %383 = arith.select %381, %379, %382 : vector<8x32xi1>, vector<8x32xf32>
    %c0_280 = arith.constant 0 : index
    %c0_281 = arith.constant 0 : index
    %384 = vector.load %arg13[%c0_280, %c0_281] : memref<8x32xf32, #tpu.memory_space<vmem>>, vector<8x32xf32>
    tpu.vector_store %arg13[%c0_280, %c0_281], %383 {strides = array<i32>} : memref<8x32xf32, #tpu.memory_space<vmem>>, vector<8x32xf32>,
    %c0_282 = arith.constant 0 : index
    %c0_283 = arith.constant 0 : index
    %385 = vector.load %arg14[%c0_282, %c0_283] : memref<8x32xf32, #tpu.memory_space<vmem>>, vector<8x32xf32>
    %386 = arith.select %381, %377, %385 : vector<8x32xi1>, vector<8x32xf32>
    %c0_284 = arith.constant 0 : index
    %c0_285 = arith.constant 0 : index
    %387 = vector.load %arg14[%c0_284, %c0_285] : memref<8x32xf32, #tpu.memory_space<vmem>>, vector<8x32xf32>
    tpu.vector_store %arg14[%c0_284, %c0_285], %386 {strides = array<i32>} : memref<8x32xf32, #tpu.memory_space<vmem>>, vector<8x32xf32>,
    %c0_286 = arith.constant 0 : index
    %c0_287 = arith.constant 0 : index
    %388 = vector.load %arg13[%c0_286, %c0_287] : memref<8x32xf32, #tpu.memory_space<vmem>>, vector<8x32xf32>
    %c16_288 = arith.constant 16 : index
    %c0_289 = arith.constant 0 : index
    %389 = vector.load %arg11[%c16_288, %c0_289] : memref<64x32xf32, #tpu.memory_space<vmem>>, vector<8x32xf32>
    tpu.vector_store %arg11[%c16_288, %c0_289], %388 {strides = array<i32>} : memref<64x32xf32, #tpu.memory_space<vmem>>, vector<8x32xf32>,
    %c24_290 = arith.constant 24 : index
    %c0_291 = arith.constant 0 : index
    %390 = vector.load %arg12[%c24_290, %c0_291] : memref<64x128xf32, #tpu.memory_space<vmem>>, vector<8x128xf32>
    %c0_292 = arith.constant 0 : index
    %c0_293 = arith.constant 0 : index
    %391 = vector.load %arg13[%c0_292, %c0_293] : memref<8x32xf32, #tpu.memory_space<vmem>>, vector<8x32xf32>
    %c0_294 = arith.constant 0 : index
    %c0_295 = arith.constant 0 : index
    %392 = vector.load %arg6[%c0_294, %c0_295] : memref<32x128xf32, #tpu.memory_space<vmem>>, vector<32x128xf32>
    %cst_296 = arith.constant dense<0.000000e+00> : vector<8x128xf32>
    %393 = tpu.matmul %391, %392, %cst_296 {dimension_numbers = #tpu.dot_dimension_numbers<[1], [0], [0], [1], [0, 0, 1, 1], [], []>} : vector<8x32xf32>, vector<32x128xf32>, vector<8x128xf32> -> vector<8x128xf32>
    %394 = arith.addf %390, %393 : vector<8x128xf32>
    %cst_297 = arith.constant 0.000000e+00 : f32
    %395 = vector.broadcast %cst_297 : f32 to vector<8x128xf32>
    %396 = arith.subf %395, %394 : vector<8x128xf32>
    %397 = math.exp %396 : vector<8x128xf32>
    %cst_298 = arith.constant 1.000000e+00 : f32
    %398 = vector.broadcast %cst_298 : f32 to vector<8x128xf32>
    %399 = arith.addf %398, %397 : vector<8x128xf32>
    %cst_299 = arith.constant 1.000000e+00 : f32
    %400 = vector.broadcast %cst_299 : f32 to vector<8x128xf32>
    %401 = arith.divf %400, %399 : vector<8x128xf32>
    %402 = vector.extract_strided_slice %401 {offsets = [0, 0], sizes = [8, 32], strides = [1, 1]} : vector<8x128xf32> to vector<8x32xf32>
    %403 = vector.extract_strided_slice %401 {offsets = [0, 32], sizes = [8, 32], strides = [1, 1]} : vector<8x128xf32> to vector<8x32xf32>
    %404 = vector.extract_strided_slice %401 {offsets = [0, 96], sizes = [8, 32], strides = [1, 1]} : vector<8x128xf32> to vector<8x32xf32>
    %405 = vector.extract_strided_slice %394 {offsets = [0, 64], sizes = [8, 32], strides = [1, 1]} : vector<8x128xf32> to vector<8x32xf32>
    %406 = math.tanh %405 : vector<8x32xf32>
    %c0_300 = arith.constant 0 : index
    %c0_301 = arith.constant 0 : index
    %407 = vector.load %arg14[%c0_300, %c0_301] : memref<8x32xf32, #tpu.memory_space<vmem>>, vector<8x32xf32>
    %408 = arith.mulf %403, %407 : vector<8x32xf32>
    %409 = arith.mulf %402, %406 : vector<8x32xf32>
    %410 = arith.addf %408, %409 : vector<8x32xf32>
    %411 = math.tanh %410 : vector<8x32xf32>
    %412 = arith.mulf %404, %411 : vector<8x32xf32>
    %c3_i32_302 = arith.constant 3 : i32
    %413 = vector.broadcast %c3_i32_302 : i32 to vector<8x32xi32>
    %414 = arith.cmpi sgt, %2, %413 : vector<8x32xi32>
    %c0_303 = arith.constant 0 : index
    %c0_304 = arith.constant 0 : index
    %415 = vector.load %arg13[%c0_303, %c0_304] : memref<8x32xf32, #tpu.memory_space<vmem>>, vector<8x32xf32>
    %416 = arith.select %414, %412, %415 : vector<8x32xi1>, vector<8x32xf32>
    %c0_305 = arith.constant 0 : index
    %c0_306 = arith.constant 0 : index
    %417 = vector.load %arg13[%c0_305, %c0_306] : memref<8x32xf32, #tpu.memory_space<vmem>>, vector<8x32xf32>
    tpu.vector_store %arg13[%c0_305, %c0_306], %416 {strides = array<i32>} : memref<8x32xf32, #tpu.memory_space<vmem>>, vector<8x32xf32>,
    %c0_307 = arith.constant 0 : index
    %c0_308 = arith.constant 0 : index
    %418 = vector.load %arg14[%c0_307, %c0_308] : memref<8x32xf32, #tpu.memory_space<vmem>>, vector<8x32xf32>
    %419 = arith.select %414, %410, %418 : vector<8x32xi1>, vector<8x32xf32>
    %c0_309 = arith.constant 0 : index
    %c0_310 = arith.constant 0 : index
    %420 = vector.load %arg14[%c0_309, %c0_310] : memref<8x32xf32, #tpu.memory_space<vmem>>, vector<8x32xf32>
    tpu.vector_store %arg14[%c0_309, %c0_310], %419 {strides = array<i32>} : memref<8x32xf32, #tpu.memory_space<vmem>>, vector<8x32xf32>,
    %c0_311 = arith.constant 0 : index
    %c0_312 = arith.constant 0 : index
    %421 = vector.load %arg13[%c0_311, %c0_312] : memref<8x32xf32, #tpu.memory_space<vmem>>, vector<8x32xf32>
    %c24_313 = arith.constant 24 : index
    %c0_314 = arith.constant 0 : index
    %422 = vector.load %arg11[%c24_313, %c0_314] : memref<64x32xf32, #tpu.memory_space<vmem>>, vector<8x32xf32>
    tpu.vector_store %arg11[%c24_313, %c0_314], %421 {strides = array<i32>} : memref<64x32xf32, #tpu.memory_space<vmem>>, vector<8x32xf32>,
    %c32_315 = arith.constant 32 : index
    %c0_316 = arith.constant 0 : index
    %423 = vector.load %arg12[%c32_315, %c0_316] : memref<64x128xf32, #tpu.memory_space<vmem>>, vector<8x128xf32>
    %c0_317 = arith.constant 0 : index
    %c0_318 = arith.constant 0 : index
    %424 = vector.load %arg13[%c0_317, %c0_318] : memref<8x32xf32, #tpu.memory_space<vmem>>, vector<8x32xf32>
    %c0_319 = arith.constant 0 : index
    %c0_320 = arith.constant 0 : index
    %425 = vector.load %arg6[%c0_319, %c0_320] : memref<32x128xf32, #tpu.memory_space<vmem>>, vector<32x128xf32>
    %cst_321 = arith.constant dense<0.000000e+00> : vector<8x128xf32>
    %426 = tpu.matmul %424, %425, %cst_321 {dimension_numbers = #tpu.dot_dimension_numbers<[1], [0], [0], [1], [0, 0, 1, 1], [], []>} : vector<8x32xf32>, vector<32x128xf32>, vector<8x128xf32> -> vector<8x128xf32>
    %427 = arith.addf %423, %426 : vector<8x128xf32>
    %cst_322 = arith.constant 0.000000e+00 : f32
    %428 = vector.broadcast %cst_322 : f32 to vector<8x128xf32>
    %429 = arith.subf %428, %427 : vector<8x128xf32>
    %430 = math.exp %429 : vector<8x128xf32>
    %cst_323 = arith.constant 1.000000e+00 : f32
    %431 = vector.broadcast %cst_323 : f32 to vector<8x128xf32>
    %432 = arith.addf %431, %430 : vector<8x128xf32>
    %cst_324 = arith.constant 1.000000e+00 : f32
    %433 = vector.broadcast %cst_324 : f32 to vector<8x128xf32>
    %434 = arith.divf %433, %432 : vector<8x128xf32>
    %435 = vector.extract_strided_slice %434 {offsets = [0, 0], sizes = [8, 32], strides = [1, 1]} : vector<8x128xf32> to vector<8x32xf32>
    %436 = vector.extract_strided_slice %434 {offsets = [0, 32], sizes = [8, 32], strides = [1, 1]} : vector<8x128xf32> to vector<8x32xf32>
    %437 = vector.extract_strided_slice %434 {offsets = [0, 96], sizes = [8, 32], strides = [1, 1]} : vector<8x128xf32> to vector<8x32xf32>
    %438 = vector.extract_strided_slice %427 {offsets = [0, 64], sizes = [8, 32], strides = [1, 1]} : vector<8x128xf32> to vector<8x32xf32>
    %439 = math.tanh %438 : vector<8x32xf32>
    %c0_325 = arith.constant 0 : index
    %c0_326 = arith.constant 0 : index
    %440 = vector.load %arg14[%c0_325, %c0_326] : memref<8x32xf32, #tpu.memory_space<vmem>>, vector<8x32xf32>
    %441 = arith.mulf %436, %440 : vector<8x32xf32>
    %442 = arith.mulf %435, %439 : vector<8x32xf32>
    %443 = arith.addf %441, %442 : vector<8x32xf32>
    %444 = math.tanh %443 : vector<8x32xf32>
    %445 = arith.mulf %437, %444 : vector<8x32xf32>
    %c4_i32_327 = arith.constant 4 : i32
    %446 = vector.broadcast %c4_i32_327 : i32 to vector<8x32xi32>
    %447 = arith.cmpi sgt, %2, %446 : vector<8x32xi32>
    %c0_328 = arith.constant 0 : index
    %c0_329 = arith.constant 0 : index
    %448 = vector.load %arg13[%c0_328, %c0_329] : memref<8x32xf32, #tpu.memory_space<vmem>>, vector<8x32xf32>
    %449 = arith.select %447, %445, %448 : vector<8x32xi1>, vector<8x32xf32>
    %c0_330 = arith.constant 0 : index
    %c0_331 = arith.constant 0 : index
    %450 = vector.load %arg13[%c0_330, %c0_331] : memref<8x32xf32, #tpu.memory_space<vmem>>, vector<8x32xf32>
    tpu.vector_store %arg13[%c0_330, %c0_331], %449 {strides = array<i32>} : memref<8x32xf32, #tpu.memory_space<vmem>>, vector<8x32xf32>,
    %c0_332 = arith.constant 0 : index
    %c0_333 = arith.constant 0 : index
    %451 = vector.load %arg14[%c0_332, %c0_333] : memref<8x32xf32, #tpu.memory_space<vmem>>, vector<8x32xf32>
    %452 = arith.select %447, %443, %451 : vector<8x32xi1>, vector<8x32xf32>
    %c0_334 = arith.constant 0 : index
    %c0_335 = arith.constant 0 : index
    %453 = vector.load %arg14[%c0_334, %c0_335] : memref<8x32xf32, #tpu.memory_space<vmem>>, vector<8x32xf32>
    tpu.vector_store %arg14[%c0_334, %c0_335], %452 {strides = array<i32>} : memref<8x32xf32, #tpu.memory_space<vmem>>, vector<8x32xf32>,
    %c0_336 = arith.constant 0 : index
    %c0_337 = arith.constant 0 : index
    %454 = vector.load %arg13[%c0_336, %c0_337] : memref<8x32xf32, #tpu.memory_space<vmem>>, vector<8x32xf32>
    %c32_338 = arith.constant 32 : index
    %c0_339 = arith.constant 0 : index
    %455 = vector.load %arg11[%c32_338, %c0_339] : memref<64x32xf32, #tpu.memory_space<vmem>>, vector<8x32xf32>
    tpu.vector_store %arg11[%c32_338, %c0_339], %454 {strides = array<i32>} : memref<64x32xf32, #tpu.memory_space<vmem>>, vector<8x32xf32>,
    %c40_340 = arith.constant 40 : index
    %c0_341 = arith.constant 0 : index
    %456 = vector.load %arg12[%c40_340, %c0_341] : memref<64x128xf32, #tpu.memory_space<vmem>>, vector<8x128xf32>
    %c0_342 = arith.constant 0 : index
    %c0_343 = arith.constant 0 : index
    %457 = vector.load %arg13[%c0_342, %c0_343] : memref<8x32xf32, #tpu.memory_space<vmem>>, vector<8x32xf32>
    %c0_344 = arith.constant 0 : index
    %c0_345 = arith.constant 0 : index
    %458 = vector.load %arg6[%c0_344, %c0_345] : memref<32x128xf32, #tpu.memory_space<vmem>>, vector<32x128xf32>
    %cst_346 = arith.constant dense<0.000000e+00> : vector<8x128xf32>
    %459 = tpu.matmul %457, %458, %cst_346 {dimension_numbers = #tpu.dot_dimension_numbers<[1], [0], [0], [1], [0, 0, 1, 1], [], []>} : vector<8x32xf32>, vector<32x128xf32>, vector<8x128xf32> -> vector<8x128xf32>
    %460 = arith.addf %456, %459 : vector<8x128xf32>
    %cst_347 = arith.constant 0.000000e+00 : f32
    %461 = vector.broadcast %cst_347 : f32 to vector<8x128xf32>
    %462 = arith.subf %461, %460 : vector<8x128xf32>
    %463 = math.exp %462 : vector<8x128xf32>
    %cst_348 = arith.constant 1.000000e+00 : f32
    %464 = vector.broadcast %cst_348 : f32 to vector<8x128xf32>
    %465 = arith.addf %464, %463 : vector<8x128xf32>
    %cst_349 = arith.constant 1.000000e+00 : f32
    %466 = vector.broadcast %cst_349 : f32 to vector<8x128xf32>
    %467 = arith.divf %466, %465 : vector<8x128xf32>
    %468 = vector.extract_strided_slice %467 {offsets = [0, 0], sizes = [8, 32], strides = [1, 1]} : vector<8x128xf32> to vector<8x32xf32>
    %469 = vector.extract_strided_slice %467 {offsets = [0, 32], sizes = [8, 32], strides = [1, 1]} : vector<8x128xf32> to vector<8x32xf32>
    %470 = vector.extract_strided_slice %467 {offsets = [0, 96], sizes = [8, 32], strides = [1, 1]} : vector<8x128xf32> to vector<8x32xf32>
    %471 = vector.extract_strided_slice %460 {offsets = [0, 64], sizes = [8, 32], strides = [1, 1]} : vector<8x128xf32> to vector<8x32xf32>
    %472 = math.tanh %471 : vector<8x32xf32>
    %c0_350 = arith.constant 0 : index
    %c0_351 = arith.constant 0 : index
    %473 = vector.load %arg14[%c0_350, %c0_351] : memref<8x32xf32, #tpu.memory_space<vmem>>, vector<8x32xf32>
    %474 = arith.mulf %469, %473 : vector<8x32xf32>
    %475 = arith.mulf %468, %472 : vector<8x32xf32>
    %476 = arith.addf %474, %475 : vector<8x32xf32>
    %477 = math.tanh %476 : vector<8x32xf32>
    %478 = arith.mulf %470, %477 : vector<8x32xf32>
    %c5_i32_352 = arith.constant 5 : i32
    %479 = vector.broadcast %c5_i32_352 : i32 to vector<8x32xi32>
    %480 = arith.cmpi sgt, %2, %479 : vector<8x32xi32>
    %c0_353 = arith.constant 0 : index
    %c0_354 = arith.constant 0 : index
    %481 = vector.load %arg13[%c0_353, %c0_354] : memref<8x32xf32, #tpu.memory_space<vmem>>, vector<8x32xf32>
    %482 = arith.select %480, %478, %481 : vector<8x32xi1>, vector<8x32xf32>
    %c0_355 = arith.constant 0 : index
    %c0_356 = arith.constant 0 : index
    %483 = vector.load %arg13[%c0_355, %c0_356] : memref<8x32xf32, #tpu.memory_space<vmem>>, vector<8x32xf32>
    tpu.vector_store %arg13[%c0_355, %c0_356], %482 {strides = array<i32>} : memref<8x32xf32, #tpu.memory_space<vmem>>, vector<8x32xf32>,
    %c0_357 = arith.constant 0 : index
    %c0_358 = arith.constant 0 : index
    %484 = vector.load %arg14[%c0_357, %c0_358] : memref<8x32xf32, #tpu.memory_space<vmem>>, vector<8x32xf32>
    %485 = arith.select %480, %476, %484 : vector<8x32xi1>, vector<8x32xf32>
    %c0_359 = arith.constant 0 : index
    %c0_360 = arith.constant 0 : index
    %486 = vector.load %arg14[%c0_359, %c0_360] : memref<8x32xf32, #tpu.memory_space<vmem>>, vector<8x32xf32>
    tpu.vector_store %arg14[%c0_359, %c0_360], %485 {strides = array<i32>} : memref<8x32xf32, #tpu.memory_space<vmem>>, vector<8x32xf32>,
    %c0_361 = arith.constant 0 : index
    %c0_362 = arith.constant 0 : index
    %487 = vector.load %arg13[%c0_361, %c0_362] : memref<8x32xf32, #tpu.memory_space<vmem>>, vector<8x32xf32>
    %c40_363 = arith.constant 40 : index
    %c0_364 = arith.constant 0 : index
    %488 = vector.load %arg11[%c40_363, %c0_364] : memref<64x32xf32, #tpu.memory_space<vmem>>, vector<8x32xf32>
    tpu.vector_store %arg11[%c40_363, %c0_364], %487 {strides = array<i32>} : memref<64x32xf32, #tpu.memory_space<vmem>>, vector<8x32xf32>,
    %c48_365 = arith.constant 48 : index
    %c0_366 = arith.constant 0 : index
    %489 = vector.load %arg12[%c48_365, %c0_366] : memref<64x128xf32, #tpu.memory_space<vmem>>, vector<8x128xf32>
    %c0_367 = arith.constant 0 : index
    %c0_368 = arith.constant 0 : index
    %490 = vector.load %arg13[%c0_367, %c0_368] : memref<8x32xf32, #tpu.memory_space<vmem>>, vector<8x32xf32>
    %c0_369 = arith.constant 0 : index
    %c0_370 = arith.constant 0 : index
    %491 = vector.load %arg6[%c0_369, %c0_370] : memref<32x128xf32, #tpu.memory_space<vmem>>, vector<32x128xf32>
    %cst_371 = arith.constant dense<0.000000e+00> : vector<8x128xf32>
    %492 = tpu.matmul %490, %491, %cst_371 {dimension_numbers = #tpu.dot_dimension_numbers<[1], [0], [0], [1], [0, 0, 1, 1], [], []>} : vector<8x32xf32>, vector<32x128xf32>, vector<8x128xf32> -> vector<8x128xf32>
    %493 = arith.addf %489, %492 : vector<8x128xf32>
    %cst_372 = arith.constant 0.000000e+00 : f32
    %494 = vector.broadcast %cst_372 : f32 to vector<8x128xf32>
    %495 = arith.subf %494, %493 : vector<8x128xf32>
    %496 = math.exp %495 : vector<8x128xf32>
    %cst_373 = arith.constant 1.000000e+00 : f32
    %497 = vector.broadcast %cst_373 : f32 to vector<8x128xf32>
    %498 = arith.addf %497, %496 : vector<8x128xf32>
    %cst_374 = arith.constant 1.000000e+00 : f32
    %499 = vector.broadcast %cst_374 : f32 to vector<8x128xf32>
    %500 = arith.divf %499, %498 : vector<8x128xf32>
    %501 = vector.extract_strided_slice %500 {offsets = [0, 0], sizes = [8, 32], strides = [1, 1]} : vector<8x128xf32> to vector<8x32xf32>
    %502 = vector.extract_strided_slice %500 {offsets = [0, 32], sizes = [8, 32], strides = [1, 1]} : vector<8x128xf32> to vector<8x32xf32>
    %503 = vector.extract_strided_slice %500 {offsets = [0, 96], sizes = [8, 32], strides = [1, 1]} : vector<8x128xf32> to vector<8x32xf32>
    %504 = vector.extract_strided_slice %493 {offsets = [0, 64], sizes = [8, 32], strides = [1, 1]} : vector<8x128xf32> to vector<8x32xf32>
    %505 = math.tanh %504 : vector<8x32xf32>
    %c0_375 = arith.constant 0 : index
    %c0_376 = arith.constant 0 : index
    %506 = vector.load %arg14[%c0_375, %c0_376] : memref<8x32xf32, #tpu.memory_space<vmem>>, vector<8x32xf32>
    %507 = arith.mulf %502, %506 : vector<8x32xf32>
    %508 = arith.mulf %501, %505 : vector<8x32xf32>
    %509 = arith.addf %507, %508 : vector<8x32xf32>
    %510 = math.tanh %509 : vector<8x32xf32>
    %511 = arith.mulf %503, %510 : vector<8x32xf32>
    %c6_i32_377 = arith.constant 6 : i32
    %512 = vector.broadcast %c6_i32_377 : i32 to vector<8x32xi32>
    %513 = arith.cmpi sgt, %2, %512 : vector<8x32xi32>
    %c0_378 = arith.constant 0 : index
    %c0_379 = arith.constant 0 : index
    %514 = vector.load %arg13[%c0_378, %c0_379] : memref<8x32xf32, #tpu.memory_space<vmem>>, vector<8x32xf32>
    %515 = arith.select %513, %511, %514 : vector<8x32xi1>, vector<8x32xf32>
    %c0_380 = arith.constant 0 : index
    %c0_381 = arith.constant 0 : index
    %516 = vector.load %arg13[%c0_380, %c0_381] : memref<8x32xf32, #tpu.memory_space<vmem>>, vector<8x32xf32>
    tpu.vector_store %arg13[%c0_380, %c0_381], %515 {strides = array<i32>} : memref<8x32xf32, #tpu.memory_space<vmem>>, vector<8x32xf32>,
    %c0_382 = arith.constant 0 : index
    %c0_383 = arith.constant 0 : index
    %517 = vector.load %arg14[%c0_382, %c0_383] : memref<8x32xf32, #tpu.memory_space<vmem>>, vector<8x32xf32>
    %518 = arith.select %513, %509, %517 : vector<8x32xi1>, vector<8x32xf32>
    %c0_384 = arith.constant 0 : index
    %c0_385 = arith.constant 0 : index
    %519 = vector.load %arg14[%c0_384, %c0_385] : memref<8x32xf32, #tpu.memory_space<vmem>>, vector<8x32xf32>
    tpu.vector_store %arg14[%c0_384, %c0_385], %518 {strides = array<i32>} : memref<8x32xf32, #tpu.memory_space<vmem>>, vector<8x32xf32>,
    %c0_386 = arith.constant 0 : index
    %c0_387 = arith.constant 0 : index
    %520 = vector.load %arg13[%c0_386, %c0_387] : memref<8x32xf32, #tpu.memory_space<vmem>>, vector<8x32xf32>
    %c48_388 = arith.constant 48 : index
    %c0_389 = arith.constant 0 : index
    %521 = vector.load %arg11[%c48_388, %c0_389] : memref<64x32xf32, #tpu.memory_space<vmem>>, vector<8x32xf32>
    tpu.vector_store %arg11[%c48_388, %c0_389], %520 {strides = array<i32>} : memref<64x32xf32, #tpu.memory_space<vmem>>, vector<8x32xf32>,
    %c56_390 = arith.constant 56 : index
    %c0_391 = arith.constant 0 : index
    %522 = vector.load %arg12[%c56_390, %c0_391] : memref<64x128xf32, #tpu.memory_space<vmem>>, vector<8x128xf32>
    %c0_392 = arith.constant 0 : index
    %c0_393 = arith.constant 0 : index
    %523 = vector.load %arg13[%c0_392, %c0_393] : memref<8x32xf32, #tpu.memory_space<vmem>>, vector<8x32xf32>
    %c0_394 = arith.constant 0 : index
    %c0_395 = arith.constant 0 : index
    %524 = vector.load %arg6[%c0_394, %c0_395] : memref<32x128xf32, #tpu.memory_space<vmem>>, vector<32x128xf32>
    %cst_396 = arith.constant dense<0.000000e+00> : vector<8x128xf32>
    %525 = tpu.matmul %523, %524, %cst_396 {dimension_numbers = #tpu.dot_dimension_numbers<[1], [0], [0], [1], [0, 0, 1, 1], [], []>} : vector<8x32xf32>, vector<32x128xf32>, vector<8x128xf32> -> vector<8x128xf32>
    %526 = arith.addf %522, %525 : vector<8x128xf32>
    %cst_397 = arith.constant 0.000000e+00 : f32
    %527 = vector.broadcast %cst_397 : f32 to vector<8x128xf32>
    %528 = arith.subf %527, %526 : vector<8x128xf32>
    %529 = math.exp %528 : vector<8x128xf32>
    %cst_398 = arith.constant 1.000000e+00 : f32
    %530 = vector.broadcast %cst_398 : f32 to vector<8x128xf32>
    %531 = arith.addf %530, %529 : vector<8x128xf32>
    %cst_399 = arith.constant 1.000000e+00 : f32
    %532 = vector.broadcast %cst_399 : f32 to vector<8x128xf32>
    %533 = arith.divf %532, %531 : vector<8x128xf32>
    %534 = vector.extract_strided_slice %533 {offsets = [0, 0], sizes = [8, 32], strides = [1, 1]} : vector<8x128xf32> to vector<8x32xf32>
    %535 = vector.extract_strided_slice %533 {offsets = [0, 32], sizes = [8, 32], strides = [1, 1]} : vector<8x128xf32> to vector<8x32xf32>
    %536 = vector.extract_strided_slice %533 {offsets = [0, 96], sizes = [8, 32], strides = [1, 1]} : vector<8x128xf32> to vector<8x32xf32>
    %537 = vector.extract_strided_slice %526 {offsets = [0, 64], sizes = [8, 32], strides = [1, 1]} : vector<8x128xf32> to vector<8x32xf32>
    %538 = math.tanh %537 : vector<8x32xf32>
    %c0_400 = arith.constant 0 : index
    %c0_401 = arith.constant 0 : index
    %539 = vector.load %arg14[%c0_400, %c0_401] : memref<8x32xf32, #tpu.memory_space<vmem>>, vector<8x32xf32>
    %540 = arith.mulf %535, %539 : vector<8x32xf32>
    %541 = arith.mulf %534, %538 : vector<8x32xf32>
    %542 = arith.addf %540, %541 : vector<8x32xf32>
    %543 = math.tanh %542 : vector<8x32xf32>
    %544 = arith.mulf %536, %543 : vector<8x32xf32>
    %c7_i32_402 = arith.constant 7 : i32
    %545 = vector.broadcast %c7_i32_402 : i32 to vector<8x32xi32>
    %546 = arith.cmpi sgt, %2, %545 : vector<8x32xi32>
    %c0_403 = arith.constant 0 : index
    %c0_404 = arith.constant 0 : index
    %547 = vector.load %arg13[%c0_403, %c0_404] : memref<8x32xf32, #tpu.memory_space<vmem>>, vector<8x32xf32>
    %548 = arith.select %546, %544, %547 : vector<8x32xi1>, vector<8x32xf32>
    %c0_405 = arith.constant 0 : index
    %c0_406 = arith.constant 0 : index
    %549 = vector.load %arg13[%c0_405, %c0_406] : memref<8x32xf32, #tpu.memory_space<vmem>>, vector<8x32xf32>
    tpu.vector_store %arg13[%c0_405, %c0_406], %548 {strides = array<i32>} : memref<8x32xf32, #tpu.memory_space<vmem>>, vector<8x32xf32>,
    %c0_407 = arith.constant 0 : index
    %c0_408 = arith.constant 0 : index
    %550 = vector.load %arg14[%c0_407, %c0_408] : memref<8x32xf32, #tpu.memory_space<vmem>>, vector<8x32xf32>
    %551 = arith.select %546, %542, %550 : vector<8x32xi1>, vector<8x32xf32>
    %c0_409 = arith.constant 0 : index
    %c0_410 = arith.constant 0 : index
    %552 = vector.load %arg14[%c0_409, %c0_410] : memref<8x32xf32, #tpu.memory_space<vmem>>, vector<8x32xf32>
    tpu.vector_store %arg14[%c0_409, %c0_410], %551 {strides = array<i32>} : memref<8x32xf32, #tpu.memory_space<vmem>>, vector<8x32xf32>,
    %c0_411 = arith.constant 0 : index
    %c0_412 = arith.constant 0 : index
    %553 = vector.load %arg13[%c0_411, %c0_412] : memref<8x32xf32, #tpu.memory_space<vmem>>, vector<8x32xf32>
    %c56_413 = arith.constant 56 : index
    %c0_414 = arith.constant 0 : index
    %554 = vector.load %arg11[%c56_413, %c0_414] : memref<64x32xf32, #tpu.memory_space<vmem>>, vector<8x32xf32>
    tpu.vector_store %arg11[%c56_413, %c0_414], %553 {strides = array<i32>} : memref<64x32xf32, #tpu.memory_space<vmem>>, vector<8x32xf32>,
    %c0_415 = arith.constant 0 : index
    %c0_416 = arith.constant 0 : index
    %555 = vector.load %arg13[%c0_415, %c0_416] : memref<8x32xf32, #tpu.memory_space<vmem>>, vector<8x32xf32>
    %c0_417 = arith.constant 0 : index
    %c0_418 = arith.constant 0 : index
    %556 = vector.load %arg8[%c0_417, %c0_418] : memref<32x4xf32, #tpu.memory_space<vmem>>, vector<32x4xf32>
    %cst_419 = arith.constant dense<0.000000e+00> : vector<8x4xf32>
    %557 = tpu.matmul %555, %556, %cst_419 {dimension_numbers = #tpu.dot_dimension_numbers<[1], [0], [0], [1], [0, 0, 1, 1], [], []>} : vector<8x32xf32>, vector<32x4xf32>, vector<8x4xf32> -> vector<8x4xf32>
    %c0_420 = arith.constant 0 : index
    %c0_421 = arith.constant 0 : index
    %558 = vector.load %arg9[%c0_420, %c0_421] : memref<1x4xf32, #tpu.memory_space<vmem>>, vector<1x4xf32>
    %559 = vector.broadcast %558 : vector<1x4xf32> to vector<8x4xf32>
    %560 = arith.addf %557, %559 : vector<8x4xf32>
    %cst_422 = arith.constant 0.000000e+00 : f32
    %561 = vector.broadcast %cst_422 : f32 to vector<8x4xf32>
    %562 = arith.subf %561, %560 : vector<8x4xf32>
    %563 = math.exp %562 : vector<8x4xf32>
    %cst_423 = arith.constant 1.000000e+00 : f32
    %564 = vector.broadcast %cst_423 : f32 to vector<8x4xf32>
    %565 = arith.addf %564, %563 : vector<8x4xf32>
    %cst_424 = arith.constant 1.000000e+00 : f32
    %566 = vector.broadcast %cst_424 : f32 to vector<8x4xf32>
    %567 = arith.divf %566, %565 : vector<8x4xf32>
    %c0_425 = arith.constant 0 : index
    %c0_426 = arith.constant 0 : index
    %568 = vector.load %arg1[%c0_425, %c0_426] : memref<8x1xi32, #tpu.memory_space<vmem>>, vector<8x1xi32>
    %569 = vector.shape_cast %568 : vector<8x1xi32> to vector<8x1xi32>
    %570 = vector.broadcast %569 : vector<8x1xi32> to vector<8x4xi32>
    %c0_i32_427 = arith.constant 0 : i32
    %571 = vector.broadcast %c0_i32_427 : i32 to vector<8x4xi32>
    %572 = arith.cmpi sgt, %570, %571 : vector<8x4xi32>
    %cst_428 = arith.constant 0xFF800000 : f32
    %573 = vector.broadcast %cst_428 : f32 to vector<8x4xf32>
    %574 = arith.select %572, %567, %573 : vector<8x4xi1>, vector<8x4xf32>
    %cst_429 = arith.constant dense<0xFF800000> : vector<4xf32>
    %575 = vector.multi_reduction <maximumf>, %574, %cst_429 [0] : vector<8x4xf32> to vector<4xf32>
    %576 = vector.shape_cast %575 : vector<4xf32> to vector<1x4xf32>
    %577 = vector.broadcast %576 : vector<1x4xf32> to vector<8x4xf32>
    %578 = arith.subf %567, %577 : vector<8x4xf32>
    %579 = math.exp %578 : vector<8x4xf32>
    %cst_430 = arith.constant 0.000000e+00 : f32
    %580 = vector.broadcast %cst_430 : f32 to vector<8x4xf32>
    %581 = arith.select %572, %579, %580 : vector<8x4xi1>, vector<8x4xf32>
    %cst_431 = arith.constant dense<0.000000e+00> : vector<4xf32>
    %582 = vector.multi_reduction <add>, %581, %cst_431 [0] : vector<8x4xf32> to vector<4xf32>
    %583 = vector.shape_cast %582 : vector<4xf32> to vector<1x4xf32>
    %584 = vector.broadcast %583 : vector<1x4xf32> to vector<8x4xf32>
    %585 = arith.divf %581, %584 : vector<8x4xf32>
    %c0_432 = arith.constant 0 : index
    %c0_433 = arith.constant 0 : index
    %586 = vector.load %arg10[%c0_432, %c0_433] : memref<8x4xf32, #tpu.memory_space<vmem>>, vector<8x4xf32>
    tpu.vector_store %arg10[%c0_432, %c0_433], %585 {strides = array<i32>} : memref<8x4xf32, #tpu.memory_space<vmem>>, vector<8x4xf32>,
    return
  }
}

</mosaic_0001>

<bundles_post_ra>
// kernel: tpu_custom_call.1
= control target key start
LH: loop header
LB: loop body
LE: loop exit
PB: predicated region body
PF: predicated region fallthrough
CT: control target
= control target key end

     0   :  { %vm153_vm0 = vcmask 261120   ;;  %v2988_v0 = vmov 0.0   ;;  %vm2989_vm1 = vmmov 0   ;;  %vm67_vm2 = vcmask 130048   ;;  %s2991_s11 = smov 64   ;;  %s2992_s12 = smov 32   ;;  %s3660_s3 = inlined_call_operand.vmem [shape: f32[32,128], index: 3, kind: input, shape index: {}]   ;;  %s3661_s2 = inlined_call_operand.vmem [shape: bf16[16,128], index: 2, kind: input, shape index: {}]   ;;  %s3662_s0 = inlined_call_operand.vmem [shape: f32[64,16], index: 0, kind: input, shape index: {}]   ;;  %s3663_s4 = inlined_call_operand.vmem [shape: f32[1,128], index: 4, kind: input, shape index: {}]   ;;  %s3664_s1 = inlined_call_operand.vmem [shape: s32[8,1], index: 1, kind: input, shape index: {}]   ;;  %s3665_s5 = inlined_call_operand.vmem [shape: bf16[32,128], index: 5, kind: input, shape index: {}]   ;;  %s3666_s6 = inlined_call_operand.vmem [shape: f32[32,128], index: 6, kind: input, shape index: {}]   ;;  %s3667_s7 = inlined_call_operand.vmem [shape: f32[1,128], index: 7, kind: input, shape index: {}]   ;;  %s3668_s8 = inlined_call_operand.vmem [shape: f32[32,4], index: 8, kind: input, shape index: {}]   ;;  %s3669_s9 = inlined_call_operand.vmem [shape: f32[1,4], index: 9, kind: input, shape index: {}]   ;;  %s3670_s10 = inlined_call_operand.vmem [shape: f32[8,4], index: 10, kind: output, shape index: {}]  }
   0x1   :  { %2642 = vmatprep.subr.mxu1 %v2988_v0  ;;  %v3053_v1 = vld [vmem:[%s3660_s3 + $0x18] sm:$0xff]  ;;  %2650 = vmatprep.mubr.msk.f32.mxu1 %vm2989_vm1, %v2988_v0  ;;  %154 = vst.msk [vmem:[#allocation4] sm:$0xff] %vm153_vm0, %v2988_v0  ;;  %155 = vst.msk [vmem:[#allocation5] sm:$0xff] %vm153_vm0, %v2988_v0  ;;  %v2849_v2 = vld [vmem:[%s3661_s2] sm:$0xff]   ;;  %v2990_v20 = vmov 0   ;;  %s2993_s14 = smov 96  }
   0x2   :  { %2643 = vmatpush3.msra.mxu1 %v3053_v1  ;;  %v3068_v3 = vld [vmem:[%s3660_s3 + $0x10] sm:$0xff]  ;;  %v40_v4 = vld [vmem:[%s3662_s0] sm:$0xff]  ;;  %v41_v5 = vld [vmem:[%s3662_s0 + $0x8] sm:$0xff]  ;;  %2632 = vmatprep.subr.bf16.mxu0 %v2849_v2  ;;  %vm2479_vm11 = vcmask 31744  }
   0x3   :  { %2644 = vmatprep.subr.mxu1 %v2988_v0  ;;  %v3080_v6 = vld [vmem:[%s3660_s3 + $0x8] sm:$0xff]  ;;  %v42_v7 = vld [vmem:[%s3662_s0 + $0x10] sm:$0xff]  ;;  %v48_v8 = vpack.c.bf16 %v41_v5, %v40_v4  ;;  %v43_v9 = vld [vmem:[%s3662_s0 + $0x18] sm:$0xff]  ;;  %2633 = vmatpush3.bf16.msra.mxu0 %v2849_v2 }
   0x4   :  { %2645 = vmatpush3.msra.mxu1 %v3068_v3  ;;  %v49_v10 = vpack.c.bf16 %v43_v9, %v42_v7  ;;  %v3093_v11 = vld [vmem:[%s3660_s3] sm:$0xff]  ;;  %2664 = vmatprep.subr.mxu0 %v2988_v0  ;;  %v45_v5 = vld [vmem:[%s3662_s0 + $0x28] sm:$0xff]  ;;  %v46_v7 = vld [vmem:[%s3662_s0 + $0x30] sm:$0xff] }
   0x5   :  { %2646 = vmatprep.subr.mxu1 %v2988_v0  ;;  %2634 = vmatprep.mubr.msk.bf16.mxu0 %vm67_vm2, %v48_v8  ;;  %v3126_v15 = vld [vmem:[%s3663_s4] ss:$0 sm:$0xff]  ;;  %v47_v9 = vld [vmem:[%s3662_s0 + $0x38] sm:$0xff] }
   0x6   :  { %2647 = vmatpush3.msra.mxu1 %v3080_v6  ;;  %2635 = vmatmul.mubr.msk.bf16.vlgmr.msra.gmra.mxu0 %vm67_vm2, %v49_v10  ;;  %v36_v30 = vld [vmem:[%s3664_s1] sm:$0xff]  ;;  %v51_v10 = vpack.c.bf16 %v47_v9, %v46_v7 }
   0x7   :  { %2648 = vmatprep.subr.mxu1 %v2988_v0  ;;  %2665 = vmatpush3.msra.mxu0 %v3053_v1  ;;  %v44_v4 = vld [vmem:[%s3662_s0 + $0x20] sm:$0xff] }
   0x8   :  { %2649 = vmatpush3.msra.mxu1 %v3093_v11  ;;  %v157_v12 = vld [vmem:[#allocation4] sm:$0xff]  ;;  %2666 = vmatprep.subr.mxu0 %v2988_v0  ;;  %v243_v22 = vld [vmem:[#allocation5] sm:$0xff]  ;;  %v50_v8 = vpack.c.bf16 %v45_v5, %v44_v4 }
   0x9   :  { %2651 = vmatmul.mubr.msk.f32.vlgmr.msra.gmra.mxu1 %vm153_vm0, %v157_v12  ;;  %2653 = vmatprep.subr.mxu1 %v2988_v0 }
   0xa   :  { %2654 = vmatpush3.msra.mxu1 %v3053_v1  ;;  %2661 = vmatprep.mubr.msk.f32.mxu1 %vm2989_vm1, %v2988_v0 }
   0xb   :  { %2655 = vmatprep.subr.mxu1 %v2988_v0  ;;  %2667 = vmatpush3.msra.mxu0 %v3068_v3 }
   0xc   :  { %2656 = vmatpush3.msra.mxu1 %v3068_v3  ;;  %2668 = vmatprep.subr.mxu0 %v2988_v0 }
   0xd   :  { %2657 = vmatprep.subr.mxu1 %v2988_v0  ;;  %2669 = vmatpush3.msra.mxu0 %v3080_v6 }
   0xe   :  { %2658 = vmatpush3.msra.mxu1 %v3080_v6  ;;  %2670 = vmatprep.subr.mxu0 %v2988_v0 }
   0xf   :  { %2659 = vmatprep.subr.mxu1 %v2988_v0  ;;  %2671 = vmatpush3.msra.mxu0 %v3093_v11 }
  0x10   :  { %2660 = vmatpush3.msra.mxu1 %v3093_v11  ;;  %2686 = vmatprep.subr.mxu0 %v2988_v0 }
  0x11   :  { %2675 = vmatprep.subr.mxu1 %v2988_v0  ;;  %2847 = vset.pattern.permute.xlu1 %v2990_v20 }
  0x12   :  { %2848 = vset.pattern.permute.xlu0 %v2990_v20  ;;  %2638 = vmatprep.mubr.msk.bf16.mxu0 %vm67_vm2, %v50_v8 }
  0x13   :  { %2639 = vmatmul.mubr.msk.bf16.gmra.mxu0 %vm67_vm2, %v51_v10 }
  0x14   :  { %2672 = vmatprep.mubr.msk.f32.mxu0 %vm2989_vm1, %v2988_v0 }
  0xc6   :  { %v3121_v13 = vpop.f32.mrf.mxu0 }
  0xc8   :  { %v114_v16 = vpop.f32.mrf.mxu0 }
  0xc9   :  { %v231_v14 = vpop.f32.mrf.mxu1  ;;  %v115_v17 = vadd.f32 %v3126_v15, %v114_v16 }
  0xca   :  { %v3162_v47 = vpop.f32.mrf.mxu0 }
  0xcb   :  { %v2652_v18 = vpop.f32.mrf.mxu1  ;;  %v235_v19 = vadd.f32 %v231_v14, %v115_v17 }
  0xcc   :  { %v117_v48 = vpop.f32.mrf.mxu0 }
  0xcd   :  { %2852 = vtanh.f32 %v235_v19  ;;  %v236_v23 = vsub.f32 0.0, %v235_v19  ;;  %v118_v49 = vadd.f32 %v3126_v15, %v117_v48 }
  0xcf   :  { %v237_v24 = vmul.f32 1.442695, %v236_v23 }
  0xd1   :  { %2854 = vpow2.f32 %v237_v24 }
  0xda   :  { %v2853_v21 = vpop.eup %2852 }
  0xdb   :  { %250 = vrot.lane.b32.xlu0 %v2853_v21, %s2991_s11 }
  0xde   :  { %v2855_v25 = vpop.eup %2854 }
  0xdf   :  { %245 = vrot.lane.b32.xlu0 %v243_v22, %s2992_s12  ;;  %v239_v26 = vadd.f32 1.0, %v2855_v25  ;;  %v3208_v25 = vpop.f32.mrf.mxu0 }
  0xe1   :  { %2856 = vrcp.f32 %v239_v26  ;;  %v3210_v26 = vpop.f32.mrf.mxu0 }
  0xee   :  { %v2857_v27 = vpop.eup %2856 }
 0x14d   :  { %v251_v28 = vpop.permute.xlu0 %250 }
 0x14e   :  { %v253_v29 = vmul.f32 %v2857_v27, %v251_v28 }
 0x150   :  { %255 = vrot.lane.b32.xlu1 %v253_v29, %s2992_s12  ;;  %v123_v29 = vadd.f32 %v3121_v13, %v3126_v15 }
 0x151   :  { %v246_v31 = vpop.permute.xlu0 %245 }
 0x152   :  { %v248_v32 = vmul.f32 %v2857_v27, %v246_v31 }
 0x154   :  { %38 = vperm.xlu1 %2847, %v36_v30  }
 0x158   :  { %266 = vrot.lane.b32.xlu1 %v157_v12, %s2993_s14 }
 0x15c   :  { %277 = vrot.lane.b32.xlu1 %v243_v22, %s2992_s12 }
 0x1c2   :  { %v256_v33 = vpop.permute.xlu1 %255 }
 0x1c3   :  { %v258_v34 = vadd.f32 %v256_v33, %v248_v32 }
 0x1c5   :  { %2858 = vtanh.f32 %v258_v34 }
 0x1cf   :  { %v3138_v36 = vpop.permute.xlu1 %38 }
 0x1d0   :  { %vm265_vm3 = vcmp.gt.s32.totalorder %v3138_v36, 0  ;;  %vm397_vm4 = vcmp.gt.s32.totalorder %v3138_v36, 1  ;;  %vm529_vm5 = vcmp.gt.s32.totalorder %v3138_v36, 2  ;;  %vm661_vm6 = vcmp.gt.s32.totalorder %v3138_v36, 3 }
 0x1d1   :  { %vm793_vm7 = vcmp.gt.s32.totalorder %v3138_v36, 4  ;;  %vm925_vm8 = vcmp.gt.s32.totalorder %v3138_v36, 5  ;;  %vm1057_vm9 = vcmp.gt.s32.totalorder %v3138_v36, 6  ;;  %vm1189_vm10 = vcmp.gt.s32.totalorder %v3138_v36, 7 }
 0x1d2   :  { %v2859_v35 = vpop.eup %2858 }
 0x1d3   :  { %261 = vrot.lane.b32.xlu0 %v2859_v35, %s2991_s11  ;;  %v267_v37 = vpop.permute.xlu1 %266 }
 0x1d7   :  { %v278_v41 = vpop.permute.xlu1 %277 }
 0x1d8   :  { %v280_v42 = vsel %vm265_vm3, %v258_v34, %v278_v41 }
 0x245   :  { %v262_v38 = vpop.permute.xlu0 %261 }
 0x246   :  { %v264_v39 = vmul.f32 %v2857_v27, %v262_v38  ;;  %v3212_v27 = vpop.f32.mrf.mxu0 }
 0x248   :  { %v269_v40 = vsel %vm265_vm3, %v264_v39, %v267_v37  ;;  %v3214_v28 = vpop.f32.mrf.mxu0 }
 0x249   :  { %271 = vrot.lane.b32.xlu0 %v269_v40, %s2992_s12 }
 0x24d   :  { %282 = vrot.lane.b32.xlu0 %v280_v42, %s2993_s14 }
 0x2bb   :  { %v272_v43 = vpop.permute.xlu0 %271 }
 0x2bc   :  { %274 = vst.msk [vmem:[#allocation4] sm:$0xff] %vm153_vm0, %v272_v43 }
 0x2bf   :  { %v283_v44 = vpop.permute.xlu0 %282 }
 0x2c0   :  { %285 = vst.msk [vmem:[#allocation5] sm:$0xff] %vm153_vm0, %v283_v44 }
 0x2c3   :  { %v289_v45 = vld [vmem:[#allocation4] sm:$0xff] }
 0x2c4   :  { %2662 = vmatmul.mubr.msk.f32.vlgmr.msra.gmra.mxu1 %vm153_vm0, %v289_v45  ;;  %287 = vst.msk [vmem:[#allocation2] sm:$0xff] %vm153_vm0, %v289_v45 }
 0x2c5   :  { %2676 = vmatpush3.msra.mxu1 %v3053_v1  ;;  %2683 = vmatprep.mubr.msk.f32.mxu1 %vm2989_vm1, %v2988_v0 }
 0x2c6   :  { %2677 = vmatprep.subr.mxu1 %v2988_v0 }
 0x2c7   :  { %v375_v46 = vld [vmem:[#allocation5] sm:$0xff]  ;;  %2678 = vmatpush3.msra.mxu1 %v3068_v3 }
 0x2c8   :  { %377 = vrot.lane.b32.xlu0 %v375_v46, %s2992_s12  ;;  %2679 = vmatprep.subr.mxu1 %v2988_v0 }
 0x2c9   :  { %2680 = vmatpush3.msra.mxu1 %v3080_v6 }
 0x2ca   :  { %2681 = vmatprep.subr.mxu1 %v2988_v0 }
 0x2cb   :  { %2682 = vmatpush3.msra.mxu1 %v3093_v11 }
 0x2cc   :  { %2697 = vmatprep.subr.mxu1 %v2988_v0 }
 0x33a   :  { %v378_v61 = vpop.permute.xlu0 %377 }
 0x384   :  { %v363_v50 = vpop.f32.mrf.mxu1 }
 0x385   :  { %v367_v51 = vadd.f32 %v363_v50, %v118_v49 }
 0x386   :  { %v2663_v52 = vpop.f32.mrf.mxu1 }
 0x387   :  { %2860 = vtanh.f32 %v367_v51  ;;  %v368_v54 = vsub.f32 0.0, %v367_v51 }
 0x389   :  { %v369_v55 = vmul.f32 1.442695, %v368_v54 }
 0x38b   :  { %2862 = vpow2.f32 %v369_v55 }
 0x394   :  { %v2861_v53 = vpop.eup %2860 }
 0x395   :  { %382 = vrot.lane.b32.xlu1 %v2861_v53, %s2991_s11 }
 0x398   :  { %v2863_v56 = vpop.eup %2862 }
 0x399   :  { %v371_v57 = vadd.f32 1.0, %v2863_v56 }
 0x39b   :  { %2864 = vrcp.f32 %v371_v57  ;;  %v126_v57 = vadd.f32 %v3162_v47, %v3126_v15 }
 0x3a8   :  { %v2865_v58 = vpop.eup %2864 }
 0x3a9   :  { %v380_v62 = vmul.f32 %v2865_v58, %v378_v61 }
 0x407   :  { %v383_v59 = vpop.permute.xlu1 %382 }
 0x408   :  { %v385_v60 = vmul.f32 %v2865_v58, %v383_v59 }
 0x40a   :  { %387 = vrot.lane.b32.xlu1 %v385_v60, %s2992_s12 }
 0x40e   :  { %398 = vrot.lane.b32.xlu1 %v289_v45, %s2993_s14 }
 0x412   :  { %409 = vrot.lane.b32.xlu1 %v375_v46, %s2992_s12 }
 0x47c   :  { %v388_v63 = vpop.permute.xlu1 %387 }
 0x47d   :  { %v390_v2 = vadd.f32 %v388_v63, %v380_v62 }
 0x47f   :  { %2866 = vtanh.f32 %v390_v2 }
 0x480   :  { %v399_v14 = vpop.permute.xlu1 %398 }
 0x484   :  { %v410_v19 = vpop.permute.xlu1 %409 }
 0x485   :  { %v412_v20 = vsel %vm397_vm4, %v390_v2, %v410_v19 }
 0x48c   :  { %v2867_v12 = vpop.eup %2866 }
 0x48d   :  { %393 = vrot.lane.b32.xlu0 %v2867_v12, %s2991_s11 }
 0x4ff   :  { %v394_v16 = vpop.permute.xlu0 %393 }
 0x500   :  { %v396_v17 = vmul.f32 %v2865_v58, %v394_v16 }
 0x502   :  { %v401_v18 = vsel %vm397_vm4, %v396_v17, %v399_v14 }
 0x503   :  { %403 = vrot.lane.b32.xlu0 %v401_v18, %s2992_s12 }
 0x507   :  { %414 = vrot.lane.b32.xlu0 %v412_v20, %s2993_s14 }
 0x575   :  { %v404_v21 = vpop.permute.xlu0 %403 }
 0x576   :  { %406 = vst.msk [vmem:[#allocation4] sm:$0xff] %vm153_vm0, %v404_v21 }
 0x579   :  { %v415_v22 = vpop.permute.xlu0 %414 }
 0x57a   :  { %417 = vst.msk [vmem:[#allocation5] sm:$0xff] %vm153_vm0, %v415_v22 }
 0x57d   :  { %v421_v23 = vld [vmem:[#allocation4] sm:$0xff] }
 0x57e   :  { %2673 = vmatmul.mubr.msk.f32.vlgmr.msra.gmra.mxu0 %vm153_vm0, %v421_v23  ;;  %419 = vst.msk [vmem:[#allocation2 + $0x8] sm:$0xff] %vm153_vm0, %v421_v23 }
 0x57f   :  { %2687 = vmatpush3.msra.mxu0 %v3053_v1  ;;  %2694 = vmatprep.mubr.msk.f32.mxu0 %vm2989_vm1, %v2988_v0 }
 0x580   :  { %2688 = vmatprep.subr.mxu0 %v2988_v0 }
 0x581   :  { %v507_v24 = vld [vmem:[#allocation5] sm:$0xff]  ;;  %2689 = vmatpush3.msra.mxu0 %v3068_v3 }
 0x582   :  { %509 = vrot.lane.b32.xlu0 %v507_v24, %s2992_s12  ;;  %2690 = vmatprep.subr.mxu0 %v2988_v0 }
 0x583   :  { %2691 = vmatpush3.msra.mxu0 %v3080_v6 }
 0x584   :  { %2692 = vmatprep.subr.mxu0 %v2988_v0 }
 0x585   :  { %2693 = vmatpush3.msra.mxu0 %v3093_v11 }
 0x586   :  { %2708 = vmatprep.subr.mxu0 %v2988_v0 }
 0x5f4   :  { %v510_v13 = vpop.permute.xlu0 %509 }
 0x63e   :  { %v495_v30 = vpop.f32.mrf.mxu0 }
 0x63f   :  { %v499_v31 = vadd.f32 %v495_v30, %v123_v29  ;;  %v131_v30 = vadd.f32 %v3126_v15, %v3210_v26 }
 0x640   :  { %v2674_v32 = vpop.f32.mrf.mxu0 }
 0x641   :  { %2868 = vtanh.f32 %v499_v31  ;;  %v500_v34 = vsub.f32 0.0, %v499_v31 }
 0x643   :  { %v501_v35 = vmul.f32 1.442695, %v500_v34 }
 0x645   :  { %2870 = vpow2.f32 %v501_v35 }
 0x64e   :  { %v2869_v33 = vpop.eup %2868 }
 0x64f   :  { %514 = vrot.lane.b32.xlu1 %v2869_v33, %s2991_s11 }
 0x652   :  { %v2871_v37 = vpop.eup %2870 }
 0x653   :  { %v503_v38 = vadd.f32 1.0, %v2871_v37 }
 0x655   :  { %2872 = vrcp.f32 %v503_v38 }
 0x662   :  { %v2873_v39 = vpop.eup %2872 }
 0x663   :  { %v512_v42 = vmul.f32 %v2873_v39, %v510_v13 }
 0x6c1   :  { %v515_v40 = vpop.permute.xlu1 %514 }
 0x6c2   :  { %v517_v41 = vmul.f32 %v2873_v39, %v515_v40 }
 0x6c4   :  { %519 = vrot.lane.b32.xlu1 %v517_v41, %s2992_s12 }
 0x6c8   :  { %530 = vrot.lane.b32.xlu1 %v421_v23, %s2993_s14 }
 0x6cc   :  { %541 = vrot.lane.b32.xlu1 %v507_v24, %s2992_s12 }
 0x736   :  { %v520_v43 = vpop.permute.xlu1 %519 }
 0x737   :  { %v522_v44 = vadd.f32 %v520_v43, %v512_v42 }
 0x739   :  { %2874 = vtanh.f32 %v522_v44 }
 0x73a   :  { %v531_v46 = vpop.permute.xlu1 %530 }
 0x73e   :  { %v542_v51 = vpop.permute.xlu1 %541 }
 0x73f   :  { %v544_v52 = vsel %vm529_vm5, %v522_v44, %v542_v51 }
 0x746   :  { %v2875_v45 = vpop.eup %2874 }
 0x747   :  { %525 = vrot.lane.b32.xlu0 %v2875_v45, %s2991_s11 }
 0x7b9   :  { %v526_v48 = vpop.permute.xlu0 %525 }
 0x7ba   :  { %v528_v49 = vmul.f32 %v2873_v39, %v526_v48 }
 0x7bc   :  { %v533_v50 = vsel %vm529_vm5, %v528_v49, %v531_v46 }
 0x7bd   :  { %535 = vrot.lane.b32.xlu0 %v533_v50, %s2992_s12 }
 0x7c1   :  { %546 = vrot.lane.b32.xlu0 %v544_v52, %s2993_s14 }
 0x82f   :  { %v536_v53 = vpop.permute.xlu0 %535 }
 0x830   :  { %538 = vst.msk [vmem:[#allocation4] sm:$0xff] %vm153_vm0, %v536_v53 }
 0x833   :  { %v547_v54 = vpop.permute.xlu0 %546 }
 0x834   :  { %549 = vst.msk [vmem:[#allocation5] sm:$0xff] %vm153_vm0, %v547_v54 }
 0x837   :  { %v553_v55 = vld [vmem:[#allocation4] sm:$0xff] }
 0x838   :  { %2684 = vmatmul.mubr.msk.f32.vlgmr.msra.gmra.mxu1 %vm153_vm0, %v553_v55  ;;  %551 = vst.msk [vmem:[#allocation2 + $0x10] sm:$0xff] %vm153_vm0, %v553_v55 }
 0x839   :  { %2698 = vmatpush3.msra.mxu1 %v3053_v1  ;;  %2705 = vmatprep.mubr.msk.f32.mxu1 %vm2989_vm1, %v2988_v0 }
 0x83a   :  { %2699 = vmatprep.subr.mxu1 %v2988_v0 }
 0x83b   :  { %v639_v56 = vld [vmem:[#allocation5] sm:$0xff]  ;;  %2700 = vmatpush3.msra.mxu1 %v3068_v3 }
 0x83c   :  { %641 = vrot.lane.b32.xlu0 %v639_v56, %s2992_s12  ;;  %2701 = vmatprep.subr.mxu1 %v2988_v0 }
 0x83d   :  { %2702 = vmatpush3.msra.mxu1 %v3080_v6 }
 0x83e   :  { %2703 = vmatprep.subr.mxu1 %v2988_v0 }
 0x83f   :  { %2704 = vmatpush3.msra.mxu1 %v3093_v11 }
 0x840   :  { %2719 = vmatprep.subr.mxu1 %v2988_v0 }
 0x8ae   :  { %v642_v47 = vpop.permute.xlu0 %641 }
 0x8f8   :  { %v627_v58 = vpop.f32.mrf.mxu1 }
 0x8f9   :  { %v631_v59 = vadd.f32 %v627_v58, %v126_v57 }
 0x8fa   :  { %v2685_v60 = vpop.f32.mrf.mxu1 }
 0x8fb   :  { %2876 = vtanh.f32 %v631_v59  ;;  %v632_v62 = vsub.f32 0.0, %v631_v59 }
 0x8fd   :  { %v633_v63 = vmul.f32 1.442695, %v632_v62 }
 0x8ff   :  { %2878 = vpow2.f32 %v633_v63 }
 0x908   :  { %v2877_v61 = vpop.eup %2876 }
 0x909   :  { %646 = vrot.lane.b32.xlu1 %v2877_v61, %s2991_s11 }
 0x90c   :  { %v2879_v2 = vpop.eup %2878 }
 0x90d   :  { %v635_v4 = vadd.f32 1.0, %v2879_v2 }
 0x90f   :  { %2880 = vrcp.f32 %v635_v4 }
 0x91c   :  { %v2881_v5 = vpop.eup %2880 }
 0x91d   :  { %v644_v9 = vmul.f32 %v2881_v5, %v642_v47  ;;  %v2850_v47 = vld [vmem:[%s3665_s5 + $0x8] sm:$0xff]  }
 0x97b   :  { %v647_v7 = vpop.permute.xlu1 %646 }
 0x97c   :  { %v649_v8 = vmul.f32 %v2881_v5, %v647_v7 }
 0x97e   :  { %651 = vrot.lane.b32.xlu1 %v649_v8, %s2992_s12 }
 0x982   :  { %662 = vrot.lane.b32.xlu1 %v553_v55, %s2993_s14 }
 0x986   :  { %673 = vrot.lane.b32.xlu1 %v639_v56, %s2992_s12 }
 0x9f0   :  { %v652_v10 = vpop.permute.xlu1 %651 }
 0x9f1   :  { %v654_v12 = vadd.f32 %v652_v10, %v644_v9 }
 0x9f3   :  { %2882 = vtanh.f32 %v654_v12 }
 0x9f4   :  { %v663_v16 = vpop.permute.xlu1 %662 }
 0x9f8   :  { %v674_v20 = vpop.permute.xlu1 %673 }
 0x9f9   :  { %v676_v21 = vsel %vm661_vm6, %v654_v12, %v674_v20  ;;  %v1213_v20 = vld [vmem:[#allocation2 + $0x8] sm:$0xff] }
 0xa00   :  { %v2883_v14 = vpop.eup %2882 }
 0xa01   :  { %657 = vrot.lane.b32.xlu0 %v2883_v14, %s2991_s11 }
 0xa73   :  { %v658_v17 = vpop.permute.xlu0 %657 }
 0xa74   :  { %v660_v18 = vmul.f32 %v2881_v5, %v658_v17 }
 0xa76   :  { %v665_v19 = vsel %vm661_vm6, %v660_v18, %v663_v16 }
 0xa77   :  { %667 = vrot.lane.b32.xlu0 %v665_v19, %s2992_s12 }
 0xa7b   :  { %678 = vrot.lane.b32.xlu0 %v676_v21, %s2993_s14  ;;  %v1212_v21 = vld [vmem:[#allocation2] sm:$0xff] }
 0xae9   :  { %v668_v22 = vpop.permute.xlu0 %667 }
 0xaea   :  { %670 = vst.msk [vmem:[#allocation4] sm:$0xff] %vm153_vm0, %v668_v22  ;;  %v2851_v22 = vld [vmem:[%s3665_s5] sm:$0xff]  }
 0xaed   :  { %v679_v23 = vpop.permute.xlu0 %678 }
 0xaee   :  { %681 = vst.msk [vmem:[#allocation5] sm:$0xff] %vm153_vm0, %v679_v23 }
 0xaf1   :  { %v685_v24 = vld [vmem:[#allocation4] sm:$0xff] }
 0xaf2   :  { %2695 = vmatmul.mubr.msk.f32.vlgmr.msra.gmra.mxu0 %vm153_vm0, %v685_v24  ;;  %683 = vst.msk [vmem:[#allocation2 + $0x18] sm:$0xff] %vm153_vm0, %v685_v24 }
 0xaf3   :  { %2709 = vmatpush3.msra.mxu0 %v3053_v1  ;;  %2716 = vmatprep.mubr.msk.f32.mxu0 %vm2989_vm1, %v2988_v0 }
 0xaf4   :  { %2710 = vmatprep.subr.mxu0 %v2988_v0 }
 0xaf5   :  { %v771_v29 = vld [vmem:[#allocation5] sm:$0xff]  ;;  %2711 = vmatpush3.msra.mxu0 %v3068_v3 }
 0xaf6   :  { %773 = vrot.lane.b32.xlu0 %v771_v29, %s2992_s12  ;;  %2712 = vmatprep.subr.mxu0 %v2988_v0 }
 0xaf7   :  { %2713 = vmatpush3.msra.mxu0 %v3080_v6 }
 0xaf8   :  { %2714 = vmatprep.subr.mxu0 %v2988_v0 }
 0xaf9   :  { %2715 = vmatpush3.msra.mxu0 %v3093_v11 }
 0xafa   :  { %2730 = vmatprep.subr.bf16.mxu0 %v2850_v47 }
 0xb68   :  { %v774_v26 = vpop.permute.xlu0 %773 }
 0xbb2   :  { %v759_v31 = vpop.f32.mrf.mxu0 }
 0xbb3   :  { %v763_v32 = vadd.f32 %v759_v31, %v131_v30  ;;  %v1215_v30 = vld [vmem:[#allocation2 + $0x18] sm:$0xff]  ;;  %v1214_v31 = vld [vmem:[#allocation2 + $0x10] sm:$0xff] }
 0xbb4   :  { %v2696_v33 = vpop.f32.mrf.mxu0 }
 0xbb5   :  { %2884 = vtanh.f32 %v763_v32  ;;  %v764_v35 = vsub.f32 0.0, %v763_v32  ;;  %v1221_v32 = vpack.c.bf16 %v1215_v30, %v1214_v31 }
 0xbb7   :  { %v765_v37 = vmul.f32 1.442695, %v764_v35 }
 0xbb9   :  { %2886 = vpow2.f32 %v765_v37  ;;  %v139_v37 = vadd.f32 %v3208_v25, %v3126_v15 }
 0xbc2   :  { %v2885_v34 = vpop.eup %2884 }
 0xbc3   :  { %778 = vrot.lane.b32.xlu1 %v2885_v34, %s2991_s11 }
 0xbc6   :  { %v2887_v38 = vpop.eup %2886 }
 0xbc7   :  { %v767_v39 = vadd.f32 1.0, %v2887_v38 }
 0xbc9   :  { %2888 = vrcp.f32 %v767_v39 }
 0xbd6   :  { %v2889_v40 = vpop.eup %2888 }
 0xbd7   :  { %v776_v42 = vmul.f32 %v2889_v40, %v774_v26 }
 0xc35   :  { %v779_v41 = vpop.permute.xlu1 %778 }
 0xc36   :  { %v781_v13 = vmul.f32 %v2889_v40, %v779_v41 }
 0xc38   :  { %783 = vrot.lane.b32.xlu1 %v781_v13, %s2992_s12 }
 0xc3c   :  { %794 = vrot.lane.b32.xlu1 %v685_v24, %s2993_s14  ;;  %v1220_v24 = vpack.c.bf16 %v1213_v20, %v1212_v21 }
 0xc40   :  { %805 = vrot.lane.b32.xlu1 %v771_v29, %s2992_s12 }
 0xcaa   :  { %v784_v43 = vpop.permute.xlu1 %783 }
 0xcab   :  { %v786_v44 = vadd.f32 %v784_v43, %v776_v42 }
 0xcad   :  { %2890 = vtanh.f32 %v786_v44 }
 0xcae   :  { %v795_v46 = vpop.permute.xlu1 %794 }
 0xcb2   :  { %v806_v51 = vpop.permute.xlu1 %805 }
 0xcb3   :  { %v808_v52 = vsel %vm793_vm7, %v786_v44, %v806_v51 }
 0xcba   :  { %v2891_v45 = vpop.eup %2890 }
 0xcbb   :  { %789 = vrot.lane.b32.xlu0 %v2891_v45, %s2991_s11 }
 0xd2d   :  { %v790_v48 = vpop.permute.xlu0 %789 }
 0xd2e   :  { %v792_v49 = vmul.f32 %v2889_v40, %v790_v48 }
 0xd30   :  { %v797_v50 = vsel %vm793_vm7, %v792_v49, %v795_v46 }
 0xd31   :  { %799 = vrot.lane.b32.xlu0 %v797_v50, %s2992_s12 }
 0xd35   :  { %810 = vrot.lane.b32.xlu0 %v808_v52, %s2993_s14 }
 0xda3   :  { %v800_v53 = vpop.permute.xlu0 %799 }
 0xda4   :  { %802 = vst.msk [vmem:[#allocation4] sm:$0xff] %vm153_vm0, %v800_v53 }
 0xda7   :  { %v811_v54 = vpop.permute.xlu0 %810 }
 0xda8   :  { %813 = vst.msk [vmem:[#allocation5] sm:$0xff] %vm153_vm0, %v811_v54 }
 0xdab   :  { %v817_v55 = vld [vmem:[#allocation4] sm:$0xff] }
 0xdac   :  { %2706 = vmatmul.mubr.msk.f32.vlgmr.msra.gmra.mxu1 %vm153_vm0, %v817_v55  ;;  %815 = vst.msk [vmem:[#allocation2 + $0x20] sm:$0xff] %vm153_vm0, %v817_v55 }
 0xdad   :  { %2720 = vmatpush3.msra.mxu1 %v3053_v1  ;;  %2727 = vmatprep.mubr.msk.f32.mxu1 %vm2989_vm1, %v2988_v0  ;;  %v134_v1 = vadd.f32 %v3126_v15, %v3214_v28 }
 0xdae   :  { %2721 = vmatprep.subr.mxu1 %v2988_v0 }
 0xdaf   :  { %v903_v56 = vld [vmem:[#allocation5] sm:$0xff]  ;;  %2722 = vmatpush3.msra.mxu1 %v3068_v3 }
 0xdb0   :  { %905 = vrot.lane.b32.xlu0 %v903_v56, %s2992_s12  ;;  %2723 = vmatprep.subr.mxu1 %v2988_v0 }
 0xdb1   :  { %2724 = vmatpush3.msra.mxu1 %v3080_v6 }
 0xdb2   :  { %2725 = vmatprep.subr.mxu1 %v2988_v0 }
 0xdb3   :  { %2726 = vmatpush3.msra.mxu1 %v3093_v11  ;;  %v1216_v33 = vld [vmem:[#allocation2 + $0x20] sm:$0xff] }
 0xdb4   :  { %2742 = vmatprep.subr.mxu1 %v2988_v0 }
 0xe22   :  { %v906_v28 = vpop.permute.xlu0 %905 }
 0xe6c   :  { %v891_v57 = vpop.f32.mrf.mxu1 }
 0xe6d   :  { %v895_v58 = vadd.f32 %v891_v57, %v134_v1 }
 0xe6e   :  { %v2707_v59 = vpop.f32.mrf.mxu1 }
 0xe6f   :  { %2892 = vtanh.f32 %v895_v58  ;;  %v896_v60 = vsub.f32 0.0, %v895_v58 }
 0xe71   :  { %v897_v61 = vmul.f32 1.442695, %v896_v60  ;;  %v142_v60 = vadd.f32 %v3212_v27, %v3126_v15 }
 0xe73   :  { %2894 = vpow2.f32 %v897_v61 }
 0xe7c   :  { %v2893_v3 = vpop.eup %2892 }
 0xe7d   :  { %910 = vrot.lane.b32.xlu1 %v2893_v3, %s2991_s11 }
 0xe80   :  { %v2895_v6 = vpop.eup %2894 }
 0xe81   :  { %v899_v62 = vadd.f32 1.0, %v2895_v6 }
 0xe83   :  { %2896 = vrcp.f32 %v899_v62 }
 0xe90   :  { %v2897_v63 = vpop.eup %2896 }
 0xe91   :  { %v908_v4 = vmul.f32 %v2897_v63, %v906_v28 }
 0xeef   :  { %v911_v11 = vpop.permute.xlu1 %910 }
 0xef0   :  { %v913_v2 = vmul.f32 %v2897_v63, %v911_v11 }
 0xef2   :  { %915 = vrot.lane.b32.xlu1 %v913_v2, %s2992_s12 }
 0xef6   :  { %926 = vrot.lane.b32.xlu1 %v817_v55, %s2993_s14 }
 0xefa   :  { %937 = vrot.lane.b32.xlu1 %v903_v56, %s2992_s12 }
 0xf64   :  { %v916_v5 = vpop.permute.xlu1 %915 }
 0xf65   :  { %v918_v7 = vadd.f32 %v916_v5, %v908_v4 }
 0xf67   :  { %2898 = vtanh.f32 %v918_v7 }
 0xf68   :  { %v927_v9 = vpop.permute.xlu1 %926 }
 0xf6c   :  { %v938_v16 = vpop.permute.xlu1 %937 }
 0xf6d   :  { %v940_v17 = vsel %vm925_vm8, %v918_v7, %v938_v16  ;;  %v3362_v16 = vld [vmem:[%s3666_s6 + $0x18] sm:$0xff] }
 0xf74   :  { %v2899_v8 = vpop.eup %2898 }
 0xf75   :  { %921 = vrot.lane.b32.xlu0 %v2899_v8, %s2991_s11 }
 0xfe7   :  { %v922_v10 = vpop.permute.xlu0 %921 }
 0xfe8   :  { %v924_v12 = vmul.f32 %v2897_v63, %v922_v10 }
 0xfea   :  { %v929_v14 = vsel %vm925_vm8, %v924_v12, %v927_v9 }
 0xfeb   :  { %931 = vrot.lane.b32.xlu0 %v929_v14, %s2992_s12 }
 0xfef   :  { %942 = vrot.lane.b32.xlu0 %v940_v17, %s2993_s14  ;;  %v3367_v17 = vld [vmem:[%s3666_s6 + $0x10] sm:$0xff] }
0x105d   :  { %v932_v18 = vpop.permute.xlu0 %931 }
0x105e   :  { %934 = vst.msk [vmem:[#allocation4] sm:$0xff] %vm153_vm0, %v932_v18 }
0x1061   :  { %v943_v19 = vpop.permute.xlu0 %942 }
0x1062   :  { %945 = vst.msk [vmem:[#allocation5] sm:$0xff] %vm153_vm0, %v943_v19  ;;  %v3376_v19 = vld [vmem:[%s3666_s6 + $0x8] sm:$0xff] }
0x1065   :  { %v946_v23 = vld [vmem:[#allocation4] sm:$0xff] }
0x1066   :  { %947 = vst.msk [vmem:[#allocation2 + $0x28] sm:$0xff] %vm153_vm0, %v946_v23  ;;  %2717 = vmatmul.mubr.msk.f32.vlgmr.msra.gmra.mxu0 %vm153_vm0, %v946_v23 }
0x1067   :  { %2731 = vmatpush3.bf16.msra.mxu0 %v2850_v47  ;;  %2734 = vmatprep.mubr.msk.bf16.mxu0 %vm153_vm0, %v1220_v24 }
0x1068   :  { %2732 = vmatprep.subr.bf16.mxu0 %v2851_v22 }
0x1069   :  { %v1035_v29 = vld [vmem:[#allocation5] sm:$0xff] }
0x106a   :  { %1037 = vrot.lane.b32.xlu0 %v1035_v29, %s2992_s12 }
0x106b   :  { %2733 = vmatpush3.bf16.msra.mxu0 %v2851_v22  ;;  %v3388_v22 = vld [vmem:[%s3666_s6] sm:$0xff] }
0x106c   :  { %2764 = vmatprep.subr.mxu0 %v2988_v0 }
0x106d   :  { %v1217_v34 = vld [vmem:[#allocation2 + $0x28] sm:$0xff] }
0x106e   :  { %2735 = vmatmul.mubr.msk.bf16.vlgmr.msra.gmra.mxu0 %vm153_vm0, %v1221_v32  ;;  %v1222_v35 = vpack.c.bf16 %v1217_v34, %v1216_v33 }
0x106f   :  { %2765 = vmatpush3.msra.mxu0 %v3362_v16 }
0x1070   :  { %2738 = vmatprep.mubr.msk.bf16.mxu0 %vm153_vm0, %v1222_v35  ;;  %2766 = vmatprep.subr.mxu0 %v2988_v0 }
0x1071   :  { %2767 = vmatpush3.msra.mxu0 %v3367_v17 }
0x1072   :  { %2768 = vmatprep.subr.mxu0 %v2988_v0 }
0x1073   :  { %2769 = vmatpush3.msra.mxu0 %v3376_v19 }
0x1074   :  { %2770 = vmatprep.subr.mxu0 %v2988_v0 }
0x1075   :  { %2771 = vmatpush3.msra.mxu0 %v3388_v22 }
0x1076   :  { %2786 = vmatprep.subr.mxu0 %v2988_v0 }
0x10dc   :  { %v1038_v25 = vpop.permute.xlu0 %1037 }
0x1126   :  { %v1023_v38 = vpop.f32.mrf.mxu0 }
0x1127   :  { %v1027_v39 = vadd.f32 %v1023_v38, %v139_v37 }
0x1128   :  { %v2718_v40 = vpop.f32.mrf.mxu0 }
0x1129   :  { %2900 = vtanh.f32 %v1027_v39  ;;  %v1028_v13 = vsub.f32 0.0, %v1027_v39  ;;  %v3429_v39 = vld [vmem:[%s3667_s7] ss:$0 sm:$0xff] }
0x112b   :  { %v1029_v26 = vmul.f32 1.442695, %v1028_v13 }
0x112d   :  { %2902 = vpow2.f32 %v1029_v26 }
0x112e   :  { %v3424_v37 = vpop.f32.mrf.mxu0 }
0x1130   :  { %v1293_v38 = vpop.f32.mrf.mxu0 }
0x1131   :  { %v1294_v40 = vadd.f32 %v3429_v39, %v1293_v38 }
0x1136   :  { %v2901_v41 = vpop.eup %2900 }
0x1137   :  { %1042 = vrot.lane.b32.xlu1 %v2901_v41, %s2991_s11 }
0x113a   :  { %v2903_v42 = vpop.eup %2902 }
0x113b   :  { %v1031_v43 = vadd.f32 1.0, %v2903_v42 }
0x113d   :  { %2904 = vrcp.f32 %v1031_v43 }
0x114a   :  { %v2905_v44 = vpop.eup %2904 }
0x114b   :  { %v1040_v48 = vmul.f32 %v2905_v44, %v1038_v25 }
0x11a9   :  { %v1043_v45 = vpop.permute.xlu1 %1042 }
0x11aa   :  { %v1045_v46 = vmul.f32 %v2905_v44, %v1043_v45 }
0x11ac   :  { %1047 = vrot.lane.b32.xlu1 %v1045_v46, %s2992_s12 }
0x11b0   :  { %1058 = vrot.lane.b32.xlu1 %v946_v23, %s2993_s14 }
0x11b4   :  { %1069 = vrot.lane.b32.xlu1 %v1035_v29, %s2992_s12 }
0x121e   :  { %v1048_v49 = vpop.permute.xlu1 %1047 }
0x121f   :  { %v1050_v50 = vadd.f32 %v1048_v49, %v1040_v48 }
0x1221   :  { %2906 = vtanh.f32 %v1050_v50 }
0x1222   :  { %v1059_v52 = vpop.permute.xlu1 %1058 }
0x1226   :  { %v1070_v56 = vpop.permute.xlu1 %1069 }
0x1227   :  { %v1072_v1 = vsel %vm1057_vm9, %v1050_v50, %v1070_v56 }
0x122e   :  { %v2907_v51 = vpop.eup %2906 }
0x122f   :  { %1053 = vrot.lane.b32.xlu0 %v2907_v51, %s2991_s11 }
0x12a1   :  { %v1054_v53 = vpop.permute.xlu0 %1053 }
0x12a2   :  { %v1056_v54 = vmul.f32 %v2905_v44, %v1054_v53 }
0x12a4   :  { %v1061_v55 = vsel %vm1057_vm9, %v1056_v54, %v1059_v52 }
0x12a5   :  { %1063 = vrot.lane.b32.xlu0 %v1061_v55, %s2992_s12 }
0x12a9   :  { %1074 = vrot.lane.b32.xlu0 %v1072_v1, %s2993_s14 }
0x1317   :  { %v1064_v57 = vpop.permute.xlu0 %1063 }
0x1318   :  { %1066 = vst.msk [vmem:[#allocation4] sm:$0xff] %vm153_vm0, %v1064_v57 }
0x131b   :  { %v1075_v58 = vpop.permute.xlu0 %1074 }
0x131c   :  { %1077 = vst.msk [vmem:[#allocation5] sm:$0xff] %vm153_vm0, %v1075_v58 }
0x131f   :  { %v1081_v59 = vld [vmem:[#allocation4] sm:$0xff] }
0x1320   :  { %2728 = vmatmul.mubr.msk.f32.vlgmr.msra.gmra.mxu1 %vm153_vm0, %v1081_v59  ;;  %1079 = vst.msk [vmem:[#allocation2 + $0x30] sm:$0xff] %vm153_vm0, %v1081_v59 }
0x1321   :  { %2750 = vmatprep.mubr.msk.f32.mxu1 %vm2989_vm1, %v2988_v0  ;;  %2743 = vmatpush3.msra.mxu1 %v3362_v16 }
0x1322   :  { %2744 = vmatprep.subr.mxu1 %v2988_v0 }
0x1323   :  { %v1167_v3 = vld [vmem:[#allocation5] sm:$0xff]  ;;  %2745 = vmatpush3.msra.mxu1 %v3367_v17 }
0x1324   :  { %1169 = vrot.lane.b32.xlu0 %v1167_v3, %s2992_s12  ;;  %2746 = vmatprep.subr.mxu1 %v2988_v0 }
0x1325   :  { %2747 = vmatpush3.msra.mxu1 %v3376_v19 }
0x1326   :  { %2748 = vmatprep.subr.mxu1 %v2988_v0 }
0x1327   :  { %2749 = vmatpush3.msra.mxu1 %v3388_v22  ;;  %v1218_v33 = vld [vmem:[#allocation2 + $0x30] sm:$0xff] }
0x1328   :  { %2753 = vmatprep.subr.mxu1 %v2988_v0 }
0x1396   :  { %v1170_v15 = vpop.permute.xlu0 %1169 }
0x13e0   :  { %v1155_v61 = vpop.f32.mrf.mxu1 }
0x13e1   :  { %v1159_v6 = vadd.f32 %v1155_v61, %v142_v60 }
0x13e2   :  { %v2729_v62 = vpop.f32.mrf.mxu1 }
0x13e3   :  { %2908 = vtanh.f32 %v1159_v6  ;;  %v1160_v11 = vsub.f32 0.0, %v1159_v6  ;;  %v3458_v62 = vpop.f32.mrf.mxu0 }
0x13e5   :  { %v1161_v2 = vmul.f32 1.442695, %v1160_v11 }
0x13e7   :  { %2910 = vpow2.f32 %v1161_v2 }
0x13f0   :  { %v2909_v63 = vpop.eup %2908 }
0x13f1   :  { %1174 = vrot.lane.b32.xlu1 %v2909_v63, %s2991_s11  ;;  %v1296_v63 = vpop.f32.mrf.mxu0 }
0x13f2   :  { %v1297_v11 = vadd.f32 %v3429_v39, %v1296_v63 }
0x13f4   :  { %v2911_v28 = vpop.eup %2910 }
0x13f5   :  { %v1163_v4 = vadd.f32 1.0, %v2911_v28 }
0x13f7   :  { %2912 = vrcp.f32 %v1163_v4 }
0x1404   :  { %v2913_v5 = vpop.eup %2912 }
0x1405   :  { %v1172_v27 = vmul.f32 %v2913_v5, %v1170_v15 }
0x1463   :  { %v1175_v7 = vpop.permute.xlu1 %1174 }
0x1464   :  { %v1177_v8 = vmul.f32 %v2913_v5, %v1175_v7 }
0x1466   :  { %1179 = vrot.lane.b32.xlu1 %v1177_v8, %s2992_s12 }
0x146a   :  { %1190 = vrot.lane.b32.xlu1 %v1081_v59, %s2993_s14 }
0x146e   :  { %1201 = vrot.lane.b32.xlu1 %v1167_v3, %s2992_s12 }
0x14d8   :  { %v1180_v47 = vpop.permute.xlu1 %1179 }
0x14d9   :  { %v1182_v9 = vadd.f32 %v1180_v47, %v1172_v27 }
0x14db   :  { %2914 = vtanh.f32 %v1182_v9 }
0x14dc   :  { %v1191_v12 = vpop.permute.xlu1 %1190 }
0x14e0   :  { %v1202_v21 = vpop.permute.xlu1 %1201 }
0x14e1   :  { %v1204_v23 = vsel %vm1189_vm10, %v1182_v9, %v1202_v21 }
0x14e8   :  { %v2915_v10 = vpop.eup %2914 }
0x14e9   :  { %1185 = vrot.lane.b32.xlu0 %v2915_v10, %s2991_s11 }
0x155b   :  { %v1186_v14 = vpop.permute.xlu0 %1185 }
0x155c   :  { %v1188_v18 = vmul.f32 %v2913_v5, %v1186_v14 }
0x155e   :  { %v1193_v20 = vsel %vm1189_vm10, %v1188_v18, %v1191_v12 }
0x155f   :  { %1195 = vrot.lane.b32.xlu0 %v1193_v20, %s2992_s12 }
0x1563   :  { %1206 = vrot.lane.b32.xlu0 %v1204_v23, %s2993_s14 }
0x15d1   :  { %v1196_v24 = vpop.permute.xlu0 %1195 }
0x15d2   :  { %1198 = vst.msk [vmem:[#allocation4] sm:$0xff] %vm153_vm0, %v1196_v24 }
0x15d5   :  { %v1207_v29 = vpop.permute.xlu0 %1206 }
0x15d6   :  { %1209 = vst.msk [vmem:[#allocation5] sm:$0xff] %vm153_vm0, %v1207_v29 }
0x15d7   :  { %1333 = vst.msk [vmem:[#allocation5] sm:$0xff] %vm153_vm0, %v2988_v0 }
0x15d9   :  { %v1210_v30 = vld [vmem:[#allocation4] sm:$0xff] }
0x15da   :  { %1211 = vst.msk [vmem:[#allocation2 + $0x38] sm:$0xff] %vm153_vm0, %v1210_v30  ;;  %1332 = vst.msk [vmem:[#allocation4] sm:$0xff] %vm153_vm0, %v2988_v0 }
0x15de   :  { %v1421_v31 = vld [vmem:[#allocation5] sm:$0xff] }
0x15df   :  { %1423 = vrot.lane.b32.xlu0 %v1421_v31, %s2992_s12 }
0x15e1   :  { %v1335_v32 = vld [vmem:[#allocation4] sm:$0xff]  ;;  %v1219_v34 = vld [vmem:[#allocation2 + $0x38] sm:$0xff] }
0x15e2   :  { %2751 = vmatmul.mubr.msk.f32.vlgmr.msra.gmra.mxu1 %vm153_vm0, %v1335_v32  ;;  %v1223_v35 = vpack.c.bf16 %v1219_v34, %v1218_v33 }
0x15e3   :  { %2754 = vmatpush3.msra.mxu1 %v3362_v16  ;;  %2761 = vmatprep.mubr.msk.f32.mxu1 %vm2989_vm1, %v2988_v0 }
0x15e4   :  { %2739 = vmatmul.mubr.msk.bf16.gmra.mxu0 %vm153_vm0, %v1223_v35  ;;  %2755 = vmatprep.subr.mxu1 %v2988_v0 }
0x15e5   :  { %2756 = vmatpush3.msra.mxu1 %v3367_v17  ;;  %2772 = vmatprep.mubr.msk.f32.mxu0 %vm2989_vm1, %v2988_v0 }
0x15e6   :  { %2757 = vmatprep.subr.mxu1 %v2988_v0 }
0x15e7   :  { %2758 = vmatpush3.msra.mxu1 %v3376_v19 }
0x15e8   :  { %2759 = vmatprep.subr.mxu1 %v2988_v0 }
0x15e9   :  { %2760 = vmatpush3.msra.mxu1 %v3388_v22 }
0x15ea   :  { %2775 = vmatprep.subr.mxu1 %v2988_v0 }
0x1651   :  { %v1424_v50 = vpop.permute.xlu0 %1423 }
0x16a2   :  { %v1409_v41 = vpop.f32.mrf.mxu1 }
0x16a3   :  { %v1413_v13 = vadd.f32 %v1409_v41, %v1294_v40 }
0x16a4   :  { %v2752_v26 = vpop.f32.mrf.mxu1  ;;  %v3487_v40 = vpop.f32.mrf.mxu0 }
0x16a5   :  { %2916 = vtanh.f32 %v1413_v13  ;;  %v1414_v43 = vsub.f32 0.0, %v1413_v13 }
0x16a6   :  { %v3489_v41 = vpop.f32.mrf.mxu0 }
0x16a7   :  { %v1415_v44 = vmul.f32 1.442695, %v1414_v43 }
0x16a8   :  { %v3491_v13 = vpop.f32.mrf.mxu0 }
0x16a9   :  { %2918 = vpow2.f32 %v1415_v44 }
0x16aa   :  { %v3493_v26 = vpop.f32.mrf.mxu0 }
0x16b2   :  { %v2917_v42 = vpop.eup %2916 }
0x16b3   :  { %1428 = vrot.lane.b32.xlu1 %v2917_v42, %s2991_s11  ;;  %v1302_v42 = vadd.f32 %v3424_v37, %v3429_v39 }
0x16b6   :  { %v2919_v45 = vpop.eup %2918 }
0x16b7   :  { %v1417_v46 = vadd.f32 1.0, %v2919_v45 }
0x16b9   :  { %2920 = vrcp.f32 %v1417_v46 }
0x16c6   :  { %v2921_v25 = vpop.eup %2920 }
0x16c7   :  { %v1426_v51 = vmul.f32 %v2921_v25, %v1424_v50 }
0x1725   :  { %v1429_v48 = vpop.permute.xlu1 %1428 }
0x1726   :  { %v1431_v49 = vmul.f32 %v2921_v25, %v1429_v48 }
0x1728   :  { %1433 = vrot.lane.b32.xlu1 %v1431_v49, %s2992_s12 }
0x172c   :  { %1443 = vrot.lane.b32.xlu1 %v1335_v32, %s2993_s14 }
0x1730   :  { %1454 = vrot.lane.b32.xlu1 %v1421_v31, %s2992_s12 }
0x179a   :  { %v1434_v52 = vpop.permute.xlu1 %1433 }
0x179b   :  { %v1436_v53 = vadd.f32 %v1434_v52, %v1426_v51 }
0x179d   :  { %2922 = vtanh.f32 %v1436_v53 }
0x179e   :  { %v1444_v55 = vpop.permute.xlu1 %1443 }
0x17a2   :  { %v1455_v58 = vpop.permute.xlu1 %1454 }
0x17a3   :  { %v1457_v59 = vsel %vm265_vm3, %v1436_v53, %v1455_v58 }
0x17aa   :  { %v2923_v54 = vpop.eup %2922 }
0x17ab   :  { %1439 = vrot.lane.b32.xlu0 %v2923_v54, %s2991_s11 }
0x181d   :  { %v1440_v56 = vpop.permute.xlu0 %1439 }
0x181e   :  { %v1442_v1 = vmul.f32 %v2921_v25, %v1440_v56 }
0x1820   :  { %v1446_v57 = vsel %vm265_vm3, %v1442_v1, %v1444_v55 }
0x1821   :  { %1448 = vrot.lane.b32.xlu0 %v1446_v57, %s2992_s12 }
0x1825   :  { %1459 = vrot.lane.b32.xlu0 %v1457_v59, %s2993_s14 }
0x1893   :  { %v1449_v3 = vpop.permute.xlu0 %1448 }
0x1894   :  { %1451 = vst.msk [vmem:[#allocation4] sm:$0xff] %vm153_vm0, %v1449_v3 }
0x1897   :  { %v1460_v60 = vpop.permute.xlu0 %1459 }
0x1898   :  { %1462 = vst.msk [vmem:[#allocation5] sm:$0xff] %vm153_vm0, %v1460_v60 }
0x189b   :  { %v1466_v61 = vld [vmem:[#allocation4] sm:$0xff] }
0x189c   :  { %2762 = vmatmul.mubr.msk.f32.vlgmr.msra.gmra.mxu1 %vm153_vm0, %v1466_v61  ;;  %1464 = vst.msk [vmem:[#allocation2] sm:$0xff] %vm153_vm0, %v1466_v61 }
0x189d   :  { %2776 = vmatpush3.msra.mxu1 %v3362_v16  ;;  %2783 = vmatprep.mubr.msk.f32.mxu1 %vm2989_vm1, %v2988_v0 }
0x189e   :  { %2777 = vmatprep.subr.mxu1 %v2988_v0 }
0x189f   :  { %v1552_v6 = vld [vmem:[#allocation5] sm:$0xff]  ;;  %2778 = vmatpush3.msra.mxu1 %v3367_v17 }
0x18a0   :  { %1554 = vrot.lane.b32.xlu0 %v1552_v6, %s2992_s12  ;;  %2779 = vmatprep.subr.mxu1 %v2988_v0 }
0x18a1   :  { %2780 = vmatpush3.msra.mxu1 %v3376_v19 }
0x18a2   :  { %2781 = vmatprep.subr.mxu1 %v2988_v0 }
0x18a3   :  { %2782 = vmatpush3.msra.mxu1 %v3388_v22 }
0x18a4   :  { %2797 = vmatprep.subr.mxu1 %v2988_v0 }
0x1912   :  { %v1555_v12 = vpop.permute.xlu0 %1554 }
0x195c   :  { %v1540_v2 = vpop.f32.mrf.mxu1 }
0x195d   :  { %v1544_v28 = vadd.f32 %v1540_v2, %v1297_v11 }
0x195e   :  { %v2763_v4 = vpop.f32.mrf.mxu1 }
0x195f   :  { %2924 = vtanh.f32 %v1544_v28  ;;  %v1545_v7 = vsub.f32 0.0, %v1544_v28  ;;  %v1305_v28 = vadd.f32 %v3458_v62, %v3429_v39 }
0x1961   :  { %v1546_v8 = vmul.f32 1.442695, %v1545_v7 }
0x1963   :  { %2926 = vpow2.f32 %v1546_v8 }
0x196c   :  { %v2925_v5 = vpop.eup %2924 }
0x196d   :  { %1559 = vrot.lane.b32.xlu1 %v2925_v5, %s2991_s11 }
0x1970   :  { %v2927_v15 = vpop.eup %2926 }
0x1971   :  { %v1548_v27 = vadd.f32 1.0, %v2927_v15 }
0x1973   :  { %2928 = vrcp.f32 %v1548_v27 }
0x1980   :  { %v2929_v47 = vpop.eup %2928 }
0x1981   :  { %v1557_v14 = vmul.f32 %v2929_v47, %v1555_v12 }
0x19df   :  { %v1560_v9 = vpop.permute.xlu1 %1559 }
0x19e0   :  { %v1562_v10 = vmul.f32 %v2929_v47, %v1560_v9 }
0x19e2   :  { %1564 = vrot.lane.b32.xlu1 %v1562_v10, %s2992_s12 }
0x19e6   :  { %1574 = vrot.lane.b32.xlu1 %v1466_v61, %s2993_s14 }
0x19ea   :  { %1585 = vrot.lane.b32.xlu1 %v1552_v6, %s2992_s12 }
0x1a54   :  { %v1565_v18 = vpop.permute.xlu1 %1564 }
0x1a55   :  { %v1567_v20 = vadd.f32 %v1565_v18, %v1557_v14 }
0x1a57   :  { %2930 = vtanh.f32 %v1567_v20 }
0x1a58   :  { %v1575_v23 = vpop.permute.xlu1 %1574 }
0x1a5c   :  { %v1586_v31 = vpop.permute.xlu1 %1585 }
0x1a5d   :  { %v1588_v32 = vsel %vm397_vm4, %v1567_v20, %v1586_v31 }
0x1a64   :  { %v2931_v21 = vpop.eup %2930 }
0x1a65   :  { %1570 = vrot.lane.b32.xlu0 %v2931_v21, %s2991_s11 }
0x1ad7   :  { %v1571_v24 = vpop.permute.xlu0 %1570 }
0x1ad8   :  { %v1573_v29 = vmul.f32 %v2929_v47, %v1571_v24 }
0x1ada   :  { %v1577_v30 = vsel %vm397_vm4, %v1573_v29, %v1575_v23 }
0x1adb   :  { %1579 = vrot.lane.b32.xlu0 %v1577_v30, %s2992_s12 }
0x1adf   :  { %1590 = vrot.lane.b32.xlu0 %v1588_v32, %s2993_s14 }
0x1b4d   :  { %v1580_v33 = vpop.permute.xlu0 %1579 }
0x1b4e   :  { %1582 = vst.msk [vmem:[#allocation4] sm:$0xff] %vm153_vm0, %v1580_v33 }
0x1b51   :  { %v1591_v34 = vpop.permute.xlu0 %1590 }
0x1b52   :  { %1593 = vst.msk [vmem:[#allocation5] sm:$0xff] %vm153_vm0, %v1591_v34 }
0x1b55   :  { %v1597_v35 = vld [vmem:[#allocation4] sm:$0xff] }
0x1b56   :  { %2773 = vmatmul.mubr.msk.f32.vlgmr.msra.gmra.mxu0 %vm153_vm0, %v1597_v35  ;;  %1595 = vst.msk [vmem:[#allocation2 + $0x8] sm:$0xff] %vm153_vm0, %v1597_v35 }
0x1b57   :  { %2787 = vmatpush3.msra.mxu0 %v3362_v16  ;;  %2794 = vmatprep.mubr.msk.f32.mxu0 %vm2989_vm1, %v2988_v0 }
0x1b58   :  { %2788 = vmatprep.subr.mxu0 %v2988_v0 }
0x1b59   :  { %v1683_v38 = vld [vmem:[#allocation5] sm:$0xff]  ;;  %2789 = vmatpush3.msra.mxu0 %v3367_v17 }
0x1b5a   :  { %1685 = vrot.lane.b32.xlu0 %v1683_v38, %s2992_s12  ;;  %2790 = vmatprep.subr.mxu0 %v2988_v0 }
0x1b5b   :  { %2791 = vmatpush3.msra.mxu0 %v3376_v19 }
0x1b5c   :  { %2792 = vmatprep.subr.mxu0 %v2988_v0 }
0x1b5d   :  { %2793 = vmatpush3.msra.mxu0 %v3388_v22 }
0x1b5e   :  { %2808 = vmatprep.subr.mxu0 %v2988_v0 }
0x1bcc   :  { %v1686_v37 = vpop.permute.xlu0 %1685 }
0x1c16   :  { %v1671_v43 = vpop.f32.mrf.mxu0 }
0x1c17   :  { %v1675_v44 = vadd.f32 %v1671_v43, %v1302_v42  ;;  %v1310_v43 = vadd.f32 %v3429_v39, %v3489_v41 }
0x1c18   :  { %v2774_v45 = vpop.f32.mrf.mxu0 }
0x1c19   :  { %2932 = vtanh.f32 %v1675_v44  ;;  %v1676_v25 = vsub.f32 0.0, %v1675_v44 }
0x1c1b   :  { %v1677_v48 = vmul.f32 1.442695, %v1676_v25 }
0x1c1d   :  { %2934 = vpow2.f32 %v1677_v48 }
0x1c26   :  { %v2933_v46 = vpop.eup %2932 }
0x1c27   :  { %1690 = vrot.lane.b32.xlu1 %v2933_v46, %s2991_s11 }
0x1c2a   :  { %v2935_v49 = vpop.eup %2934 }
0x1c2b   :  { %v1679_v50 = vadd.f32 1.0, %v2935_v49 }
0x1c2d   :  { %2936 = vrcp.f32 %v1679_v50 }
0x1c3a   :  { %v2937_v51 = vpop.eup %2936 }
0x1c3b   :  { %v1688_v54 = vmul.f32 %v2937_v51, %v1686_v37 }
0x1c99   :  { %v1691_v52 = vpop.permute.xlu1 %1690 }
0x1c9a   :  { %v1693_v53 = vmul.f32 %v2937_v51, %v1691_v52 }
0x1c9c   :  { %1695 = vrot.lane.b32.xlu1 %v1693_v53, %s2992_s12 }
0x1ca0   :  { %1705 = vrot.lane.b32.xlu1 %v1597_v35, %s2993_s14 }
0x1ca4   :  { %1716 = vrot.lane.b32.xlu1 %v1683_v38, %s2992_s12 }
0x1d0e   :  { %v1696_v55 = vpop.permute.xlu1 %1695 }
0x1d0f   :  { %v1698_v56 = vadd.f32 %v1696_v55, %v1688_v54 }
0x1d11   :  { %2938 = vtanh.f32 %v1698_v56 }
0x1d12   :  { %v1706_v57 = vpop.permute.xlu1 %1705 }
0x1d16   :  { %v1717_v60 = vpop.permute.xlu1 %1716 }
0x1d17   :  { %v1719_v61 = vsel %vm529_vm5, %v1698_v56, %v1717_v60 }
0x1d1e   :  { %v2939_v1 = vpop.eup %2938 }
0x1d1f   :  { %1701 = vrot.lane.b32.xlu0 %v2939_v1, %s2991_s11 }
0x1d91   :  { %v1702_v58 = vpop.permute.xlu0 %1701 }
0x1d92   :  { %v1704_v59 = vmul.f32 %v2937_v51, %v1702_v58 }
0x1d94   :  { %v1708_v3 = vsel %vm529_vm5, %v1704_v59, %v1706_v57 }
0x1d95   :  { %1710 = vrot.lane.b32.xlu0 %v1708_v3, %s2992_s12 }
0x1d99   :  { %1721 = vrot.lane.b32.xlu0 %v1719_v61, %s2993_s14 }
0x1e07   :  { %v1711_v6 = vpop.permute.xlu0 %1710 }
0x1e08   :  { %1713 = vst.msk [vmem:[#allocation4] sm:$0xff] %vm153_vm0, %v1711_v6 }
0x1e0b   :  { %v1722_v63 = vpop.permute.xlu0 %1721 }
0x1e0c   :  { %1724 = vst.msk [vmem:[#allocation5] sm:$0xff] %vm153_vm0, %v1722_v63 }
0x1e0f   :  { %v1728_v11 = vld [vmem:[#allocation4] sm:$0xff] }
0x1e10   :  { %2784 = vmatmul.mubr.msk.f32.vlgmr.msra.gmra.mxu1 %vm153_vm0, %v1728_v11  ;;  %1726 = vst.msk [vmem:[#allocation2 + $0x10] sm:$0xff] %vm153_vm0, %v1728_v11 }
0x1e11   :  { %2798 = vmatpush3.msra.mxu1 %v3362_v16  ;;  %2805 = vmatprep.mubr.msk.f32.mxu1 %vm2989_vm1, %v2988_v0 }
0x1e12   :  { %2799 = vmatprep.subr.mxu1 %v2988_v0 }
0x1e13   :  { %v1814_v2 = vld [vmem:[#allocation5] sm:$0xff]  ;;  %2800 = vmatpush3.msra.mxu1 %v3367_v17 }
0x1e14   :  { %1816 = vrot.lane.b32.xlu0 %v1814_v2, %s2992_s12  ;;  %2801 = vmatprep.subr.mxu1 %v2988_v0 }
0x1e15   :  { %2802 = vmatpush3.msra.mxu1 %v3376_v19 }
0x1e16   :  { %2803 = vmatprep.subr.mxu1 %v2988_v0 }
0x1e17   :  { %2804 = vmatpush3.msra.mxu1 %v3388_v22 }
0x1e18   :  { %2819 = vmatprep.subr.mxu1 %v2988_v0 }
0x1e86   :  { %v1817_v62 = vpop.permute.xlu0 %1816 }
0x1ed0   :  { %v1802_v4 = vpop.f32.mrf.mxu1 }
0x1ed1   :  { %v1806_v5 = vadd.f32 %v1802_v4, %v1305_v28 }
0x1ed2   :  { %v2785_v7 = vpop.f32.mrf.mxu1 }
0x1ed3   :  { %2940 = vtanh.f32 %v1806_v5  ;;  %v1807_v15 = vsub.f32 0.0, %v1806_v5 }
0x1ed5   :  { %v1808_v27 = vmul.f32 1.442695, %v1807_v15 }
0x1ed7   :  { %2942 = vpow2.f32 %v1808_v27 }
0x1ee0   :  { %v2941_v8 = vpop.eup %2940 }
0x1ee1   :  { %1821 = vrot.lane.b32.xlu1 %v2941_v8, %s2991_s11 }
0x1ee4   :  { %v2943_v47 = vpop.eup %2942 }
0x1ee5   :  { %v1810_v9 = vadd.f32 1.0, %v2943_v47 }
0x1ee7   :  { %2944 = vrcp.f32 %v1810_v9 }
0x1ef4   :  { %v2945_v10 = vpop.eup %2944 }
0x1ef5   :  { %v1819_v18 = vmul.f32 %v2945_v10, %v1817_v62 }
0x1f53   :  { %v1822_v12 = vpop.permute.xlu1 %1821 }
0x1f54   :  { %v1824_v14 = vmul.f32 %v2945_v10, %v1822_v12 }
0x1f56   :  { %1826 = vrot.lane.b32.xlu1 %v1824_v14, %s2992_s12 }
0x1f5a   :  { %1836 = vrot.lane.b32.xlu1 %v1728_v11, %s2993_s14 }
0x1f5e   :  { %1847 = vrot.lane.b32.xlu1 %v1814_v2, %s2992_s12 }
0x1fc8   :  { %v1827_v20 = vpop.permute.xlu1 %1826 }
0x1fc9   :  { %v1829_v21 = vadd.f32 %v1827_v20, %v1819_v18 }
0x1fcb   :  { %2946 = vtanh.f32 %v1829_v21 }
0x1fcc   :  { %v1837_v24 = vpop.permute.xlu1 %1836 }
0x1fd0   :  { %v1848_v32 = vpop.permute.xlu1 %1847 }
0x1fd1   :  { %v1850_v33 = vsel %vm661_vm6, %v1829_v21, %v1848_v32 }
0x1fd8   :  { %v2947_v23 = vpop.eup %2946 }
0x1fd9   :  { %1832 = vrot.lane.b32.xlu0 %v2947_v23, %s2991_s11 }
0x204b   :  { %v1833_v29 = vpop.permute.xlu0 %1832 }
0x204c   :  { %v1835_v30 = vmul.f32 %v2945_v10, %v1833_v29 }
0x204e   :  { %v1839_v31 = vsel %vm661_vm6, %v1835_v30, %v1837_v24 }
0x204f   :  { %1841 = vrot.lane.b32.xlu0 %v1839_v31, %s2992_s12 }
0x2053   :  { %1852 = vrot.lane.b32.xlu0 %v1850_v33, %s2993_s14  ;;  %v1318_v33 = vadd.f32 %v3487_v40, %v3429_v39 }
0x20c1   :  { %v1842_v34 = vpop.permute.xlu0 %1841 }
0x20c2   :  { %1844 = vst.msk [vmem:[#allocation4] sm:$0xff] %vm153_vm0, %v1842_v34 }
0x20c5   :  { %v1853_v35 = vpop.permute.xlu0 %1852 }
0x20c6   :  { %1855 = vst.msk [vmem:[#allocation5] sm:$0xff] %vm153_vm0, %v1853_v35 }
0x20c9   :  { %v1859_v38 = vld [vmem:[#allocation4] sm:$0xff] }
0x20ca   :  { %2795 = vmatmul.mubr.msk.f32.vlgmr.msra.gmra.mxu0 %vm153_vm0, %v1859_v38  ;;  %1857 = vst.msk [vmem:[#allocation2 + $0x18] sm:$0xff] %vm153_vm0, %v1859_v38 }
0x20cb   :  { %2809 = vmatpush3.msra.mxu0 %v3362_v16  ;;  %2816 = vmatprep.mubr.msk.f32.mxu0 %vm2989_vm1, %v2988_v0 }
0x20cc   :  { %2810 = vmatprep.subr.mxu0 %v2988_v0 }
0x20cd   :  { %v1945_v42 = vld [vmem:[#allocation5] sm:$0xff]  ;;  %2811 = vmatpush3.msra.mxu0 %v3367_v17 }
0x20ce   :  { %1947 = vrot.lane.b32.xlu0 %v1945_v42, %s2992_s12  ;;  %2812 = vmatprep.subr.mxu0 %v2988_v0 }
0x20cf   :  { %2813 = vmatpush3.msra.mxu0 %v3376_v19 }
0x20d0   :  { %2814 = vmatprep.subr.mxu0 %v2988_v0 }
0x20d1   :  { %2815 = vmatpush3.msra.mxu0 %v3388_v22 }
0x20d2   :  { %2830 = vmatprep.subr.mxu0 %v2988_v0 }
0x2140   :  { %v1948_v41 = vpop.permute.xlu0 %1947 }
0x218a   :  { %v1933_v44 = vpop.f32.mrf.mxu0 }
0x218b   :  { %v1937_v45 = vadd.f32 %v1933_v44, %v1310_v43 }
0x218c   :  { %v2796_v46 = vpop.f32.mrf.mxu0 }
0x218d   :  { %2948 = vtanh.f32 %v1937_v45  ;;  %v1938_v48 = vsub.f32 0.0, %v1937_v45 }
0x218f   :  { %v1939_v49 = vmul.f32 1.442695, %v1938_v48 }
0x2191   :  { %2950 = vpow2.f32 %v1939_v49 }
0x219a   :  { %v2949_v25 = vpop.eup %2948 }
0x219b   :  { %1952 = vrot.lane.b32.xlu1 %v2949_v25, %s2991_s11 }
0x219e   :  { %v2951_v50 = vpop.eup %2950 }
0x219f   :  { %v1941_v51 = vadd.f32 1.0, %v2951_v50 }
0x21a1   :  { %2952 = vrcp.f32 %v1941_v51 }
0x21ae   :  { %v2953_v52 = vpop.eup %2952 }
0x21af   :  { %v1950_v54 = vmul.f32 %v2953_v52, %v1948_v41 }
0x220d   :  { %v1953_v53 = vpop.permute.xlu1 %1952 }
0x220e   :  { %v1955_v37 = vmul.f32 %v2953_v52, %v1953_v53 }
0x2210   :  { %1957 = vrot.lane.b32.xlu1 %v1955_v37, %s2992_s12 }
0x2214   :  { %1967 = vrot.lane.b32.xlu1 %v1859_v38, %s2993_s14 }
0x2218   :  { %1978 = vrot.lane.b32.xlu1 %v1945_v42, %s2992_s12 }
0x2282   :  { %v1958_v55 = vpop.permute.xlu1 %1957 }
0x2283   :  { %v1960_v56 = vadd.f32 %v1958_v55, %v1950_v54 }
0x2285   :  { %2954 = vtanh.f32 %v1960_v56 }
0x2286   :  { %v1968_v57 = vpop.permute.xlu1 %1967 }
0x228a   :  { %v1979_v60 = vpop.permute.xlu1 %1978 }
0x228b   :  { %v1981_v61 = vsel %vm793_vm7, %v1960_v56, %v1979_v60  ;;  %v1321_v60 = vadd.f32 %v3491_v13, %v3429_v39 }
0x2292   :  { %v2955_v1 = vpop.eup %2954 }
0x2293   :  { %1963 = vrot.lane.b32.xlu0 %v2955_v1, %s2991_s11 }
0x2305   :  { %v1964_v58 = vpop.permute.xlu0 %1963 }
0x2306   :  { %v1966_v59 = vmul.f32 %v2953_v52, %v1964_v58 }
0x2308   :  { %v1970_v3 = vsel %vm793_vm7, %v1966_v59, %v1968_v57 }
0x2309   :  { %1972 = vrot.lane.b32.xlu0 %v1970_v3, %s2992_s12 }
0x230d   :  { %1983 = vrot.lane.b32.xlu0 %v1981_v61, %s2993_s14 }
0x237b   :  { %v1973_v6 = vpop.permute.xlu0 %1972 }
0x237c   :  { %1975 = vst.msk [vmem:[#allocation4] sm:$0xff] %vm153_vm0, %v1973_v6 }
0x237f   :  { %v1984_v63 = vpop.permute.xlu0 %1983 }
0x2380   :  { %1986 = vst.msk [vmem:[#allocation5] sm:$0xff] %vm153_vm0, %v1984_v63 }
0x2383   :  { %v1990_v11 = vld [vmem:[#allocation4] sm:$0xff] }
0x2384   :  { %2806 = vmatmul.mubr.msk.f32.vlgmr.msra.gmra.mxu1 %vm153_vm0, %v1990_v11  ;;  %1988 = vst.msk [vmem:[#allocation2 + $0x20] sm:$0xff] %vm153_vm0, %v1990_v11 }
0x2385   :  { %2820 = vmatpush3.msra.mxu1 %v3362_v16  ;;  %2827 = vmatprep.mubr.msk.f32.mxu1 %vm2989_vm1, %v2988_v0  ;;  %v1313_v16 = vadd.f32 %v3429_v39, %v3493_v26  ;;  %v2473_v39 = vld [vmem:[%s3664_s1] sm:$0xff] }
0x2386   :  { %2821 = vmatprep.subr.mxu1 %v2988_v0 }
0x2387   :  { %v2076_v2 = vld [vmem:[#allocation5] sm:$0xff]  ;;  %2822 = vmatpush3.msra.mxu1 %v3367_v17 }
0x2388   :  { %2078 = vrot.lane.b32.xlu0 %v2076_v2, %s2992_s12  ;;  %2823 = vmatprep.subr.mxu1 %v2988_v0 }
0x2389   :  { %2824 = vmatpush3.msra.mxu1 %v3376_v19 }
0x238a   :  { %2825 = vmatprep.subr.mxu1 %v2988_v0 }
0x238b   :  { %2826 = vmatpush3.msra.mxu1 %v3388_v22 }
0x23fa   :  { %v2079_v22 = vpop.permute.xlu0 %2078 }
0x2444   :  { %v2064_v28 = vpop.f32.mrf.mxu1 }
0x2445   :  { %v2068_v4 = vadd.f32 %v2064_v28, %v1313_v16 }
0x2446   :  { %v2807_v5 = vpop.f32.mrf.mxu1 }
0x2447   :  { %2956 = vtanh.f32 %v2068_v4  ;;  %v2069_v17 = vsub.f32 0.0, %v2068_v4 }
0x2449   :  { %v2070_v8 = vmul.f32 1.442695, %v2069_v17 }
0x244b   :  { %2958 = vpow2.f32 %v2070_v8 }
0x2454   :  { %v2957_v7 = vpop.eup %2956 }
0x2455   :  { %2083 = vrot.lane.b32.xlu1 %v2957_v7, %s2991_s11 }
0x2458   :  { %v2959_v15 = vpop.eup %2958 }
0x2459   :  { %v2072_v27 = vadd.f32 1.0, %v2959_v15 }
0x245b   :  { %2960 = vrcp.f32 %v2072_v27 }
0x2468   :  { %v2961_v19 = vpop.eup %2960 }
0x2469   :  { %v2081_v26 = vmul.f32 %v2961_v19, %v2079_v22  ;;  %v2384_v22 = vld [vmem:[%s3668_s8 + $0x8] sm:$0xff] }
0x24c7   :  { %v2084_v47 = vpop.permute.xlu1 %2083 }
0x24c8   :  { %v2086_v9 = vmul.f32 %v2961_v19, %v2084_v47  ;;  %v2386_v47 = vld [vmem:[%s3668_s8 + $0x18] sm:$0xff] }
0x24ca   :  { %2088 = vrot.lane.b32.xlu1 %v2086_v9, %s2992_s12  ;;  %v2385_v9 = vld [vmem:[%s3668_s8 + $0x10] sm:$0xff] }
0x24ce   :  { %2098 = vrot.lane.b32.xlu1 %v1990_v11, %s2993_s14 }
0x24d2   :  { %2109 = vrot.lane.b32.xlu1 %v2076_v2, %s2992_s12 }
0x253c   :  { %v2089_v10 = vpop.permute.xlu1 %2088 }
0x253d   :  { %v2091_v12 = vadd.f32 %v2089_v10, %v2081_v26  ;;  %v2383_v26 = vld [vmem:[%s3668_s8] sm:$0xff] }
0x253f   :  { %2962 = vtanh.f32 %v2091_v12 }
0x2540   :  { %v2099_v62 = vpop.permute.xlu1 %2098 }
0x2544   :  { %v2110_v23 = vpop.permute.xlu1 %2109 }
0x2545   :  { %v2112_v24 = vsel %vm925_vm8, %v2091_v12, %v2110_v23 }
0x254c   :  { %v2963_v14 = vpop.eup %2962 }
0x254d   :  { %2094 = vrot.lane.b32.xlu0 %v2963_v14, %s2991_s11 }
0x25bf   :  { %v2095_v18 = vpop.permute.xlu0 %2094 }
0x25c0   :  { %v2097_v20 = vmul.f32 %v2961_v19, %v2095_v18 }
0x25c2   :  { %v2101_v21 = vsel %vm925_vm8, %v2097_v20, %v2099_v62 }
0x25c3   :  { %2103 = vrot.lane.b32.xlu0 %v2101_v21, %s2992_s12 }
0x25c7   :  { %2114 = vrot.lane.b32.xlu0 %v2112_v24, %s2993_s14 }
0x2635   :  { %v2104_v29 = vpop.permute.xlu0 %2103 }
0x2636   :  { %2106 = vst.msk [vmem:[#allocation4] sm:$0xff] %vm153_vm0, %v2104_v29  ;;  %v2534_v29 = vld [vmem:[%s3669_s9] ss:$0 sm:$0xff] }
0x2639   :  { %v2115_v30 = vpop.permute.xlu0 %2114 }
0x263a   :  { %2117 = vst.msk [vmem:[#allocation5] sm:$0xff] %vm153_vm0, %v2115_v30 }
0x263d   :  { %v2121_v31 = vld [vmem:[#allocation4] sm:$0xff] }
0x263e   :  { %2817 = vmatmul.mubr.msk.f32.vlgmr.msra.gmra.mxu0 %vm153_vm0, %v2121_v31  ;;  %2119 = vst.msk [vmem:[#allocation2 + $0x28] sm:$0xff] %vm153_vm0, %v2121_v31 }
0x263f   :  { %2838 = vmatprep.mubr.msk.f32.mxu0 %vm2989_vm1, %v2988_v0  ;;  %2831 = vmatpush3.msra.mxu0 %v2386_v47 }
0x2640   :  { %2832 = vmatprep.subr.mxu0 %v2988_v0 }
0x2641   :  { %v2207_v32 = vld [vmem:[#allocation5] sm:$0xff]  ;;  %2833 = vmatpush3.msra.mxu0 %v2385_v9 }
0x2642   :  { %2209 = vrot.lane.b32.xlu0 %v2207_v32, %s2992_s12  ;;  %2834 = vmatprep.subr.mxu0 %v2988_v0 }
0x2643   :  { %2835 = vmatpush3.msra.mxu0 %v2384_v22 }
0x2644   :  { %2836 = vmatprep.subr.mxu0 %v2988_v0 }
0x2645   :  { %2837 = vmatpush3.msra.mxu0 %v2383_v26 }
0x26b4   :  { %v2210_v40 = vpop.permute.xlu0 %2209 }
0x26fe   :  { %v2195_v34 = vpop.f32.mrf.mxu0 }
0x26ff   :  { %v2199_v35 = vadd.f32 %v2195_v34, %v1318_v33 }
0x2700   :  { %v2818_v38 = vpop.f32.mrf.mxu0 }
0x2701   :  { %2964 = vtanh.f32 %v2199_v35  ;;  %v2200_v43 = vsub.f32 0.0, %v2199_v35 }
0x2703   :  { %v2201_v44 = vmul.f32 1.442695, %v2200_v43 }
0x2705   :  { %2966 = vpow2.f32 %v2201_v44 }
0x270e   :  { %v2965_v42 = vpop.eup %2964 }
0x270f   :  { %2214 = vrot.lane.b32.xlu1 %v2965_v42, %s2991_s11 }
0x2712   :  { %v2967_v45 = vpop.eup %2966 }
0x2713   :  { %v2203_v46 = vadd.f32 1.0, %v2967_v45 }
0x2715   :  { %2968 = vrcp.f32 %v2203_v46 }
0x2722   :  { %v2969_v25 = vpop.eup %2968 }
0x2723   :  { %v2212_v50 = vmul.f32 %v2969_v25, %v2210_v40 }
0x2781   :  { %v2215_v48 = vpop.permute.xlu1 %2214 }
0x2782   :  { %v2217_v49 = vmul.f32 %v2969_v25, %v2215_v48 }
0x2784   :  { %2219 = vrot.lane.b32.xlu1 %v2217_v49, %s2992_s12 }
0x2788   :  { %2229 = vrot.lane.b32.xlu1 %v2121_v31, %s2993_s14 }
0x278c   :  { %2240 = vrot.lane.b32.xlu1 %v2207_v32, %s2992_s12 }
0x27f6   :  { %v2220_v51 = vpop.permute.xlu1 %2219 }
0x27f7   :  { %v2222_v52 = vadd.f32 %v2220_v51, %v2212_v50 }
0x27f9   :  { %2970 = vtanh.f32 %v2222_v52 }
0x27fa   :  { %v2230_v37 = vpop.permute.xlu1 %2229 }
0x27fe   :  { %v2241_v56 = vpop.permute.xlu1 %2240 }
0x27ff   :  { %v2243_v1 = vsel %vm1057_vm9, %v2222_v52, %v2241_v56 }
0x2806   :  { %v2971_v53 = vpop.eup %2970 }
0x2807   :  { %2225 = vrot.lane.b32.xlu0 %v2971_v53, %s2991_s11 }
0x2879   :  { %v2226_v41 = vpop.permute.xlu0 %2225 }
0x287a   :  { %v2228_v54 = vmul.f32 %v2969_v25, %v2226_v41 }
0x287c   :  { %v2232_v55 = vsel %vm1057_vm9, %v2228_v54, %v2230_v37 }
0x287d   :  { %2234 = vrot.lane.b32.xlu0 %v2232_v55, %s2992_s12 }
0x2881   :  { %2245 = vrot.lane.b32.xlu0 %v2243_v1, %s2993_s14 }
0x28ef   :  { %v2235_v57 = vpop.permute.xlu0 %2234 }
0x28f0   :  { %2237 = vst.msk [vmem:[#allocation4] sm:$0xff] %vm153_vm0, %v2235_v57 }
0x28f3   :  { %v2246_v58 = vpop.permute.xlu0 %2245 }
0x28f4   :  { %2248 = vst.msk [vmem:[#allocation5] sm:$0xff] %vm153_vm0, %v2246_v58 }
0x28f7   :  { %v2252_v59 = vld [vmem:[#allocation4] sm:$0xff] }
0x28f8   :  { %2828 = vmatmul.mubr.msk.f32.vlgmr.msra.gmra.mxu1 %vm153_vm0, %v2252_v59  ;;  %2250 = vst.msk [vmem:[#allocation2 + $0x30] sm:$0xff] %vm153_vm0, %v2252_v59 }
0x28fb   :  { %v2338_v3 = vld [vmem:[#allocation5] sm:$0xff] }
0x28fc   :  { %2340 = vrot.lane.b32.xlu0 %v2338_v3, %s2992_s12 }
0x296e   :  { %v2341_v13 = vpop.permute.xlu0 %2340 }
0x29b8   :  { %v2326_v61 = vpop.f32.mrf.mxu1 }
0x29b9   :  { %v2330_v6 = vadd.f32 %v2326_v61, %v1321_v60 }
0x29ba   :  { %v2829_v63 = vpop.f32.mrf.mxu1 }
0x29bb   :  { %2972 = vtanh.f32 %v2330_v6  ;;  %v2331_v2 = vsub.f32 0.0, %v2330_v6 }
0x29bd   :  { %v2332_v16 = vmul.f32 1.442695, %v2331_v2 }
0x29bf   :  { %2974 = vpow2.f32 %v2332_v16 }
0x29c8   :  { %v2973_v11 = vpop.eup %2972 }
0x29c9   :  { %2345 = vrot.lane.b32.xlu1 %v2973_v11, %s2991_s11 }
0x29cc   :  { %v2975_v28 = vpop.eup %2974 }
0x29cd   :  { %v2334_v4 = vadd.f32 1.0, %v2975_v28 }
0x29cf   :  { %2976 = vrcp.f32 %v2334_v4 }
0x29dc   :  { %v2977_v5 = vpop.eup %2976 }
0x29dd   :  { %v2343_v8 = vmul.f32 %v2977_v5, %v2341_v13 }
0x2a3b   :  { %v2346_v7 = vpop.permute.xlu1 %2345 }
0x2a3c   :  { %v2348_v17 = vmul.f32 %v2977_v5, %v2346_v7 }
0x2a3e   :  { %2350 = vrot.lane.b32.xlu1 %v2348_v17, %s2992_s12 }
0x2a42   :  { %2360 = vrot.lane.b32.xlu1 %v2252_v59, %s2993_s14 }
0x2a46   :  { %2475 = vperm.xlu1 %2847, %v2473_v39  }
0x2ab0   :  { %v2351_v15 = vpop.permute.xlu1 %2350 }
0x2ab1   :  { %v2353_v27 = vadd.f32 %v2351_v15, %v2343_v8 }
0x2ab3   :  { %2978 = vtanh.f32 %v2353_v27 }
0x2ab4   :  { %v2361_v14 = vpop.permute.xlu1 %2360 }
0x2ac0   :  { %v2979_v19 = vpop.eup %2978 }
0x2ac1   :  { %2356 = vrot.lane.b32.xlu0 %v2979_v19, %s2991_s11  ;;  %v2476_v23 = vpop.permute.xlu1 %2475 }
0x2ac2   :  { %vm2477_vm12 = vcmp.gt.s32.totalorder %v2476_v23, 0 }
0x2b33   :  { %v2357_v10 = vpop.permute.xlu0 %2356 }
0x2b34   :  { %v2359_v12 = vmul.f32 %v2977_v5, %v2357_v10 }
0x2b36   :  { %v2363_v62 = vsel %vm1189_vm10, %v2359_v12, %v2361_v14 }
0x2b37   :  { %2365 = vrot.lane.b32.xlu0 %v2363_v62, %s2992_s12 }
0x2b3b   :  { %2371 = vrot.lane.b32.xlu0 %v2338_v3, %s2992_s12 }
0x2ba9   :  { %v2366_v18 = vpop.permute.xlu0 %2365 }
0x2baa   :  { %2368 = vst.msk [vmem:[#allocation4] sm:$0xff] %vm153_vm0, %v2366_v18 }
0x2bad   :  { %v2372_v20 = vpop.permute.xlu0 %2371 }
0x2bae   :  { %v2374_v0 = vsel %vm1189_vm10, %v2353_v27, %v2372_v20 }
0x2baf   :  { %2376 = vrot.lane.b32.xlu1 %v2374_v0, %s2993_s14 }
0x2bb1   :  { %v2380_v21 = vld [vmem:[#allocation4] sm:$0xff] }
0x2bb2   :  { %2381 = vst.msk [vmem:[#allocation2 + $0x38] sm:$0xff] %vm153_vm0, %v2380_v21  ;;  %2839 = vmatmul.mubr.msk.f32.vlgmr.msra.gmra.mxu0 %vm153_vm0, %v2380_v21 }
0x2c21   :  { %v2377_v24 = vpop.permute.xlu1 %2376 }
0x2c22   :  { %2379 = vst.msk [vmem:[#allocation5] sm:$0xff] %vm153_vm0, %v2377_v24 }
0x2c72   :  { %v2463_v30 = vpop.f32.mrf.mxu0 }
0x2c73   :  { %v2464_v31 = vadd.f32 %v2534_v29, %v2463_v30 }
0x2c74   :  { %v2840_v32 = vpop.f32.mrf.mxu0 }
0x2c75   :  { %v2467_v36 = vsub.f32 0.0, %v2464_v31 }
0x2c77   :  { %v2468_v33 = vmul.f32 1.442695, %v2467_v36 }
0x2c79   :  { %2980 = vpow2.f32 %v2468_v33 }
0x2c86   :  { %v2981_v34 = vpop.eup %2980 }
0x2c87   :  { %v2470_v35 = vadd.f32 1.0, %v2981_v34 }
0x2c89   :  { %2982 = vrcp.f32 %v2470_v35 }
0x2c96   :  { %v2983_v38 = vpop.eup %2982 }
0x2c97   :  { %v2478_v42 = vsel %vm2477_vm12, %v2983_v38, -inf }
0x2c98   :  { %v2480_v43 = vsel %vm2479_vm11, %v2478_v42, -inf }
0x2c99   :  { %v2481_v44 = vrot.slane %v2480_v43, 4 }
0x2c9b   :  { %v2482_v45 = vmax.f32 %v2480_v43, %v2481_v44 }
0x2c9d   :  { %v2483_v46 = vrot.slane %v2482_v45, 2 }
0x2c9f   :  { %v2484_v25 = vmax.f32 %v2482_v45, %v2483_v46 }
0x2ca1   :  { %v2485_v48 = vrot.slane %v2484_v25, 1 }
0x2ca3   :  { %v2486_v49 = vmax.f32 %v2484_v25, %v2485_v48 }
0x2ca5   :  { %v2487_v40 = vsub.f32 %v2983_v38, %v2486_v49 }
0x2ca7   :  { %v2488_v50 = vmul.f32 1.442695, %v2487_v40 }
0x2ca9   :  { %2984 = vpow2.f32 %v2488_v50 }
0x2cb6   :  { %v2985_v51 = vpop.eup %2984 }
0x2cb7   :  { %v2490_v52 = vsel %vm2477_vm12, %v2985_v51, 0.0 }
0x2cb8   :  { %v2491_v53 = vsel %vm2479_vm11, %v2490_v52, 0.0 }
0x2cb9   :  { %v2492_v37 = vrot.slane %v2491_v53, 4 }
0x2cbb   :  { %v2493_v41 = vadd.f32 %v2492_v37, %v2491_v53 }
0x2cbd   :  { %v2494_v54 = vrot.slane %v2493_v41, 2 }
0x2cbf   :  { %v2495_v55 = vadd.f32 %v2494_v54, %v2493_v41 }
0x2cc1   :  { %v2496_v56 = vrot.slane %v2495_v55, 1 }
0x2cc3   :  { %v2497_v1 = vadd.f32 %v2496_v56, %v2495_v55 }
0x2cc5   :  { %2986 = vrcp.f32 %v2497_v1 }
0x2cd2   :  { %v2987_v57 = vpop.eup %2986 }
0x2cd3   :  { %v2499_v58 = vmul.f32 %v2987_v57, %v2490_v52 }
0x2cd5   :  { %2500 = vst.msk [vmem:[%s3670_s10] sm:$0xff] %vm2479_vm11, %v2499_v58 }

</bundles_post_ra>
